<compile_context>
chip_gen: v5e
topology: v5e:2x2
jax: 0.10.0
libtpu: 0.0.40
codegen_flags: <defaults>
</compile_context>

<pallas_src>
import jax
import jax.numpy as jnp
from jax.experimental import pallas as pl
from jax.experimental.pallas import tpu as pltpu

_BN_EPS = 1e-5
_LANE = 128
_MAX_TILE_M = 512

# ConvTranspose2d(k=4, s=2, p=1): output phase -> ((input offset, kernel index), ...)
#   output row oy = 2*r + py reads input row r + dy with kernel row ky for each (dy, ky).
_TAPS = {0: ((0, 1), (-1, 3)), 1: ((1, 0), (0, 2))}


def _round_up(x, m):
    return (x + m - 1) // m * m


def _compiler_params():
    return pltpu.CompilerParams(
        dimension_semantics=("parallel", "parallel"),   # v7x: shard grid over both TCs
        vmem_limit_bytes=32 * 1024 * 1024,              # explicit budget, safe on v5e/v6e/v7x
    )


# ---------------------------------------------------------------------------
# Pallas kernels
# ---------------------------------------------------------------------------
def _mm_stats_kernel(p_ref, w_ref, y_ref, sum_ref, ssq_ref):
    # p_ref: (TILE_M, K) bf16, w_ref: (K, C) bf16 -> y: (TILE_M, C) f32 on the MXU.
    y = jnp.dot(p_ref[...], w_ref[...], preferred_element_type=jnp.float32)
    y_ref[...] = y
    # Per-tile partial BN statistics kept as sublane-aligned (8, C) sub-sums; the tiny
    # cross-tile reduction to global batch stats happens outside the kernel.
    yg = y.reshape(-1, 8, y.shape[-1])
    sum_ref[...] = jnp.sum(yg, axis=0)
    ssq_ref[...] = jnp.sum(yg * yg, axis=0)


def _bn_relu_kernel(y_ref, scale_ref, shift_ref, o_ref):
    # Elementwise epilogue in f32 (v5e has no bf16 VPU), bf16 store for the next layer.
    a = jnp.maximum(y_ref[...] * scale_ref[...] + shift_ref[...], 0.0)
    o_ref[...] = a.astype(o_ref.dtype)


def _mm_tanh_kernel(p_ref, w_ref, o_ref):
    y = jnp.dot(p_ref[...], w_ref[...], preferred_element_type=jnp.float32)
    o_ref[...] = jnp.tanh(y)


# ---------------------------------------------------------------------------
# Glue: phase-decomposed patch construction (shift + concat only, no gathers).
# ---------------------------------------------------------------------------
def _build_phase_patches(x, m_pad):
    # x: (N, Hi, Wi, Cp) bf16 -> (4, m_pad, 4*Cp) bf16; phase index = py*2 + px.
    n, hi, wi, cp = x.shape
    m_p = n * hi * wi
    xp = jnp.pad(x, ((0, 0), (1, 1), (1, 1), (0, 0)))
    phases = []
    for py in (0, 1):
        for px in (0, 1):
            taps = []
            for dy, _ky in _TAPS[py]:
                for dx, _kx in _TAPS[px]:
                    taps.append(xp[:, 1 + dy:1 + dy + hi, 1 + dx:1 + dx + wi, :])
            p = jnp.concatenate(taps, axis=-1).reshape(m_p, 4 * cp)
            if m_pad > m_p:
                p = jnp.pad(p, ((0, m_pad - m_p), (0, 0)))
            phases.append(p)
    return jnp.stack(phases, axis=0)


# ---------------------------------------------------------------------------
# One stride-2 ConvTranspose2d (+BN+ReLU | +Tanh) layer.
# ---------------------------------------------------------------------------
def _convT_s2_layer(x, w_ph, gamma_p=None, beta_p=None, final=False):
    n, hi, wi, cp = x.shape
    k_dim = 4 * cp                       # contraction dim (multiple of 512)
    c_out = w_ph.shape[-1]               # lane-padded output channels (multiple of 128)
    m_p = n * hi * wi                    # rows per phase
    tile_m = min(_MAX_TILE_M, _round_up(m_p, 8))
    m_pad = _round_up(m_p, tile_m)
    n_tiles = m_pad // tile_m

    patches = _build_phase_patches(x, m_pad)                     # (4, m_pad, k_dim) bf16

    p_spec = pl.BlockSpec((None, tile_m, k_dim), lambda ph, m: (ph, m, 0))
    w_spec = pl.BlockSpec((None, k_dim, c_out), lambda ph, m: (ph, 0, 0))
    y_spec = pl.BlockSpec((None, tile_m, c_out), lambda ph, m: (ph, m, 0))

    if final:
        act = pl.pallas_call(
            _mm_tanh_kernel,
            grid=(4, n_tiles),
            in_specs=[p_spec, w_spec],
            out_specs=y_spec,
            out_shape=jax.ShapeDtypeStruct((4, m_pad, c_out), jnp.float32),
            compiler_params=_compiler_params(),
        )(patches, w_ph)
    else:
        stat_spec = pl.BlockSpec((None, None, 8, c_out), lambda ph, m: (ph, m, 0, 0))
        y, sums, ssqs = pl.pallas_call(
            _mm_stats_kernel,
            grid=(4, n_tiles),
            in_specs=[p_spec, w_spec],
            out_specs=[y_spec, stat_spec, stat_spec],
            out_shape=[
                jax.ShapeDtypeStruct((4, m_pad, c_out), jnp.float32),
                jax.ShapeDtypeStruct((4, n_tiles, 8, c_out), jnp.float32),
                jax.ShapeDtypeStruct((4, n_tiles, 8, c_out), jnp.float32),
            ],
            compiler_params=_compiler_params(),
        )(patches, w_ph)

        # Global training-mode batch stats over all real rows of all 4 phases
        # (padded rows contribute exactly 0 to both sums, so only the divisor matters).
        m_total = jnp.float32(4 * m_p)
        mean = jnp.sum(sums, axis=(0, 1, 2)) / m_total
        var = jnp.maximum(jnp.sum(ssqs, axis=(0, 1, 2)) / m_total - mean * mean, 0.0)
        scale = gamma_p * jax.lax.rsqrt(var + _BN_EPS)
        shift = beta_p - mean * scale

        act = pl.pallas_call(
            _bn_relu_kernel,
            grid=(4, n_tiles),
            in_specs=[
                y_spec,
                pl.BlockSpec((1, c_out), lambda ph, m: (0, 0)),
                pl.BlockSpec((1, c_out), lambda ph, m: (0, 0)),
            ],
            out_specs=y_spec,
            out_shape=jax.ShapeDtypeStruct((4, m_pad, c_out), jnp.bfloat16),
            compiler_params=_compiler_params(),
        )(y, scale.reshape(1, c_out), shift.reshape(1, c_out))

    # Interleave the 4 phases back: out[:, 2r+py, 2c+px, :] = phase(py,px)[:, r, c, :]
    act = act[:, :m_p, :].reshape(2, 2, n, hi, wi, c_out)
    act = jnp.transpose(act, (2, 3, 0, 4, 1, 5)).reshape(n, 2 * hi, 2 * wi, c_out)
    return act


# ---------------------------------------------------------------------------
# Layer 1: ConvTranspose2d(dim_z, ngf*8, init_size, 1, 0) on a 1x1 input == linear map.
# Per the perf review this tiny (N x dim_z) GEMM stays in plain JAX.
# ---------------------------------------------------------------------------
def _head_layer(z2d, w1, gamma, beta, cout_pad):
    dim_z, c1, k, _ = w1.shape
    y = jnp.dot(z2d, w1.reshape(dim_z, c1 * k * k))
    y = jnp.transpose(y.reshape(-1, c1, k, k), (0, 2, 3, 1))      # (N, k, k, C1) NHWC
    mean = jnp.mean(y, axis=(0, 1, 2))
    var = jnp.mean(jnp.square(y - mean), axis=(0, 1, 2))          # biased, training-mode BN
    a = jnp.maximum((y - mean) * jax.lax.rsqrt(var + _BN_EPS) * gamma + beta, 0.0)
    if cout_pad > c1:
        a = jnp.pad(a, ((0, 0), (0, 0), (0, 0), (0, cout_pad - c1)))
    return a.astype(jnp.bfloat16)


# ---------------------------------------------------------------------------
# Parameter packing (done ONCE, outside the jitted forward): phase-decomposed,
# channel-padded, pre-transposed bf16 weight matrices + padded gamma/beta.
# ---------------------------------------------------------------------------
def _prep_s2_weight(w, cin_pad, cout_pad):
    # w: (Cin, Cout, 4, 4) in PyTorch ConvTranspose2d layout.
    cin, cout = w.shape[0], w.shape[1]
    wp = jnp.zeros((cin_pad, cout_pad, 4, 4), jnp.float32).at[:cin, :cout].set(w)
    mats = []
    for py in (0, 1):
        for px in (0, 1):
            blocks = []
            for _dy, ky in _TAPS[py]:
                for _dx, kx in _TAPS[px]:
                    blocks.append(wp[:, :, ky, kx])               # (cin_pad, cout_pad)
            mats.append(jnp.concatenate(blocks, axis=0))          # (4*cin_pad, cout_pad)
    return jnp.stack(mats, axis=0).astype(jnp.bfloat16)           # (4, 4*cin_pad, cout_pad)


def prepare_params(params):
    w1, g1, b1, _k1, _s1, _p1 = params[0]
    head = (w1, g1, b1, _round_up(w1.shape[1], _LANE))

    layers = []
    for (w, gamma, beta, k, s, p) in params[1:]:
        assert (k, s, p) == (4, 2, 1)
        cin, cout = w.shape[0], w.shape[1]
        cin_pad = _round_up(cin, _LANE)
        cout_pad = _round_up(cout, _LANE)
        w_ph = _prep_s2_weight(w, cin_pad, cout_pad)
        # gamma/beta padded with zeros so padded channels normalize to exactly 0.
        gamma_p = jnp.zeros((cout_pad,), jnp.float32).at[:cout].set(gamma)
        beta_p = jnp.zeros((cout_pad,), jnp.float32).at[:cout].set(beta)
        layers.append((w_ph, gamma_p, beta_p))
    n_channels = params[-1][0].shape[1]
    return head, tuple(layers), n_channels


# ---------------------------------------------------------------------------
# Full VideoGenerator.forward.
# ---------------------------------------------------------------------------
def video_generator_forward(z_nchw, packed):
    head, layers, n_channels = packed
    z2d = z_nchw.reshape(z_nchw.shape[0], -1).astype(jnp.float32)   # (N, dim_z, 1, 1) -> (N, dim_z)
    x = _head_layer(z2d, *head)
    n_layers = len(layers)
    for i, (w_ph, gamma_p, beta_p) in enumerate(layers):
        x = _convT_s2_layer(x, w_ph, gamma_p, beta_p, final=(i == n_layers - 1))
    x = x[..., :n_channels]                                          # drop lane padding
    return jnp.transpose(x, (0, 3, 1, 2)).astype(jnp.float32)        # NHWC -> NCHW


def init_params(key, n_channels, dim_z, ngf, init_size):
    """Deterministic synthetic parameters (DCGAN-style normal(0, 0.02) conv weights)."""
    layer_cfg = [
        (dim_z,   ngf * 8, init_size, 1, 0),
        (ngf * 8, ngf * 4, 4, 2, 1),
        (ngf * 4, ngf * 2, 4, 2, 1),
        (ngf * 2, ngf,     4, 2, 1),
        (ngf,     n_channels, 4, 2, 1),
    ]
    params = []
    for (cin, cout, k, s, p) in layer_cfg:
        key, kw, kg, kb = jax.random.split(key, 4)
        w = 0.02 * jax.random.normal(kw, (cin, cout, k, k), dtype=jnp.float32)
        gamma = 1.0 + 0.1 * jax.random.normal(kg, (cout,), dtype=jnp.float32)
        beta = 0.1 * jax.random.normal(kb, (cout,), dtype=jnp.float32)
        params.append((w, gamma, beta, k, s, p))
    return params


if __name__ == "__main__":
    # Small config consistent with the module (img_size divisible by 16).
    N = 2
    n_channels = 3
    dim_z_content = 8
    dim_z_motion = 8
    ngf = 16
    img_size = 32
    init_size = img_size // 16            # 2
    dim_z = dim_z_content + dim_z_motion  # 16

    key = jax.random.PRNGKey(0)
    k_param, k_z = jax.random.split(key)
    params = init_params(k_param, n_channels, dim_z, ngf, init_size)
    packed = prepare_params(params)       # weight repacking hoisted out of the forward

    z = jax.random.normal(k_z, (N, dim_z, 1, 1), dtype=jnp.float32)  # PyTorch-style NCHW latent

    fwd = jax.jit(lambda zz: video_generator_forward(zz, packed))
    out = jax.block_until_ready(fwd(z))

    assert out.shape == (N, n_channels, img_size, img_size), out.shape
    assert bool(jnp.all(jnp.isfinite(out)))
    assert bool(jnp.all(jnp.abs(out) <= 1.0 + 1e-6))  # tanh range
    print("KERNEL_OK")
</pallas_src>

<mosaic_0001>
module attributes {stable_mosaic.version = 11 : i64} {
  func.func @_mm_stats_kernel(%arg0: i32, %arg1: i32, %arg2: memref<1x8x512xbf16, #tpu.memory_space<vmem>>, %arg3: memref<1x512x128xbf16, #tpu.memory_space<vmem>>, %arg4: memref<1x8x128xf32, #tpu.memory_space<vmem>>, %arg5: memref<1x1x8x128xf32, #tpu.memory_space<vmem>>, %arg6: memref<1x1x8x128xf32, #tpu.memory_space<vmem>>) attributes {dimension_semantics = [#tpu.dimension_semantics<parallel>, #tpu.dimension_semantics<parallel>], iteration_bounds = array<i64: 4, 1>, scalar_prefetch = 0 : i64, scratch_operands = 0 : i64, tpu.core_type = #tpu.core_type<tc>, window_params = [{transform_indices = @transform_0, window_bounds = array<i64: 1, 8, 512>}, {transform_indices = @transform_1, window_bounds = array<i64: 1, 512, 128>}, {transform_indices = @transform_2, window_bounds = array<i64: 1, 8, 128>}, {transform_indices = @transform_3, window_bounds = array<i64: 1, 1, 8, 128>}, {transform_indices = @transform_4, window_bounds = array<i64: 1, 1, 8, 128>}]} {
    %c0 = arith.constant 0 : index
    %c0_0 = arith.constant 0 : index
    %c0_1 = arith.constant 0 : index
    %0 = vector.load %arg2[%c0, %c0_0, %c0_1] : memref<1x8x512xbf16, #tpu.memory_space<vmem>>, vector<1x8x512xbf16>
    %1 = vector.shape_cast %0 : vector<1x8x512xbf16> to vector<8x512xbf16>
    %c0_2 = arith.constant 0 : index
    %c0_3 = arith.constant 0 : index
    %c0_4 = arith.constant 0 : index
    %2 = vector.load %arg3[%c0_2, %c0_3, %c0_4] : memref<1x512x128xbf16, #tpu.memory_space<vmem>>, vector<1x512x128xbf16>
    %3 = vector.shape_cast %2 : vector<1x512x128xbf16> to vector<512x128xbf16>
    %cst = arith.constant dense<0.000000e+00> : vector<8x128xf32>
    %4 = tpu.matmul %1, %3, %cst {dimension_numbers = #tpu.dot_dimension_numbers<[1], [0], [0], [1], [0, 0, 1, 1], [], []>} : vector<8x512xbf16>, vector<512x128xbf16>, vector<8x128xf32> -> vector<8x128xf32>
    %c0_5 = arith.constant 0 : index
    %c0_6 = arith.constant 0 : index
    %c0_7 = arith.constant 0 : index
    %5 = vector.load %arg4[%c0_5, %c0_6, %c0_7] : memref<1x8x128xf32, #tpu.memory_space<vmem>>, vector<1x8x128xf32>
    %6 = vector.shape_cast %5 : vector<1x8x128xf32> to vector<8x128xf32>
    %7 = vector.shape_cast %4 : vector<8x128xf32> to vector<1x8x128xf32>
    tpu.vector_store %arg4[%c0_5, %c0_6, %c0_7], %7 {strides = array<i32>} : memref<1x8x128xf32, #tpu.memory_space<vmem>>, vector<1x8x128xf32>,
    %8 = vector.shape_cast %4 : vector<8x128xf32> to vector<1x8x128xf32>
    %cst_8 = arith.constant dense<0.000000e+00> : vector<8x128xf32>
    %9 = vector.multi_reduction <add>, %8, %cst_8 [0] : vector<1x8x128xf32> to vector<8x128xf32>
    %c0_9 = arith.constant 0 : index
    %c0_10 = arith.constant 0 : index
    %c0_11 = arith.constant 0 : index
    %c0_12 = arith.constant 0 : index
    %10 = vector.load %arg5[%c0_9, %c0_10, %c0_11, %c0_12] : memref<1x1x8x128xf32, #tpu.memory_space<vmem>>, vector<1x1x8x128xf32>
    %11 = vector.shape_cast %10 : vector<1x1x8x128xf32> to vector<8x128xf32>
    %12 = vector.shape_cast %9 : vector<8x128xf32> to vector<1x1x8x128xf32>
    tpu.vector_store %arg5[%c0_9, %c0_10, %c0_11, %c0_12], %12 {strides = array<i32>} : memref<1x1x8x128xf32, #tpu.memory_space<vmem>>, vector<1x1x8x128xf32>,
    %13 = arith.mulf %8, %8 : vector<1x8x128xf32>
    %cst_13 = arith.constant dense<0.000000e+00> : vector<8x128xf32>
    %14 = vector.multi_reduction <add>, %13, %cst_13 [0] : vector<1x8x128xf32> to vector<8x128xf32>
    %c0_14 = arith.constant 0 : index
    %c0_15 = arith.constant 0 : index
    %c0_16 = arith.constant 0 : index
    %c0_17 = arith.constant 0 : index
    %15 = vector.load %arg6[%c0_14, %c0_15, %c0_16, %c0_17] : memref<1x1x8x128xf32, #tpu.memory_space<vmem>>, vector<1x1x8x128xf32>
    %16 = vector.shape_cast %15 : vector<1x1x8x128xf32> to vector<8x128xf32>
    %17 = vector.shape_cast %14 : vector<8x128xf32> to vector<1x1x8x128xf32>
    tpu.vector_store %arg6[%c0_14, %c0_15, %c0_16, %c0_17], %17 {strides = array<i32>} : memref<1x1x8x128xf32, #tpu.memory_space<vmem>>, vector<1x1x8x128xf32>,
    return
  }
  func.func @transform_0(%arg0: i32, %arg1: i32) -> (i32, i32, i32) {
    %c0_i32 = arith.constant 0 : i32
    %c0_i32_0 = arith.constant 0 : i32
    return %arg0, %arg1, %c0_i32 : i32, i32, i32
  }
  func.func @transform_1(%arg0: i32, %arg1: i32) -> (i32, i32, i32) {
    %c0_i32 = arith.constant 0 : i32
    %c0_i32_0 = arith.constant 0 : i32
    %c0_i32_1 = arith.constant 0 : i32
    return %arg0, %c0_i32, %c0_i32_0 : i32, i32, i32
  }
  func.func @transform_2(%arg0: i32, %arg1: i32) -> (i32, i32, i32) {
    %c0_i32 = arith.constant 0 : i32
    %c0_i32_0 = arith.constant 0 : i32
    return %arg0, %arg1, %c0_i32 : i32, i32, i32
  }
  func.func @transform_3(%arg0: i32, %arg1: i32) -> (i32, i32, i32, i32) {
    %c0_i32 = arith.constant 0 : i32
    %c0_i32_0 = arith.constant 0 : i32
    %c0_i32_1 = arith.constant 0 : i32
    return %arg0, %arg1, %c0_i32, %c0_i32_0 : i32, i32, i32, i32
  }
  func.func @transform_4(%arg0: i32, %arg1: i32) -> (i32, i32, i32, i32) {
    %c0_i32 = arith.constant 0 : i32
    %c0_i32_0 = arith.constant 0 : i32
    %c0_i32_1 = arith.constant 0 : i32
    return %arg0, %arg1, %c0_i32, %c0_i32_0 : i32, i32, i32, i32
  }
}

module attributes {stable_mosaic.version = 11 : i64} {
  func.func @_bn_relu_kernel(%arg0: i32, %arg1: i32, %arg2: memref<1x8x128xf32, #tpu.memory_space<vmem>>, %arg3: memref<1x128xf32, #tpu.memory_space<vmem>>, %arg4: memref<1x128xf32, #tpu.memory_space<vmem>>, %arg5: memref<1x8x128xbf16, #tpu.memory_space<vmem>>) attributes {dimension_semantics = [#tpu.dimension_semantics<parallel>, #tpu.dimension_semantics<parallel>], iteration_bounds = array<i64: 4, 1>, scalar_prefetch = 0 : i64, scratch_operands = 0 : i64, tpu.core_type = #tpu.core_type<tc>, window_params = [{transform_indices = @transform_0, window_bounds = array<i64: 1, 8, 128>}, {pipeline_mode = #tpu.pipeline_mode<synchronous>, transform_indices = @transform_1, window_bounds = array<i64: 1, 128>}, {pipeline_mode = #tpu.pipeline_mode<synchronous>, transform_indices = @transform_2, window_bounds = array<i64: 1, 128>}, {transform_indices = @transform_3, window_bounds = array<i64: 1, 8, 128>}]} {
    %c0 = arith.constant 0 : index
    %c0_0 = arith.constant 0 : index
    %c0_1 = arith.constant 0 : index
    %0 = vector.load %arg2[%c0, %c0_0, %c0_1] : memref<1x8x128xf32, #tpu.memory_space<vmem>>, vector<1x8x128xf32>
    %1 = vector.shape_cast %0 : vector<1x8x128xf32> to vector<8x128xf32>
    %c0_2 = arith.constant 0 : index
    %c0_3 = arith.constant 0 : index
    %2 = vector.load %arg3[%c0_2, %c0_3] : memref<1x128xf32, #tpu.memory_space<vmem>>, vector<1x128xf32>
    %3 = vector.broadcast %2 : vector<1x128xf32> to vector<8x128xf32>
    %4 = arith.mulf %1, %3 : vector<8x128xf32>
    %c0_4 = arith.constant 0 : index
    %c0_5 = arith.constant 0 : index
    %5 = vector.load %arg4[%c0_4, %c0_5] : memref<1x128xf32, #tpu.memory_space<vmem>>, vector<1x128xf32>
    %6 = vector.broadcast %5 : vector<1x128xf32> to vector<8x128xf32>
    %7 = arith.addf %4, %6 : vector<8x128xf32>
    %cst = arith.constant 0.000000e+00 : f32
    %8 = vector.broadcast %cst : f32 to vector<8x128xf32>
    %9 = arith.maximumf %7, %8 : vector<8x128xf32>
    %10 = arith.truncf %9 : vector<8x128xf32> to vector<8x128xbf16>
    %c0_6 = arith.constant 0 : index
    %c0_7 = arith.constant 0 : index
    %c0_8 = arith.constant 0 : index
    %11 = vector.load %arg5[%c0_6, %c0_7, %c0_8] : memref<1x8x128xbf16, #tpu.memory_space<vmem>>, vector<1x8x128xbf16>
    %12 = vector.shape_cast %11 : vector<1x8x128xbf16> to vector<8x128xbf16>
    %13 = vector.shape_cast %10 : vector<8x128xbf16> to vector<1x8x128xbf16>
    tpu.vector_store %arg5[%c0_6, %c0_7, %c0_8], %13 {strides = array<i32>} : memref<1x8x128xbf16, #tpu.memory_space<vmem>>, vector<1x8x128xbf16>,
    return
  }
  func.func @transform_0(%arg0: i32, %arg1: i32) -> (i32, i32, i32) {
    %c0_i32 = arith.constant 0 : i32
    %c0_i32_0 = arith.constant 0 : i32
    return %arg0, %arg1, %c0_i32 : i32, i32, i32
  }
  func.func @transform_1(%arg0: i32, %arg1: i32) -> (i32, i32) {
    %c0_i32 = arith.constant 0 : i32
    %c0_i32_0 = arith.constant 0 : i32
    %c0_i32_1 = arith.constant 0 : i32
    return %c0_i32, %c0_i32_0 : i32, i32
  }
  func.func @transform_2(%arg0: i32, %arg1: i32) -> (i32, i32) {
    %c0_i32 = arith.constant 0 : i32
    %c0_i32_0 = arith.constant 0 : i32
    %c0_i32_1 = arith.constant 0 : i32
    return %c0_i32, %c0_i32_0 : i32, i32
  }
  func.func @transform_3(%arg0: i32, %arg1: i32) -> (i32, i32, i32) {
    %c0_i32 = arith.constant 0 : i32
    %c0_i32_0 = arith.constant 0 : i32
    return %arg0, %arg1, %c0_i32 : i32, i32, i32
  }
}

module attributes {stable_mosaic.version = 11 : i64} {
  func.func @_mm_stats_kernel(%arg0: i32, %arg1: i32, %arg2: memref<1x32x512xbf16, #tpu.memory_space<vmem>>, %arg3: memref<1x512x128xbf16, #tpu.memory_space<vmem>>, %arg4: memref<1x32x128xf32, #tpu.memory_space<vmem>>, %arg5: memref<1x1x8x128xf32, #tpu.memory_space<vmem>>, %arg6: memref<1x1x8x128xf32, #tpu.memory_space<vmem>>) attributes {dimension_semantics = [#tpu.dimension_semantics<parallel>, #tpu.dimension_semantics<parallel>], iteration_bounds = array<i64: 4, 1>, scalar_prefetch = 0 : i64, scratch_operands = 0 : i64, tpu.core_type = #tpu.core_type<tc>, window_params = [{transform_indices = @transform_0, window_bounds = array<i64: 1, 32, 512>}, {transform_indices = @transform_1, window_bounds = array<i64: 1, 512, 128>}, {transform_indices = @transform_2, window_bounds = array<i64: 1, 32, 128>}, {transform_indices = @transform_3, window_bounds = array<i64: 1, 1, 8, 128>}, {transform_indices = @transform_4, window_bounds = array<i64: 1, 1, 8, 128>}]} {
    %c0 = arith.constant 0 : index
    %c0_0 = arith.constant 0 : index
    %c0_1 = arith.constant 0 : index
    %0 = vector.load %arg2[%c0, %c0_0, %c0_1] : memref<1x32x512xbf16, #tpu.memory_space<vmem>>, vector<1x32x512xbf16>
    %1 = vector.shape_cast %0 : vector<1x32x512xbf16> to vector<32x512xbf16>
    %c0_2 = arith.constant 0 : index
    %c0_3 = arith.constant 0 : index
    %c0_4 = arith.constant 0 : index
    %2 = vector.load %arg3[%c0_2, %c0_3, %c0_4] : memref<1x512x128xbf16, #tpu.memory_space<vmem>>, vector<1x512x128xbf16>
    %3 = vector.shape_cast %2 : vector<1x512x128xbf16> to vector<512x128xbf16>
    %cst = arith.constant dense<0.000000e+00> : vector<32x128xf32>
    %4 = tpu.matmul %1, %3, %cst {dimension_numbers = #tpu.dot_dimension_numbers<[1], [0], [0], [1], [0, 0, 1, 1], [], []>} : vector<32x512xbf16>, vector<512x128xbf16>, vector<32x128xf32> -> vector<32x128xf32>
    %c0_5 = arith.constant 0 : index
    %c0_6 = arith.constant 0 : index
    %c0_7 = arith.constant 0 : index
    %5 = vector.load %arg4[%c0_5, %c0_6, %c0_7] : memref<1x32x128xf32, #tpu.memory_space<vmem>>, vector<1x32x128xf32>
    %6 = vector.shape_cast %5 : vector<1x32x128xf32> to vector<32x128xf32>
    %7 = vector.shape_cast %4 : vector<32x128xf32> to vector<1x32x128xf32>
    tpu.vector_store %arg4[%c0_5, %c0_6, %c0_7], %7 {strides = array<i32>} : memref<1x32x128xf32, #tpu.memory_space<vmem>>, vector<1x32x128xf32>,
    %8 = vector.shape_cast %4 : vector<32x128xf32> to vector<4x8x128xf32>
    %cst_8 = arith.constant dense<0.000000e+00> : vector<8x128xf32>
    %9 = vector.multi_reduction <add>, %8, %cst_8 [0] : vector<4x8x128xf32> to vector<8x128xf32>
    %c0_9 = arith.constant 0 : index
    %c0_10 = arith.constant 0 : index
    %c0_11 = arith.constant 0 : index
    %c0_12 = arith.constant 0 : index
    %10 = vector.load %arg5[%c0_9, %c0_10, %c0_11, %c0_12] : memref<1x1x8x128xf32, #tpu.memory_space<vmem>>, vector<1x1x8x128xf32>
    %11 = vector.shape_cast %10 : vector<1x1x8x128xf32> to vector<8x128xf32>
    %12 = vector.shape_cast %9 : vector<8x128xf32> to vector<1x1x8x128xf32>
    tpu.vector_store %arg5[%c0_9, %c0_10, %c0_11, %c0_12], %12 {strides = array<i32>} : memref<1x1x8x128xf32, #tpu.memory_space<vmem>>, vector<1x1x8x128xf32>,
    %13 = arith.mulf %8, %8 : vector<4x8x128xf32>
    %cst_13 = arith.constant dense<0.000000e+00> : vector<8x128xf32>
    %14 = vector.multi_reduction <add>, %13, %cst_13 [0] : vector<4x8x128xf32> to vector<8x128xf32>
    %c0_14 = arith.constant 0 : index
    %c0_15 = arith.constant 0 : index
    %c0_16 = arith.constant 0 : index
    %c0_17 = arith.constant 0 : index
    %15 = vector.load %arg6[%c0_14, %c0_15, %c0_16, %c0_17] : memref<1x1x8x128xf32, #tpu.memory_space<vmem>>, vector<1x1x8x128xf32>
    %16 = vector.shape_cast %15 : vector<1x1x8x128xf32> to vector<8x128xf32>
    %17 = vector.shape_cast %14 : vector<8x128xf32> to vector<1x1x8x128xf32>
    tpu.vector_store %arg6[%c0_14, %c0_15, %c0_16, %c0_17], %17 {strides = array<i32>} : memref<1x1x8x128xf32, #tpu.memory_space<vmem>>, vector<1x1x8x128xf32>,
    return
  }
  func.func @transform_0(%arg0: i32, %arg1: i32) -> (i32, i32, i32) {
    %c0_i32 = arith.constant 0 : i32
    %c0_i32_0 = arith.constant 0 : i32
    return %arg0, %arg1, %c0_i32 : i32, i32, i32
  }
  func.func @transform_1(%arg0: i32, %arg1: i32) -> (i32, i32, i32) {
    %c0_i32 = arith.constant 0 : i32
    %c0_i32_0 = arith.constant 0 : i32
    %c0_i32_1 = arith.constant 0 : i32
    return %arg0, %c0_i32, %c0_i32_0 : i32, i32, i32
  }
  func.func @transform_2(%arg0: i32, %arg1: i32) -> (i32, i32, i32) {
    %c0_i32 = arith.constant 0 : i32
    %c0_i32_0 = arith.constant 0 : i32
    return %arg0, %arg1, %c0_i32 : i32, i32, i32
  }
  func.func @transform_3(%arg0: i32, %arg1: i32) -> (i32, i32, i32, i32) {
    %c0_i32 = arith.constant 0 : i32
    %c0_i32_0 = arith.constant 0 : i32
    %c0_i32_1 = arith.constant 0 : i32
    return %arg0, %arg1, %c0_i32, %c0_i32_0 : i32, i32, i32, i32
  }
  func.func @transform_4(%arg0: i32, %arg1: i32) -> (i32, i32, i32, i32) {
    %c0_i32 = arith.constant 0 : i32
    %c0_i32_0 = arith.constant 0 : i32
    %c0_i32_1 = arith.constant 0 : i32
    return %arg0, %arg1, %c0_i32, %c0_i32_0 : i32, i32, i32, i32
  }
}

module attributes {stable_mosaic.version = 11 : i64} {
  func.func @_bn_relu_kernel(%arg0: i32, %arg1: i32, %arg2: memref<1x32x128xf32, #tpu.memory_space<vmem>>, %arg3: memref<1x128xf32, #tpu.memory_space<vmem>>, %arg4: memref<1x128xf32, #tpu.memory_space<vmem>>, %arg5: memref<1x32x128xbf16, #tpu.memory_space<vmem>>) attributes {dimension_semantics = [#tpu.dimension_semantics<parallel>, #tpu.dimension_semantics<parallel>], iteration_bounds = array<i64: 4, 1>, scalar_prefetch = 0 : i64, scratch_operands = 0 : i64, tpu.core_type = #tpu.core_type<tc>, window_params = [{transform_indices = @transform_0, window_bounds = array<i64: 1, 32, 128>}, {pipeline_mode = #tpu.pipeline_mode<synchronous>, transform_indices = @transform_1, window_bounds = array<i64: 1, 128>}, {pipeline_mode = #tpu.pipeline_mode<synchronous>, transform_indices = @transform_2, window_bounds = array<i64: 1, 128>}, {transform_indices = @transform_3, window_bounds = array<i64: 1, 32, 128>}]} {
    %c0 = arith.constant 0 : index
    %c0_0 = arith.constant 0 : index
    %c0_1 = arith.constant 0 : index
    %0 = vector.load %arg2[%c0, %c0_0, %c0_1] : memref<1x32x128xf32, #tpu.memory_space<vmem>>, vector<1x32x128xf32>
    %1 = vector.shape_cast %0 : vector<1x32x128xf32> to vector<32x128xf32>
    %c0_2 = arith.constant 0 : index
    %c0_3 = arith.constant 0 : index
    %2 = vector.load %arg3[%c0_2, %c0_3] : memref<1x128xf32, #tpu.memory_space<vmem>>, vector<1x128xf32>
    %3 = vector.broadcast %2 : vector<1x128xf32> to vector<32x128xf32>
    %4 = arith.mulf %1, %3 : vector<32x128xf32>
    %c0_4 = arith.constant 0 : index
    %c0_5 = arith.constant 0 : index
    %5 = vector.load %arg4[%c0_4, %c0_5] : memref<1x128xf32, #tpu.memory_space<vmem>>, vector<1x128xf32>
    %6 = vector.broadcast %5 : vector<1x128xf32> to vector<32x128xf32>
    %7 = arith.addf %4, %6 : vector<32x128xf32>
    %cst = arith.constant 0.000000e+00 : f32
    %8 = vector.broadcast %cst : f32 to vector<32x128xf32>
    %9 = arith.maximumf %7, %8 : vector<32x128xf32>
    %10 = arith.truncf %9 : vector<32x128xf32> to vector<32x128xbf16>
    %c0_6 = arith.constant 0 : index
    %c0_7 = arith.constant 0 : index
    %c0_8 = arith.constant 0 : index
    %11 = vector.load %arg5[%c0_6, %c0_7, %c0_8] : memref<1x32x128xbf16, #tpu.memory_space<vmem>>, vector<1x32x128xbf16>
    %12 = vector.shape_cast %11 : vector<1x32x128xbf16> to vector<32x128xbf16>
    %13 = vector.shape_cast %10 : vector<32x128xbf16> to vector<1x32x128xbf16>
    tpu.vector_store %arg5[%c0_6, %c0_7, %c0_8], %13 {strides = array<i32>} : memref<1x32x128xbf16, #tpu.memory_space<vmem>>, vector<1x32x128xbf16>,
    return
  }
  func.func @transform_0(%arg0: i32, %arg1: i32) -> (i32, i32, i32) {
    %c0_i32 = arith.constant 0 : i32
    %c0_i32_0 = arith.constant 0 : i32
    return %arg0, %arg1, %c0_i32 : i32, i32, i32
  }
  func.func @transform_1(%arg0: i32, %arg1: i32) -> (i32, i32) {
    %c0_i32 = arith.constant 0 : i32
    %c0_i32_0 = arith.constant 0 : i32
    %c0_i32_1 = arith.constant 0 : i32
    return %c0_i32, %c0_i32_0 : i32, i32
  }
  func.func @transform_2(%arg0: i32, %arg1: i32) -> (i32, i32) {
    %c0_i32 = arith.constant 0 : i32
    %c0_i32_0 = arith.constant 0 : i32
    %c0_i32_1 = arith.constant 0 : i32
    return %c0_i32, %c0_i32_0 : i32, i32
  }
  func.func @transform_3(%arg0: i32, %arg1: i32) -> (i32, i32, i32) {
    %c0_i32 = arith.constant 0 : i32
    %c0_i32_0 = arith.constant 0 : i32
    return %arg0, %arg1, %c0_i32 : i32, i32, i32
  }
}

module attributes {stable_mosaic.version = 11 : i64} {
  func.func @_mm_stats_kernel(%arg0: i32, %arg1: i32, %arg2: memref<1x128x512xbf16, #tpu.memory_space<vmem>>, %arg3: memref<1x512x128xbf16, #tpu.memory_space<vmem>>, %arg4: memref<1x128x128xf32, #tpu.memory_space<vmem>>, %arg5: memref<1x1x8x128xf32, #tpu.memory_space<vmem>>, %arg6: memref<1x1x8x128xf32, #tpu.memory_space<vmem>>) attributes {dimension_semantics = [#tpu.dimension_semantics<parallel>, #tpu.dimension_semantics<parallel>], iteration_bounds = array<i64: 4, 1>, scalar_prefetch = 0 : i64, scratch_operands = 0 : i64, tpu.core_type = #tpu.core_type<tc>, window_params = [{transform_indices = @transform_0, window_bounds = array<i64: 1, 128, 512>}, {transform_indices = @transform_1, window_bounds = array<i64: 1, 512, 128>}, {transform_indices = @transform_2, window_bounds = array<i64: 1, 128, 128>}, {transform_indices = @transform_3, window_bounds = array<i64: 1, 1, 8, 128>}, {transform_indices = @transform_4, window_bounds = array<i64: 1, 1, 8, 128>}]} {
    %c0 = arith.constant 0 : index
    %c0_0 = arith.constant 0 : index
    %c0_1 = arith.constant 0 : index
    %0 = vector.load %arg2[%c0, %c0_0, %c0_1] : memref<1x128x512xbf16, #tpu.memory_space<vmem>>, vector<1x128x512xbf16>
    %1 = vector.shape_cast %0 : vector<1x128x512xbf16> to vector<128x512xbf16>
    %c0_2 = arith.constant 0 : index
    %c0_3 = arith.constant 0 : index
    %c0_4 = arith.constant 0 : index
    %2 = vector.load %arg3[%c0_2, %c0_3, %c0_4] : memref<1x512x128xbf16, #tpu.memory_space<vmem>>, vector<1x512x128xbf16>
    %3 = vector.shape_cast %2 : vector<1x512x128xbf16> to vector<512x128xbf16>
    %cst = arith.constant dense<0.000000e+00> : vector<128x128xf32>
    %4 = tpu.matmul %1, %3, %cst {dimension_numbers = #tpu.dot_dimension_numbers<[1], [0], [0], [1], [0, 0, 1, 1], [], []>} : vector<128x512xbf16>, vector<512x128xbf16>, vector<128x128xf32> -> vector<128x128xf32>
    %c0_5 = arith.constant 0 : index
    %c0_6 = arith.constant 0 : index
    %c0_7 = arith.constant 0 : index
    %5 = vector.load %arg4[%c0_5, %c0_6, %c0_7] : memref<1x128x128xf32, #tpu.memory_space<vmem>>, vector<1x128x128xf32>
    %6 = vector.shape_cast %5 : vector<1x128x128xf32> to vector<128x128xf32>
    %7 = vector.shape_cast %4 : vector<128x128xf32> to vector<1x128x128xf32>
    tpu.vector_store %arg4[%c0_5, %c0_6, %c0_7], %7 {strides = array<i32>} : memref<1x128x128xf32, #tpu.memory_space<vmem>>, vector<1x128x128xf32>,
    %8 = vector.shape_cast %4 : vector<128x128xf32> to vector<16x8x128xf32>
    %cst_8 = arith.constant dense<0.000000e+00> : vector<8x128xf32>
    %9 = vector.multi_reduction <add>, %8, %cst_8 [0] : vector<16x8x128xf32> to vector<8x128xf32>
    %c0_9 = arith.constant 0 : index
    %c0_10 = arith.constant 0 : index
    %c0_11 = arith.constant 0 : index
    %c0_12 = arith.constant 0 : index
    %10 = vector.load %arg5[%c0_9, %c0_10, %c0_11, %c0_12] : memref<1x1x8x128xf32, #tpu.memory_space<vmem>>, vector<1x1x8x128xf32>
    %11 = vector.shape_cast %10 : vector<1x1x8x128xf32> to vector<8x128xf32>
    %12 = vector.shape_cast %9 : vector<8x128xf32> to vector<1x1x8x128xf32>
    tpu.vector_store %arg5[%c0_9, %c0_10, %c0_11, %c0_12], %12 {strides = array<i32>} : memref<1x1x8x128xf32, #tpu.memory_space<vmem>>, vector<1x1x8x128xf32>,
    %13 = arith.mulf %8, %8 : vector<16x8x128xf32>
    %cst_13 = arith.constant dense<0.000000e+00> : vector<8x128xf32>
    %14 = vector.multi_reduction <add>, %13, %cst_13 [0] : vector<16x8x128xf32> to vector<8x128xf32>
    %c0_14 = arith.constant 0 : index
    %c0_15 = arith.constant 0 : index
    %c0_16 = arith.constant 0 : index
    %c0_17 = arith.constant 0 : index
    %15 = vector.load %arg6[%c0_14, %c0_15, %c0_16, %c0_17] : memref<1x1x8x128xf32, #tpu.memory_space<vmem>>, vector<1x1x8x128xf32>
    %16 = vector.shape_cast %15 : vector<1x1x8x128xf32> to vector<8x128xf32>
    %17 = vector.shape_cast %14 : vector<8x128xf32> to vector<1x1x8x128xf32>
    tpu.vector_store %arg6[%c0_14, %c0_15, %c0_16, %c0_17], %17 {strides = array<i32>} : memref<1x1x8x128xf32, #tpu.memory_space<vmem>>, vector<1x1x8x128xf32>,
    return
  }
  func.func @transform_0(%arg0: i32, %arg1: i32) -> (i32, i32, i32) {
    %c0_i32 = arith.constant 0 : i32
    %c0_i32_0 = arith.constant 0 : i32
    return %arg0, %arg1, %c0_i32 : i32, i32, i32
  }
  func.func @transform_1(%arg0: i32, %arg1: i32) -> (i32, i32, i32) {
    %c0_i32 = arith.constant 0 : i32
    %c0_i32_0 = arith.constant 0 : i32
    %c0_i32_1 = arith.constant 0 : i32
    return %arg0, %c0_i32, %c0_i32_0 : i32, i32, i32
  }
  func.func @transform_2(%arg0: i32, %arg1: i32) -> (i32, i32, i32) {
    %c0_i32 = arith.constant 0 : i32
    %c0_i32_0 = arith.constant 0 : i32
    return %arg0, %arg1, %c0_i32 : i32, i32, i32
  }
  func.func @transform_3(%arg0: i32, %arg1: i32) -> (i32, i32, i32, i32) {
    %c0_i32 = arith.constant 0 : i32
    %c0_i32_0 = arith.constant 0 : i32
    %c0_i32_1 = arith.constant 0 : i32
    return %arg0, %arg1, %c0_i32, %c0_i32_0 : i32, i32, i32, i32
  }
  func.func @transform_4(%arg0: i32, %arg1: i32) -> (i32, i32, i32, i32) {
    %c0_i32 = arith.constant 0 : i32
    %c0_i32_0 = arith.constant 0 : i32
    %c0_i32_1 = arith.constant 0 : i32
    return %arg0, %arg1, %c0_i32, %c0_i32_0 : i32, i32, i32, i32
  }
}

module attributes {stable_mosaic.version = 11 : i64} {
  func.func @_bn_relu_kernel(%arg0: i32, %arg1: i32, %arg2: memref<1x128x128xf32, #tpu.memory_space<vmem>>, %arg3: memref<1x128xf32, #tpu.memory_space<vmem>>, %arg4: memref<1x128xf32, #tpu.memory_space<vmem>>, %arg5: memref<1x128x128xbf16, #tpu.memory_space<vmem>>) attributes {dimension_semantics = [#tpu.dimension_semantics<parallel>, #tpu.dimension_semantics<parallel>], iteration_bounds = array<i64: 4, 1>, scalar_prefetch = 0 : i64, scratch_operands = 0 : i64, tpu.core_type = #tpu.core_type<tc>, window_params = [{transform_indices = @transform_0, window_bounds = array<i64: 1, 128, 128>}, {pipeline_mode = #tpu.pipeline_mode<synchronous>, transform_indices = @transform_1, window_bounds = array<i64: 1, 128>}, {pipeline_mode = #tpu.pipeline_mode<synchronous>, transform_indices = @transform_2, window_bounds = array<i64: 1, 128>}, {transform_indices = @transform_3, window_bounds = array<i64: 1, 128, 128>}]} {
    %c0 = arith.constant 0 : index
    %c0_0 = arith.constant 0 : index
    %c0_1 = arith.constant 0 : index
    %0 = vector.load %arg2[%c0, %c0_0, %c0_1] : memref<1x128x128xf32, #tpu.memory_space<vmem>>, vector<1x128x128xf32>
    %1 = vector.shape_cast %0 : vector<1x128x128xf32> to vector<128x128xf32>
    %c0_2 = arith.constant 0 : index
    %c0_3 = arith.constant 0 : index
    %2 = vector.load %arg3[%c0_2, %c0_3] : memref<1x128xf32, #tpu.memory_space<vmem>>, vector<1x128xf32>
    %3 = vector.broadcast %2 : vector<1x128xf32> to vector<128x128xf32>
    %4 = arith.mulf %1, %3 : vector<128x128xf32>
    %c0_4 = arith.constant 0 : index
    %c0_5 = arith.constant 0 : index
    %5 = vector.load %arg4[%c0_4, %c0_5] : memref<1x128xf32, #tpu.memory_space<vmem>>, vector<1x128xf32>
    %6 = vector.broadcast %5 : vector<1x128xf32> to vector<128x128xf32>
    %7 = arith.addf %4, %6 : vector<128x128xf32>
    %cst = arith.constant 0.000000e+00 : f32
    %8 = vector.broadcast %cst : f32 to vector<128x128xf32>
    %9 = arith.maximumf %7, %8 : vector<128x128xf32>
    %10 = arith.truncf %9 : vector<128x128xf32> to vector<128x128xbf16>
    %c0_6 = arith.constant 0 : index
    %c0_7 = arith.constant 0 : index
    %c0_8 = arith.constant 0 : index
    %11 = vector.load %arg5[%c0_6, %c0_7, %c0_8] : memref<1x128x128xbf16, #tpu.memory_space<vmem>>, vector<1x128x128xbf16>
    %12 = vector.shape_cast %11 : vector<1x128x128xbf16> to vector<128x128xbf16>
    %13 = vector.shape_cast %10 : vector<128x128xbf16> to vector<1x128x128xbf16>
    tpu.vector_store %arg5[%c0_6, %c0_7, %c0_8], %13 {strides = array<i32>} : memref<1x128x128xbf16, #tpu.memory_space<vmem>>, vector<1x128x128xbf16>,
    return
  }
  func.func @transform_0(%arg0: i32, %arg1: i32) -> (i32, i32, i32) {
    %c0_i32 = arith.constant 0 : i32
    %c0_i32_0 = arith.constant 0 : i32
    return %arg0, %arg1, %c0_i32 : i32, i32, i32
  }
  func.func @transform_1(%arg0: i32, %arg1: i32) -> (i32, i32) {
    %c0_i32 = arith.constant 0 : i32
    %c0_i32_0 = arith.constant 0 : i32
    %c0_i32_1 = arith.constant 0 : i32
    return %c0_i32, %c0_i32_0 : i32, i32
  }
  func.func @transform_2(%arg0: i32, %arg1: i32) -> (i32, i32) {
    %c0_i32 = arith.constant 0 : i32
    %c0_i32_0 = arith.constant 0 : i32
    %c0_i32_1 = arith.constant 0 : i32
    return %c0_i32, %c0_i32_0 : i32, i32
  }
  func.func @transform_3(%arg0: i32, %arg1: i32) -> (i32, i32, i32) {
    %c0_i32 = arith.constant 0 : i32
    %c0_i32_0 = arith.constant 0 : i32
    return %arg0, %arg1, %c0_i32 : i32, i32, i32
  }
}

module attributes {stable_mosaic.version = 11 : i64} {
  func.func @_mm_tanh_kernel(%arg0: i32, %arg1: i32, %arg2: memref<1x512x512xbf16, #tpu.memory_space<vmem>>, %arg3: memref<1x512x128xbf16, #tpu.memory_space<vmem>>, %arg4: memref<1x512x128xf32, #tpu.memory_space<vmem>>) attributes {dimension_semantics = [#tpu.dimension_semantics<parallel>, #tpu.dimension_semantics<parallel>], iteration_bounds = array<i64: 4, 1>, scalar_prefetch = 0 : i64, scratch_operands = 0 : i64, tpu.core_type = #tpu.core_type<tc>, window_params = [{transform_indices = @transform_0, window_bounds = array<i64: 1, 512, 512>}, {transform_indices = @transform_1, window_bounds = array<i64: 1, 512, 128>}, {transform_indices = @transform_2, window_bounds = array<i64: 1, 512, 128>}]} {
    %c0 = arith.constant 0 : index
    %c0_0 = arith.constant 0 : index
    %c0_1 = arith.constant 0 : index
    %0 = vector.load %arg2[%c0, %c0_0, %c0_1] : memref<1x512x512xbf16, #tpu.memory_space<vmem>>, vector<1x512x512xbf16>
    %1 = vector.shape_cast %0 : vector<1x512x512xbf16> to vector<512x512xbf16>
    %c0_2 = arith.constant 0 : index
    %c0_3 = arith.constant 0 : index
    %c0_4 = arith.constant 0 : index
    %2 = vector.load %arg3[%c0_2, %c0_3, %c0_4] : memref<1x512x128xbf16, #tpu.memory_space<vmem>>, vector<1x512x128xbf16>
    %3 = vector.shape_cast %2 : vector<1x512x128xbf16> to vector<512x128xbf16>
    %cst = arith.constant dense<0.000000e+00> : vector<512x128xf32>
    %4 = tpu.matmul %1, %3, %cst {dimension_numbers = #tpu.dot_dimension_numbers<[1], [0], [0], [1], [0, 0, 1, 1], [], []>} : vector<512x512xbf16>, vector<512x128xbf16>, vector<512x128xf32> -> vector<512x128xf32>
    %5 = math.tanh %4 : vector<512x128xf32>
    %c0_5 = arith.constant 0 : index
    %c0_6 = arith.constant 0 : index
    %c0_7 = arith.constant 0 : index
    %6 = vector.load %arg4[%c0_5, %c0_6, %c0_7] : memref<1x512x128xf32, #tpu.memory_space<vmem>>, vector<1x512x128xf32>
    %7 = vector.shape_cast %6 : vector<1x512x128xf32> to vector<512x128xf32>
    %8 = vector.shape_cast %5 : vector<512x128xf32> to vector<1x512x128xf32>
    tpu.vector_store %arg4[%c0_5, %c0_6, %c0_7], %8 {strides = array<i32>} : memref<1x512x128xf32, #tpu.memory_space<vmem>>, vector<1x512x128xf32>,
    return
  }
  func.func @transform_0(%arg0: i32, %arg1: i32) -> (i32, i32, i32) {
    %c0_i32 = arith.constant 0 : i32
    %c0_i32_0 = arith.constant 0 : i32
    return %arg0, %arg1, %c0_i32 : i32, i32, i32
  }
  func.func @transform_1(%arg0: i32, %arg1: i32) -> (i32, i32, i32) {
    %c0_i32 = arith.constant 0 : i32
    %c0_i32_0 = arith.constant 0 : i32
    %c0_i32_1 = arith.constant 0 : i32
    return %arg0, %c0_i32, %c0_i32_0 : i32, i32, i32
  }
  func.func @transform_2(%arg0: i32, %arg1: i32) -> (i32, i32, i32) {
    %c0_i32 = arith.constant 0 : i32
    %c0_i32_0 = arith.constant 0 : i32
    return %arg0, %arg1, %c0_i32 : i32, i32, i32
  }
}

</mosaic_0001>

<bundles_post_ra>
// kernel: _lambda_.8
= control target key start
LH: loop header
LB: loop body
LE: loop exit
PB: predicated region body
PF: predicated region fallthrough
CT: control target
= control target key end

     0   :  { %s364_s12 = smov 0   ;;  %s366_s13 = smov 0   ;;  %s391_s0 = inlined_call_operand.vmem [shape: f32[4,8,128], index: 0, kind: input, shape index: {}]   ;;  %s392_s1 = inlined_call_operand.vmem [shape: f32[1,128], index: 1, kind: input, shape index: {}]   ;;  %s393_s2 = inlined_call_operand.vmem [shape: f32[1,128], index: 2, kind: input, shape index: {}]   ;;  %s394_s3 = inlined_call_operand.vmem [shape: bf16[4,8,128], index: 3, kind: output, shape index: {}]  }
   0x1   :  { %s368_s14 = smov 0  }
   0x2 LB: > { %s25_s15 = sadd.s32 1, %s338_s13  ;;  %p289_p0 = scmp.ge.s32.totalorder %s342_s14, 1  ;;  %s342_s14 = sphi %s368_s14, %s13_s14   ;;  %s338_s13 = sphi %s366_s13, %s396_s13   ;;  %s334_s12 = sphi %s364_s12, %s395_s12  }
   0x3   : > { %p27_p1 = scmp.ge.s32.totalorder %s25_s15, 4  ;;  %p155_p2 = scmp.lt.s32.totalorder %s342_s14, 5 }
   0x5   : > { %s398_s15 = smov (%p27_p1, %s25_s15), 0  ;;  %p156_p3 = pnand %p289_p0, %p155_p2 }
   0x6   : > { %p183_p4 = scmp.lt.s32.totalorder (!%p156_p3), %s334_s12, 3 }
   0x7   : > { %159 = sbr.rel (%p156_p3) target bundleno = 25 (0x19), region = 32 }
   0xc   : > { %s400_s12 = smov (!%p183_p4, %s334_s12), 3  ;;  %v318_v0 = vld [vmem:[%s392_s1] ss:$0 sm:$0xff] }
   0xd   : > { %s290_s18 = sshll.u32 %s400_s12, 3  ;;  %v319_v1 = vld [vmem:[%s393_s2] ss:$0 sm:$0xff]  ;;  %s291_s24 = sshll.u32 %s400_s12, 2 }
   0xe   : > { %s189_s21 = scalar_lea.vmem %s391_s0, %s290_s18  ;;  %s196_s27 = scalar_lea.vmem %s394_s3, %s291_s24 }
   0xf   : > { %v197_v2 = vld [vmem:[%s189_s21] sm:$0xff] }
  0x10   : > { %v202_v3 = vmul.f32 %v318_v0, %v197_v2 }
  0x12   : > { %v207_v4 = vadd.f32 %v319_v1, %v202_v3 }
  0x14   : > { %v208_v5 = vmax.f32 %v207_v4, 0.0 }
  0x16   : > { %v209_v6 = vpack.c.bf16 %v208_v5, %v208_v5 }
  0x18   : > { %210 = vst [vmem:[%s196_s27] sm:$0xf] %v209_v6 }
  0x19 PF: > { %s13_s14 = sadd.s32 1, %s342_s14   ;;  %s395_s12 = smov %s338_s13 }
  0x1a   : > { %p10_p5 = scmp.ge.s32.totalorder %s13_s14, 6   ;;  %s396_s13 = smov %s398_s15 }
  0x1c   :  { %12 = sbr.rel (!%p10_p5) target bundleno = 2 (0x2), region = 62 }

// kernel: _lambda_.7
= control target key start
LH: loop header
LB: loop body
LE: loop exit
PB: predicated region body
PF: predicated region fallthrough
CT: control target
= control target key end

     0   :  { %10 = vsyncpa [#allocation3], 0  ;;  %s1304_s0 = inlined_call_operand.vmem [shape: bf16[4,8,512], index: 0, kind: input, shape index: {}]   ;;  %s1305_s1 = inlined_call_operand.hbm [shape: bf16[4,512,128], index: 1, kind: input, shape index: {}]   ;;  %s1306_s2 = inlined_call_operand.vmem [shape: f32[4,8,128], index: 2, kind: output, shape index: {0}]   ;;  %s1307_s3 = inlined_call_operand.vmem [shape: f32[4,1,8,128], index: 3, kind: output, shape index: {1}]   ;;  %s1308_s4 = inlined_call_operand.vmem [shape: f32[4,1,8,128], index: 4, kind: output, shape index: {2}]  }
   0x1   :  { %12 = vsyncpa [#allocation3 + $0x1], 0  ;;  %s1169_s15 = smov 0   ;;  %s1171_s16 = smov 0  }
   0x2   :  { %s1173_s17 = smov 0   ;;  %s1175_s18 = smov 0  }
   0x3   :  { %s1177_s19 = smov 0   ;;  %s1179_s20 = smov 0  }
   0x4 LB: > { %s825_s21 = sadd.s32 4294967295, %s1140_s20   ;;  %s30_s22 = sadd.s32 1, %s1136_s19  ;;  %s1140_s20 = sphi %s1179_s20, %s18_s20   ;;  %s1136_s19 = sphi %s1177_s19, %s1315_s19   ;;  %s1132_s18 = sphi %s1175_s18, %s1314_s18   ;;  %s1128_s17 = sphi %s1173_s17, %s1313_s17   ;;  %s1124_s16 = sphi %s1171_s16, %s1312_s16   ;;  %s1120_s15 = sphi %s1169_s15, %s1311_s15  }
   0x5   : > { %p32_p0 = scmp.ge.s32.totalorder %s30_s22, 4  ;;  %s65_s23 = sadd.s32 1, %s1128_s17 }
   0x6   : > { %p72_p1 = scmp.ne.s32.totalorder %s1128_s17, %s1124_s16  ;;  %p73_p2 = scmp.eq.s32.totalorder %s1140_s20, 0 }
   0x7   : > { %s1317_s22 = smov (%p32_p0, %s30_s22), 0  ;;  %p78_p4 = scmp.ne.s32.totalorder %s1124_s16, %s1120_s15 }
   0x8   : > { %p1205_p3 = por %p73_p2, %p72_p1  ;;  %s62_s25 = ssub.s32 %s1136_s19, %s1317_s22 }
   0x9   : > { %p79_p5 = scmp.eq.s32.totalorder %s825_s21, 0  ;;  %p63_p6 = scmp.eq.s32.totalorder %s62_s25, 0 }
   0xa   : > { %p1009_p8 = scmp.lt.s32.totalorder %s1140_s20, 4  ;;  %s198_s28 = sand.u32 1, %s1128_s17  }
   0xb   : > { %p1212_p7 = por %p79_p5, %p78_p4  ;;  %s969_s29 = sshll.u32 %s1136_s19, 8 }
   0xc   : > { %s1218_s27 = scalar_select %p63_p6, %s1128_s17, %s65_s23  }
   0xd   : > { %s829_s30 = sshll.u32 %s198_s28, 8  ;;  %s207_s7 = scalar_lea.hbm %s1305_s1, %s969_s29 }
   0xe   : > { %s208_s8 = sshll.u32 %s207_s7, 4  ;;  %s202_s9 = scalar_lea.vmem [#allocation2], %s829_s30  ;;  %s209_s8 = int_to_ptr.hbm [resolvable:$true] %s208_s8 }
   0xf   : > { %s210_s10 = sshll.u32 %s202_s9, 4  ;;  %p1006_p9 = pnand %p1009_p8, %p1205_p3  ;;  %s211_s10 = int_to_ptr.vmem [resolvable:$true] %s210_s10 }
  0x10   : > { %p832_p10 = scmp.ge.s32.totalorder %s1140_s20, 1  ;;  %p218_p11 = scmp.lt.s32.totalorder %s1140_s20, 5 }
  0x11   : > { %s199_s11 = scalar_lea.sflag [#allocation3], %s198_s28  ;;  %s1142_s12 = smov 64  }
  0x12   : > { %s1143_s13 = smov 4   ;;  %p219_p12 = pnand %p832_p10, %p218_p11 }
  0x13   : > { %1008 = dma.hbm_to_vmem [thread:$0]  (!%p1006_p9), %s209_s8, 4096, %s211_s10, %s199_s11, %s1142_s12, %s1142_s12, %s1143_s13  }
  0x14   : > { %222 = sbr.rel (%p219_p12) target bundleno = 201 (0xc9), region = 28  ;;  %s224_s14 = sand.u32 (!%p219_p12), 1, %s1124_s16  }
  0x15   : > { %s833_s15 = sshll.u32 (!%p219_p12), %s224_s14, 8  ;;  %s225_s21 = scalar_lea.sflag (!%p219_p12), [#allocation3], %s224_s14 }
  0x16   : > { %s1230_s23 = scalar_lea.vmem (!%p219_p12), [#allocation2], %s833_s15 }
  0x19   : > { %1115 = dma.done.wait (%p1212_p7), %s225_s21, 4096  }
  0x1a   : > { %1117 = vsyncadd (%p1212_p7), %s225_s21, 4294963200  ;;  %v978_v0 = vld [vmem:[%s1230_s23 + $0x38] sm:$0xff]  ;;  %v977_v4 = vld [vmem:[%s1230_s23 + $0x30] sm:$0xff]  ;;  %p279_p13 = scmp.lt.s32.totalorder %s1132_s18, 3 }
  0x1b   : > { %v986_v1 = vld [vmem:[%s1230_s23 + $0x78] sm:$0xff]  ;;  %581 = vmatpush.bf16.msra.mxu0 %v978_v0  ;;  %v985_v5 = vld [vmem:[%s1230_s23 + $0x70] sm:$0xff]  ;;  %v976_v8 = vld [vmem:[%s1230_s23 + $0x28] sm:$0xff] }
  0x1c   : > { %v994_v2 = vld [vmem:[%s1230_s23 + $0xb8] sm:$0xff]  ;;  %594 = vmatpush.bf16.msra.mxu1 %v986_v1  ;;  %v993_v6 = vld [vmem:[%s1230_s23 + $0xb0] sm:$0xff]  ;;  %v984_v9 = vld [vmem:[%s1230_s23 + $0x68] sm:$0xff]  ;;  %s1319_s18 = smov (!%p279_p13, %s1132_s18), 3 }
  0x1d   : > { %v1002_v3 = vld [vmem:[%s1230_s23 + $0xf8] sm:$0xff]  ;;  %607 = vmatpush.bf16.msra.mxu2 %v994_v2  ;;  %v1001_v7 = vld [vmem:[%s1230_s23 + $0xf0] sm:$0xff]  ;;  %v992_v10 = vld [vmem:[%s1230_s23 + $0xa8] sm:$0xff]  ;;  %s970_s24 = sshll.u32 %s1319_s18, 4  ;;  %s836_s29 = sshll.u32 %s1319_s18, 3 }
  0x1e   : > { %620 = vmatpush.bf16.msra.mxu3 %v1002_v3  ;;  %v1000_v11 = vld [vmem:[%s1230_s23 + $0xe8] sm:$0xff]  ;;  %v975_v12 = vld [vmem:[%s1230_s23 + $0x20] sm:$0xff]  ;;  %v974_v16 = vld [vmem:[%s1230_s23 + $0x18] sm:$0xff]  ;;  %s287_s28 = scalar_lea.vmem %s1304_s0, %s970_s24  ;;  %s294_s6 = scalar_lea.vmem %s1306_s2, %s836_s29 }
  0x1f   : > { %582 = vmatpush.bf16.msra.mxu0 %v977_v4  ;;  %v983_v13 = vld [vmem:[%s1230_s23 + $0x60] sm:$0xff]  ;;  %v982_v17 = vld [vmem:[%s1230_s23 + $0x58] sm:$0xff]  ;;  %v973_v20 = vld [vmem:[%s1230_s23 + $0x10] sm:$0xff]  ;;  %s301_s9 = scalar_lea.vmem %s1307_s3, %s836_s29  ;;  %s308_s12 = scalar_lea.vmem %s1308_s4, %s836_s29 }
  0x20   : > { %595 = vmatpush.bf16.msra.mxu1 %v985_v5  ;;  %v991_v14 = vld [vmem:[%s1230_s23 + $0xa0] sm:$0xff]  ;;  %v990_v18 = vld [vmem:[%s1230_s23 + $0x98] sm:$0xff]  ;;  %v981_v21 = vld [vmem:[%s1230_s23 + $0x50] sm:$0xff] }
  0x21   : > { %608 = vmatpush.bf16.msra.mxu2 %v993_v6  ;;  %v999_v15 = vld [vmem:[%s1230_s23 + $0xe0] sm:$0xff]  ;;  %v998_v19 = vld [vmem:[%s1230_s23 + $0xd8] sm:$0xff]  ;;  %v989_v22 = vld [vmem:[%s1230_s23 + $0x90] sm:$0xff] }
  0x22   : > { %621 = vmatpush.bf16.msra.mxu3 %v1001_v7  ;;  %v997_v23 = vld [vmem:[%s1230_s23 + $0xd0] sm:$0xff]  ;;  %v972_v24 = vld [vmem:[%s1230_s23 + $0x8] sm:$0xff]  ;;  %v309_v26 = vld [vmem:[%s287_s28] sm:$0xff] }
  0x23   : > { %583 = vmatpush.bf16.msra.mxu0 %v976_v8  ;;  %v980_v25 = vld [vmem:[%s1230_s23 + $0x48] sm:$0xff]  ;;  %v377_v30 = vunpack.c.l.b16 %v309_v26  ;;  %v378_v31 = vunpack.c.h.b16 %v309_v26  ;;  %v971_v32 = vld [vmem:[%s1230_s23] sm:$0xff] }
  0x24   : > { %596 = vmatpush.bf16.msra.mxu1 %v984_v9  ;;  %v988_v27 = vld [vmem:[%s1230_s23 + $0x88] sm:$0xff]  ;;  %v979_v33 = vld [vmem:[%s1230_s23 + $0x40] sm:$0xff] }
  0x25   : > { %609 = vmatpush.bf16.msra.mxu2 %v992_v10  ;;  %v996_v28 = vld [vmem:[%s1230_s23 + $0xc8] sm:$0xff]  ;;  %v987_v36 = vld [vmem:[%s1230_s23 + $0x80] sm:$0xff]  ;;  %v381_v38 = vpack.c.b16 %v377_v30, %v377_v30  ;;  %v382_v39 = vpack.c.b16 %v378_v31, %v378_v31 }
  0x26   : > { %622 = vmatpush.bf16.msra.mxu3 %v1000_v11  ;;  %v310_v29 = vld [vmem:[%s287_s28 + $0x8] sm:$0xff]  ;;  %v995_v37 = vld [vmem:[%s1230_s23 + $0xc0] sm:$0xff] }
  0x27   : > { %584 = vmatpush.bf16.msra.mxu0 %v975_v12  ;;  %v379_v34 = vunpack.c.l.b16 %v310_v29  ;;  %v380_v35 = vunpack.c.h.b16 %v310_v29 }
  0x28   : > { %597 = vmatpush.bf16.msra.mxu1 %v983_v13 }
  0x29   : > { %610 = vmatpush.bf16.msra.mxu2 %v991_v14  ;;  %v383_v40 = vpack.c.b16 %v379_v34, %v379_v34  ;;  %v384_v41 = vpack.c.b16 %v380_v35, %v380_v35 }
  0x2a   : > { %623 = vmatpush.bf16.msra.mxu3 %v999_v15 }
  0x2b   : > { %585 = vmatpush.bf16.msra.mxu0 %v974_v16 }
  0x2c   : > { %598 = vmatpush.bf16.msra.mxu1 %v982_v17 }
  0x2d   : > { %611 = vmatpush.bf16.msra.mxu2 %v990_v18 }
  0x2e   : > { %624 = vmatpush.bf16.msra.mxu3 %v998_v19 }
  0x2f   : > { %586 = vmatpush.bf16.msra.mxu0 %v973_v20 }
  0x30   : > { %599 = vmatpush.bf16.msra.mxu1 %v981_v21 }
  0x31   : > { %612 = vmatpush.bf16.msra.mxu2 %v989_v22 }
  0x32   : > { %625 = vmatpush.bf16.msra.mxu3 %v997_v23 }
  0x33   : > { %587 = vmatpush.bf16.msra.mxu0 %v972_v24 }
  0x34   : > { %600 = vmatpush.bf16.msra.mxu1 %v980_v25 }
  0x35   : > { %613 = vmatpush.bf16.msra.mxu2 %v988_v27 }
  0x36   : > { %626 = vmatpush.bf16.msra.mxu3 %v996_v28 }
  0x37   : > { %588 = vmatpush.bf16.msra.mxu0 %v971_v32 }
  0x38   : > { %601 = vmatpush.bf16.msra.mxu1 %v979_v33 }
  0x39   : > { %614 = vmatpush.bf16.msra.mxu2 %v987_v36 }
  0x3a   : > { %627 = vmatpush.bf16.msra.mxu3 %v995_v37  ;;  %589 = vmatmul.bf16.vlgmr.msra.gmra.mxu0 %v381_v38 }
  0x3b   : > { %602 = vmatmul.bf16.vlgmr.msra.gmra.mxu1 %v382_v39 }
  0x3c   : > { %615 = vmatmul.bf16.vlgmr.msra.gmra.mxu2 %v383_v40 }
  0x3d   : > { %628 = vmatmul.bf16.vlgmr.msra.gmra.mxu3 %v384_v41 }
  0xb7   : > { %v590_v42 = vpop.f32.mrf.mxu0 }
  0xb8   : > { %v603_v43 = vpop.f32.mrf.mxu1 }
  0xb9   : > { %v604_v44 = vadd.f32 %v603_v43, %v590_v42 }
  0xbf   : > { %v616_v45 = vpop.f32.mrf.mxu2  ;;  %v592_v48 = vpop.f32.mrf.mxu0 }
  0xc0   : > { %v629_v46 = vpop.f32.mrf.mxu3  ;;  %v617_v47 = vadd.f32 %v616_v45, %v604_v44  ;;  %v605_v49 = vpop.f32.mrf.mxu1 }
  0xc2   : > { %v630_v50 = vadd.f32 %v629_v46, %v617_v47 }
  0xc4   : > { %633 = vst [vmem:[%s294_s6] sm:$0xff] %v630_v50  ;;  %v636_v51 = vmul.f32 %v630_v50, %v630_v50 }
  0xc5   : > { %635 = vst [vmem:[%s301_s9] sm:$0xff] %v630_v50 }
  0xc6   : > { %638 = vst [vmem:[%s308_s12] sm:$0xff] %v636_v51 }
  0xc7   : > { %v618_v52 = vpop.f32.mrf.mxu2 }
  0xc8   : > { %v631_v53 = vpop.f32.mrf.mxu3 }
  0xc9 PF: > { %s18_s20 = sadd.s32 1, %s1140_s20   ;;  %s1311_s15 = smov %s1124_s16 }
  0xca   : > { %p15_p0 = scmp.ge.s32.totalorder %s18_s20, 6   ;;  %s1312_s16 = smov %s1128_s17 }
  0xcb   : > { %s1313_s17 = smov %s1218_s27  ;;  %s1314_s18 = smov %s1136_s19 }
  0xcc   : > { %s1315_s19 = smov %s1317_s22  ;;  %17 = sbr.rel (!%p15_p0) target bundleno = 4 (0x4), region = 95 }
  0xd1   :  { %704 = vsyncpa [#allocation3], 1 }
  0xd2   :  { %706 = vsyncpa [#allocation3 + $0x1], 1 }

// kernel: _lambda_.10
= control target key start
LH: loop header
LB: loop body
LE: loop exit
PB: predicated region body
PF: predicated region fallthrough
CT: control target
= control target key end

     0   :  { %s423_s12 = smov 0   ;;  %s425_s13 = smov 0   ;;  %s462_s0 = inlined_call_operand.vmem [shape: f32[4,32,128], index: 0, kind: input, shape index: {}]   ;;  %s463_s1 = inlined_call_operand.vmem [shape: f32[1,128], index: 1, kind: input, shape index: {}]   ;;  %s464_s2 = inlined_call_operand.vmem [shape: f32[1,128], index: 2, kind: input, shape index: {}]   ;;  %s465_s3 = inlined_call_operand.vmem [shape: bf16[4,32,128], index: 3, kind: output, shape index: {}]  }
   0x1   :  { %s427_s14 = smov 0  }
   0x2 LB: > { %s25_s15 = sadd.s32 1, %s397_s13  ;;  %p333_p0 = scmp.ge.s32.totalorder %s401_s14, 1  ;;  %s401_s14 = sphi %s427_s14, %s13_s14   ;;  %s397_s13 = sphi %s425_s13, %s467_s13   ;;  %s393_s12 = sphi %s423_s12, %s466_s12  }
   0x3   : > { %p27_p1 = scmp.ge.s32.totalorder %s25_s15, 4  ;;  %p158_p2 = scmp.lt.s32.totalorder %s401_s14, 5 }
   0x5   : > { %s469_s15 = smov (%p27_p1, %s25_s15), 0  ;;  %p159_p3 = pnand %p333_p0, %p158_p2 }
   0x6   : > { %p191_p4 = scmp.lt.s32.totalorder (!%p159_p3), %s393_s12, 3 }
   0x7   : > { %162 = sbr.rel (%p159_p3) target bundleno = 26 (0x1a), region = 32 }
   0xc   : > { %s471_s12 = smov (!%p191_p4, %s393_s12), 3  ;;  %v377_v0 = vld [vmem:[%s463_s1] ss:$0 sm:$0xff] }
   0xd   : > { %s340_s18 = sshll.u32 %s471_s12, 5  ;;  %v378_v1 = vld [vmem:[%s464_s2] ss:$0 sm:$0xff]  ;;  %s341_s24 = sshll.u32 %s471_s12, 4 }
   0xe   : > { %s198_s21 = scalar_lea.vmem %s462_s0, %s340_s18  ;;  %s208_s27 = scalar_lea.vmem %s465_s3, %s341_s24 }
   0xf   : > { %v210_v2 = vld [vmem:[%s198_s21] sm:$0xff]  ;;  %v211_v3 = vld [vmem:[%s198_s21 + $0x8] sm:$0xff]  ;;  %v212_v4 = vld [vmem:[%s198_s21 + $0x10] sm:$0xff] }
  0x10   : > { %v218_v5 = vmul.f32 %v377_v0, %v210_v2  ;;  %v219_v6 = vmul.f32 %v377_v0, %v211_v3  ;;  %v213_v7 = vld [vmem:[%s198_s21 + $0x18] sm:$0xff]  ;;  %v220_v8 = vmul.f32 %v377_v0, %v212_v4 }
  0x11   : > { %v221_v9 = vmul.f32 %v377_v0, %v213_v7 }
  0x12   : > { %v226_v10 = vadd.f32 %v378_v1, %v218_v5  ;;  %v227_v11 = vadd.f32 %v378_v1, %v219_v6  ;;  %v228_v12 = vadd.f32 %v378_v1, %v220_v8 }
  0x13   : > { %v229_v13 = vadd.f32 %v378_v1, %v221_v9 }
  0x14   : > { %v230_v14 = vmax.f32 %v226_v10, 0.0  ;;  %v231_v15 = vmax.f32 %v227_v11, 0.0  ;;  %v232_v16 = vmax.f32 %v228_v12, 0.0 }
  0x15   : > { %v233_v17 = vmax.f32 %v229_v13, 0.0 }
  0x16   : > { %v345_v18 = vpack.c.bf16 %v231_v15, %v230_v14 }
  0x17   : > { %v350_v19 = vpack.c.bf16 %v233_v17, %v232_v16 }
  0x18   : > { %346 = vst [vmem:[%s208_s27] sm:$0xff] %v345_v18  }
  0x19   : > { %352 = vst [vmem:[%s208_s27 + $0x8] sm:$0xff] %v350_v19  }
  0x1a PF: > { %s13_s14 = sadd.s32 1, %s401_s14   ;;  %s466_s12 = smov %s397_s13 }
  0x1b   : > { %p10_p5 = scmp.ge.s32.totalorder %s13_s14, 6   ;;  %s467_s13 = smov %s469_s15 }
  0x1d   :  { %12 = sbr.rel (!%p10_p5) target bundleno = 2 (0x2), region = 62 }

// kernel: _lambda_.9
= control target key start
LH: loop header
LB: loop body
LE: loop exit
PB: predicated region body
PF: predicated region fallthrough
CT: control target
= control target key end

     0   :  { %10 = vsyncpa [#allocation3], 0  ;;  %s1456_s0 = inlined_call_operand.vmem [shape: bf16[4,32,512], index: 0, kind: input, shape index: {}]   ;;  %s1457_s1 = inlined_call_operand.hbm [shape: bf16[4,512,128], index: 1, kind: input, shape index: {}]   ;;  %s1458_s2 = inlined_call_operand.vmem [shape: f32[4,32,128], index: 2, kind: output, shape index: {0}]   ;;  %s1459_s3 = inlined_call_operand.vmem [shape: f32[4,1,8,128], index: 3, kind: output, shape index: {1}]   ;;  %s1460_s4 = inlined_call_operand.vmem [shape: f32[4,1,8,128], index: 4, kind: output, shape index: {2}]  }
   0x1   :  { %12 = vsyncpa [#allocation3 + $0x1], 0  ;;  %s1296_s15 = smov 0   ;;  %s1298_s16 = smov 0  }
   0x2   :  { %s1300_s17 = smov 0   ;;  %s1302_s18 = smov 0  }
   0x3   :  { %s1304_s19 = smov 0   ;;  %s1306_s20 = smov 0  }
   0x4 LB: > { %s910_s21 = sadd.s32 4294967295, %s1267_s20   ;;  %s30_s22 = sadd.s32 1, %s1263_s19  ;;  %s1267_s20 = sphi %s1306_s20, %s18_s20   ;;  %s1263_s19 = sphi %s1304_s19, %s1467_s19   ;;  %s1259_s18 = sphi %s1302_s18, %s1466_s18   ;;  %s1255_s17 = sphi %s1300_s17, %s1465_s17   ;;  %s1251_s16 = sphi %s1298_s16, %s1464_s16   ;;  %s1247_s15 = sphi %s1296_s15, %s1463_s15  }
   0x5   : > { %p32_p0 = scmp.ge.s32.totalorder %s30_s22, 4  ;;  %s65_s23 = sadd.s32 1, %s1255_s17 }
   0x6   : > { %p72_p1 = scmp.ne.s32.totalorder %s1255_s17, %s1251_s16  ;;  %p73_p2 = scmp.eq.s32.totalorder %s1267_s20, 0 }
   0x7   : > { %s1469_s22 = smov (%p32_p0, %s30_s22), 0  ;;  %p78_p4 = scmp.ne.s32.totalorder %s1251_s16, %s1247_s15 }
   0x8   : > { %p1332_p3 = por %p73_p2, %p72_p1  ;;  %s62_s25 = ssub.s32 %s1263_s19, %s1469_s22 }
   0x9   : > { %p79_p5 = scmp.eq.s32.totalorder %s910_s21, 0  ;;  %p63_p6 = scmp.eq.s32.totalorder %s62_s25, 0 }
   0xa   : > { %p1136_p8 = scmp.lt.s32.totalorder %s1267_s20, 4  ;;  %s200_s28 = sand.u32 1, %s1255_s17  }
   0xb   : > { %p1339_p7 = por %p79_p5, %p78_p4  ;;  %s1087_s29 = sshll.u32 %s1263_s19, 8 }
   0xc   : > { %s1345_s27 = scalar_select %p63_p6, %s1255_s17, %s65_s23  }
   0xd   : > { %s914_s30 = sshll.u32 %s200_s28, 8  ;;  %s209_s7 = scalar_lea.hbm %s1457_s1, %s1087_s29 }
   0xe   : > { %s210_s8 = sshll.u32 %s209_s7, 4  ;;  %s204_s9 = scalar_lea.vmem [#allocation2], %s914_s30  ;;  %s211_s8 = int_to_ptr.hbm [resolvable:$true] %s210_s8 }
   0xf   : > { %s212_s10 = sshll.u32 %s204_s9, 4  ;;  %p1133_p9 = pnand %p1136_p8, %p1332_p3  ;;  %s213_s10 = int_to_ptr.vmem [resolvable:$true] %s212_s10 }
  0x10   : > { %p917_p10 = scmp.ge.s32.totalorder %s1267_s20, 1  ;;  %p220_p11 = scmp.lt.s32.totalorder %s1267_s20, 5 }
  0x11   : > { %s201_s11 = scalar_lea.sflag [#allocation3], %s200_s28  ;;  %s1269_s12 = smov 64  }
  0x12   : > { %s1270_s13 = smov 4   ;;  %p221_p12 = pnand %p917_p10, %p220_p11 }
  0x13   : > { %1135 = dma.hbm_to_vmem [thread:$0]  (!%p1133_p9), %s211_s8, 4096, %s213_s10, %s201_s11, %s1269_s12, %s1269_s12, %s1270_s13  }
  0x14   : > { %224 = sbr.rel (%p221_p12) target bundleno = 225 (0xe1), region = 28  ;;  %s226_s14 = sand.u32 (!%p221_p12), 1, %s1251_s16  }
  0x15   : > { %s918_s15 = sshll.u32 (!%p221_p12), %s226_s14, 8  ;;  %s227_s21 = scalar_lea.sflag (!%p221_p12), [#allocation3], %s226_s14 }
  0x16   : > { %s1357_s23 = scalar_lea.vmem (!%p221_p12), [#allocation2], %s918_s15 }
  0x19   : > { %1242 = dma.done.wait (%p1339_p7), %s227_s21, 4096  }
  0x1a   : > { %1244 = vsyncadd (%p1339_p7), %s227_s21, 4294963200  ;;  %v1105_v0 = vld [vmem:[%s1357_s23 + $0x38] sm:$0xff]  ;;  %v1104_v4 = vld [vmem:[%s1357_s23 + $0x30] sm:$0xff]  ;;  %p285_p13 = scmp.lt.s32.totalorder %s1259_s18, 3 }
  0x1b   : > { %v1113_v1 = vld [vmem:[%s1357_s23 + $0x78] sm:$0xff]  ;;  %623 = vmatpush.bf16.msra.mxu0 %v1105_v0  ;;  %v1112_v5 = vld [vmem:[%s1357_s23 + $0x70] sm:$0xff]  ;;  %v1103_v8 = vld [vmem:[%s1357_s23 + $0x28] sm:$0xff] }
  0x1c   : > { %v1121_v2 = vld [vmem:[%s1357_s23 + $0xb8] sm:$0xff]  ;;  %642 = vmatpush.bf16.msra.mxu1 %v1113_v1  ;;  %v1120_v6 = vld [vmem:[%s1357_s23 + $0xb0] sm:$0xff]  ;;  %v1111_v9 = vld [vmem:[%s1357_s23 + $0x68] sm:$0xff]  ;;  %s1471_s18 = smov (!%p285_p13, %s1259_s18), 3 }
  0x1d   : > { %v1129_v3 = vld [vmem:[%s1357_s23 + $0xf8] sm:$0xff]  ;;  %661 = vmatpush.bf16.msra.mxu2 %v1121_v2  ;;  %v1128_v7 = vld [vmem:[%s1357_s23 + $0xf0] sm:$0xff]  ;;  %v1119_v10 = vld [vmem:[%s1357_s23 + $0xa8] sm:$0xff]  ;;  %s1088_s24 = sshll.u32 %s1471_s18, 6  ;;  %s1089_s29 = sshll.u32 %s1471_s18, 5 }
  0x1e   : > { %680 = vmatpush.bf16.msra.mxu3 %v1129_v3  ;;  %v1127_v11 = vld [vmem:[%s1357_s23 + $0xe8] sm:$0xff]  ;;  %v1102_v12 = vld [vmem:[%s1357_s23 + $0x20] sm:$0xff]  ;;  %v1101_v16 = vld [vmem:[%s1357_s23 + $0x18] sm:$0xff]  ;;  %s1397_s28 = scalar_lea.vmem %s1456_s0, %s1088_s24  ;;  %s1425_s6 = scalar_lea.vmem %s1458_s2, %s1089_s29 }
  0x1f   : > { %624 = vmatpush.bf16.msra.mxu0 %v1104_v4  ;;  %v1110_v13 = vld [vmem:[%s1357_s23 + $0x60] sm:$0xff]  ;;  %v1109_v17 = vld [vmem:[%s1357_s23 + $0x58] sm:$0xff]  ;;  %v1100_v20 = vld [vmem:[%s1357_s23 + $0x10] sm:$0xff]  ;;  %s923_s7 = sshll.u32 %s1471_s18, 3 }
  0x20   : > { %643 = vmatpush.bf16.msra.mxu1 %v1112_v5  ;;  %v1118_v14 = vld [vmem:[%s1357_s23 + $0xa0] sm:$0xff]  ;;  %v1117_v18 = vld [vmem:[%s1357_s23 + $0x98] sm:$0xff]  ;;  %v1108_v21 = vld [vmem:[%s1357_s23 + $0x50] sm:$0xff]  ;;  %s311_s10 = scalar_lea.vmem %s1459_s3, %s923_s7  ;;  %s318_s13 = scalar_lea.vmem %s1460_s4, %s923_s7 }
  0x21   : > { %662 = vmatpush.bf16.msra.mxu2 %v1120_v6  ;;  %v1126_v15 = vld [vmem:[%s1357_s23 + $0xe0] sm:$0xff]  ;;  %v1125_v19 = vld [vmem:[%s1357_s23 + $0xd8] sm:$0xff]  ;;  %v1116_v22 = vld [vmem:[%s1357_s23 + $0x90] sm:$0xff] }
  0x22   : > { %681 = vmatpush.bf16.msra.mxu3 %v1128_v7  ;;  %v1124_v23 = vld [vmem:[%s1357_s23 + $0xd0] sm:$0xff]  ;;  %v1099_v24 = vld [vmem:[%s1357_s23 + $0x8] sm:$0xff]  ;;  %v1098_v28 = vld [vmem:[%s1357_s23] sm:$0xff] }
  0x23   : > { %625 = vmatpush.bf16.msra.mxu0 %v1103_v8  ;;  %v1107_v25 = vld [vmem:[%s1357_s23 + $0x48] sm:$0xff]  ;;  %v1106_v29 = vld [vmem:[%s1357_s23 + $0x40] sm:$0xff]  ;;  %v1092_v33 = vld [vmem:[%s1397_s28 + $0xc] sm:$0xf0] }
  0x24   : > { %644 = vmatpush.bf16.msra.mxu1 %v1111_v9  ;;  %v1115_v26 = vld [vmem:[%s1357_s23 + $0x88] sm:$0xff]  ;;  %v1114_v30 = vld [vmem:[%s1357_s23 + $0x80] sm:$0xff]  ;;  %v929_v35 = vld [vmem:[%s1397_s28 + $0x10] sm:$0xf0] }
  0x25   : > { %663 = vmatpush.bf16.msra.mxu2 %v1119_v10  ;;  %v1123_v27 = vld [vmem:[%s1357_s23 + $0xc8] sm:$0xff]  ;;  %v1122_v31 = vld [vmem:[%s1357_s23 + $0xc0] sm:$0xff]  ;;  %v1093_v37 = vld [vmem:[%s1397_s28 + $0x14] sm:$0xf0] }
  0x26   : > { %682 = vmatpush.bf16.msra.mxu3 %v1127_v11  ;;  %v927_v32 = vld [vmem:[%s1397_s28] sm:$0xf]  ;;  %v1090_v34 = vld [vmem:[%s1397_s28 + $0x4] sm:$0xf]  ;;  %v935_v36 = vld [vmem:[%s1397_s28 + $0x8] sm:$0xf] }
  0x27   : > { %626 = vmatpush.bf16.msra.mxu0 %v1102_v12  ;;  %v1091_v38 = vld [vmem:[%s1397_s28 + $0xc] sm:$0xf]  ;;  %v937_v39 = vld [vmem:[%s1397_s28 + $0x18] sm:$0xf0]  ;;  %v928_v40 = vor.u32 %v1092_v33, %v927_v32  ;;  %v932_v41 = vor.u32 %v1090_v34, %v929_v35  ;;  %v936_v42 = vor.u32 %v1093_v37, %v935_v36  ;;  %v943_v44 = vld [vmem:[%s1397_s28 + $0x20] sm:$0xf] }
  0x28   : > { %645 = vmatpush.bf16.msra.mxu1 %v1110_v13  ;;  %v940_v43 = vor.u32 %v1091_v38, %v937_v39  ;;  %v1096_v45 = vld [vmem:[%s1397_s28 + $0x2c] sm:$0xf0]  ;;  %v1094_v46 = vld [vmem:[%s1397_s28 + $0x24] sm:$0xf]  ;;  %v945_v47 = vld [vmem:[%s1397_s28 + $0x30] sm:$0xf0] }
  0x29   : > { %664 = vmatpush.bf16.msra.mxu2 %v1118_v14  ;;  %v951_v48 = vld [vmem:[%s1397_s28 + $0x28] sm:$0xf]  ;;  %v1097_v49 = vld [vmem:[%s1397_s28 + $0x34] sm:$0xf0]  ;;  %v1095_v50 = vld [vmem:[%s1397_s28 + $0x2c] sm:$0xf]  ;;  %v944_v52 = vor.u32 %v1096_v45, %v943_v44  ;;  %v948_v53 = vor.u32 %v1094_v46, %v945_v47 }
  0x2a   : > { %683 = vmatpush.bf16.msra.mxu3 %v1126_v15  ;;  %v953_v51 = vld [vmem:[%s1397_s28 + $0x38] sm:$0xf0]  ;;  %v952_v54 = vor.u32 %v1097_v49, %v951_v48 }
  0x2b   : > { %627 = vmatpush.bf16.msra.mxu0 %v1101_v16  ;;  %v956_v55 = vor.u32 %v1095_v50, %v953_v51 }
  0x2c   : > { %646 = vmatpush.bf16.msra.mxu1 %v1109_v17 }
  0x2d   : > { %665 = vmatpush.bf16.msra.mxu2 %v1117_v18 }
  0x2e   : > { %684 = vmatpush.bf16.msra.mxu3 %v1125_v19 }
  0x2f   : > { %628 = vmatpush.bf16.msra.mxu0 %v1100_v20 }
  0x30   : > { %647 = vmatpush.bf16.msra.mxu1 %v1108_v21 }
  0x31   : > { %666 = vmatpush.bf16.msra.mxu2 %v1116_v22 }
  0x32   : > { %685 = vmatpush.bf16.msra.mxu3 %v1124_v23 }
  0x33   : > { %629 = vmatpush.bf16.msra.mxu0 %v1099_v24 }
  0x34   : > { %648 = vmatpush.bf16.msra.mxu1 %v1107_v25 }
  0x35   : > { %667 = vmatpush.bf16.msra.mxu2 %v1115_v26 }
  0x36   : > { %686 = vmatpush.bf16.msra.mxu3 %v1123_v27 }
  0x37   : > { %630 = vmatpush.bf16.msra.mxu0 %v1098_v28 }
  0x38   : > { %649 = vmatpush.bf16.msra.mxu1 %v1106_v29 }
  0x39   : > { %668 = vmatpush.bf16.msra.mxu2 %v1114_v30 }
  0x3a   : > { %687 = vmatpush.bf16.msra.mxu3 %v1122_v31  ;;  %631 = vmatmul.bf16.vlgmr.msra.gmra.mxu0 %v928_v40 }
  0x3b   : > { %650 = vmatmul.bf16.vlgmr.msra.gmra.mxu1 %v932_v41 }
  0x3c   : > { %669 = vmatmul.bf16.vlgmr.msra.gmra.mxu2 %v936_v42 }
  0x3d   : > { %688 = vmatmul.bf16.vlgmr.msra.gmra.mxu3 %v940_v43 }
  0x4a   : > { %636 = vmatmul.bf16.gmra.mxu0 %v944_v52 }
  0x4b   : > { %655 = vmatmul.bf16.gmra.mxu1 %v948_v53 }
  0x4c   : > { %674 = vmatmul.bf16.gmra.mxu2 %v952_v54 }
  0x4d   : > { %693 = vmatmul.bf16.gmra.mxu3 %v956_v55 }
  0xb7   : > { %v632_v56 = vpop.f32.mrf.mxu0 }
  0xb8   : > { %v651_v57 = vpop.f32.mrf.mxu1 }
  0xb9   : > { %v652_v58 = vadd.f32 %v651_v57, %v632_v56 }
  0xbf   : > { %v670_v59 = vpop.f32.mrf.mxu2  ;;  %v634_v62 = vpop.f32.mrf.mxu0 }
  0xc0   : > { %v689_v60 = vpop.f32.mrf.mxu3  ;;  %v671_v61 = vadd.f32 %v670_v59, %v652_v58  ;;  %v653_v63 = vpop.f32.mrf.mxu1 }
  0xc1   : > { %v654_v1 = vadd.f32 %v653_v63, %v634_v62 }
  0xc2   : > { %v690_v0 = vadd.f32 %v689_v60, %v671_v61 }
  0xc4   : > { %699 = vst [vmem:[%s1425_s6] sm:$0xff] %v690_v0  ;;  %v707_v18 = vmul.f32 %v690_v0, %v690_v0 }
  0xc7   : > { %v672_v2 = vpop.f32.mrf.mxu2  ;;  %v637_v5 = vpop.f32.mrf.mxu0 }
  0xc8   : > { %v691_v3 = vpop.f32.mrf.mxu3  ;;  %v673_v4 = vadd.f32 %v672_v2, %v654_v1  ;;  %v656_v6 = vpop.f32.mrf.mxu1 }
  0xc9   : > { %v657_v8 = vadd.f32 %v656_v6, %v637_v5 }
  0xca   : > { %v692_v7 = vadd.f32 %v691_v3, %v673_v4 }
  0xcc   : > { %700 = vst [vmem:[%s1425_s6 + $0x8] sm:$0xff] %v692_v7  ;;  %v708_v15 = vmul.f32 %v692_v7, %v692_v7  ;;  %v703_v19 = vadd.f32 %v692_v7, %v690_v0 }
  0xce   : > { %v711_v23 = vadd.f32 %v708_v15, %v707_v18 }
  0xcf   : > { %v675_v9 = vpop.f32.mrf.mxu2  ;;  %v639_v13 = vpop.f32.mrf.mxu0 }
  0xd0   : > { %v694_v10 = vpop.f32.mrf.mxu3  ;;  %v676_v11 = vadd.f32 %v675_v9, %v657_v8  ;;  %v658_v14 = vpop.f32.mrf.mxu1 }
  0xd1   : > { %v659_v16 = vadd.f32 %v658_v14, %v639_v13 }
  0xd2   : > { %v695_v12 = vadd.f32 %v694_v10, %v676_v11 }
  0xd4   : > { %701 = vst [vmem:[%s1425_s6 + $0x10] sm:$0xff] %v695_v12  ;;  %v709_v20 = vmul.f32 %v695_v12, %v695_v12  ;;  %v704_v24 = vadd.f32 %v703_v19, %v695_v12 }
  0xd6   : > { %v712_v26 = vadd.f32 %v711_v23, %v709_v20 }
  0xd7   : > { %v677_v17 = vpop.f32.mrf.mxu2 }
  0xd8   : > { %v678_v21 = vadd.f32 %v677_v17, %v659_v16  ;;  %v696_v22 = vpop.f32.mrf.mxu3 }
  0xda   : > { %v697_v25 = vadd.f32 %v696_v22, %v678_v21 }
  0xdc   : > { %702 = vst [vmem:[%s1425_s6 + $0x18] sm:$0xff] %v697_v25  ;;  %v705_v27 = vadd.f32 %v704_v24, %v697_v25  ;;  %v710_v28 = vmul.f32 %v697_v25, %v697_v25 }
  0xde   : > { %706 = vst [vmem:[%s311_s10] sm:$0xff] %v705_v27  ;;  %v713_v29 = vadd.f32 %v712_v26, %v710_v28 }
  0xe0   : > { %714 = vst [vmem:[%s318_s13] sm:$0xff] %v713_v29 }
  0xe1 PF: > { %s18_s20 = sadd.s32 1, %s1267_s20   ;;  %s1463_s15 = smov %s1251_s16 }
  0xe2   : > { %p15_p0 = scmp.ge.s32.totalorder %s18_s20, 6   ;;  %s1464_s16 = smov %s1255_s17 }
  0xe3   : > { %s1465_s17 = smov %s1345_s27  ;;  %s1466_s18 = smov %s1263_s19 }
  0xe4   : > { %s1467_s19 = smov %s1469_s22  ;;  %17 = sbr.rel (!%p15_p0) target bundleno = 4 (0x4), region = 95 }
  0xe9   :  { %785 = vsyncpa [#allocation3], 1 }
  0xea   :  { %787 = vsyncpa [#allocation3 + $0x1], 1 }

// kernel: _lambda_.12
= control target key start
LH: loop header
LB: loop body
LE: loop exit
PB: predicated region body
PF: predicated region fallthrough
CT: control target
= control target key end

     0   :  { %s531_s12 = smov 0   ;;  %s533_s13 = smov 0   ;;  %s638_s0 = inlined_call_operand.vmem [shape: f32[4,128,128], index: 0, kind: input, shape index: {}]   ;;  %s639_s1 = inlined_call_operand.vmem [shape: f32[1,128], index: 1, kind: input, shape index: {}]   ;;  %s640_s2 = inlined_call_operand.vmem [shape: f32[1,128], index: 2, kind: input, shape index: {}]   ;;  %s641_s3 = inlined_call_operand.vmem [shape: bf16[4,128,128], index: 3, kind: output, shape index: {}]  }
   0x1   :  { %s535_s14 = smov 0  }
   0x2 LB: > { %s25_s15 = sadd.s32 1, %s505_s13  ;;  %p405_p0 = scmp.ge.s32.totalorder %s509_s14, 1  ;;  %s509_s14 = sphi %s535_s14, %s13_s14   ;;  %s505_s13 = sphi %s533_s13, %s643_s13   ;;  %s501_s12 = sphi %s531_s12, %s642_s12  }
   0x3   : > { %p27_p1 = scmp.ge.s32.totalorder %s25_s15, 4  ;;  %p158_p2 = scmp.lt.s32.totalorder %s509_s14, 5 }
   0x5   : > { %s645_s15 = smov (%p27_p1, %s25_s15), 0  ;;  %p159_p3 = pnand %p405_p0, %p158_p2 }
   0x6   : > { %p191_p4 = scmp.lt.s32.totalorder (!%p159_p3), %s501_s12, 3 }
   0x7   : > { %162 = sbr.rel (%p159_p3) target bundleno = 36 (0x24), region = 32 }
   0xc   : > { %s647_s12 = smov (!%p191_p4, %s501_s12), 3  ;;  %v554_v0 = vld [vmem:[%s639_s1] ss:$0 sm:$0xff] }
   0xd   : > { %s412_s18 = sshll.u32 %s647_s12, 7  ;;  %v565_v1 = vld [vmem:[%s640_s2] ss:$0 sm:$0xff]  ;;  %s413_s24 = sshll.u32 %s647_s12, 6 }
   0xe   : > { %s560_s21 = scalar_lea.vmem %s638_s0, %s412_s18  ;;  %s597_s27 = scalar_lea.vmem %s641_s3, %s413_s24 }
   0xf   : > { %v210_v2 = vld [vmem:[%s560_s21] sm:$0xff]  ;;  %v211_v3 = vld [vmem:[%s560_s21 + $0x8] sm:$0xff]  ;;  %v212_v4 = vld [vmem:[%s560_s21 + $0x10] sm:$0xff] }
  0x10   : > { %v230_v5 = vmul.f32 %v554_v0, %v210_v2  ;;  %v231_v6 = vmul.f32 %v554_v0, %v211_v3  ;;  %v213_v7 = vld [vmem:[%s560_s21 + $0x18] sm:$0xff]  ;;  %v232_v8 = vmul.f32 %v554_v0, %v212_v4  ;;  %v214_v9 = vld [vmem:[%s560_s21 + $0x20] sm:$0xff]  ;;  %v215_v10 = vld [vmem:[%s560_s21 + $0x28] sm:$0xff] }
  0x11   : > { %v233_v11 = vmul.f32 %v554_v0, %v213_v7  ;;  %v234_v12 = vmul.f32 %v554_v0, %v214_v9  ;;  %v235_v13 = vmul.f32 %v554_v0, %v215_v10  ;;  %v216_v14 = vld [vmem:[%s560_s21 + $0x30] sm:$0xff]  ;;  %v217_v15 = vld [vmem:[%s560_s21 + $0x38] sm:$0xff]  ;;  %v218_v24 = vld [vmem:[%s560_s21 + $0x40] sm:$0xff] }
  0x12   : > { %v250_v16 = vadd.f32 %v565_v1, %v230_v5  ;;  %v251_v17 = vadd.f32 %v565_v1, %v231_v6  ;;  %v252_v18 = vadd.f32 %v565_v1, %v232_v8  ;;  %v236_v19 = vmul.f32 %v554_v0, %v216_v14  ;;  %v219_v25 = vld [vmem:[%s560_s21 + $0x48] sm:$0xff]  ;;  %v220_v30 = vld [vmem:[%s560_s21 + $0x50] sm:$0xff]  ;;  %v221_v35 = vld [vmem:[%s560_s21 + $0x58] sm:$0xff] }
  0x13   : > { %v253_v20 = vadd.f32 %v565_v1, %v233_v11  ;;  %v254_v21 = vadd.f32 %v565_v1, %v234_v12  ;;  %v255_v22 = vadd.f32 %v565_v1, %v235_v13  ;;  %v237_v23 = vmul.f32 %v554_v0, %v217_v15  ;;  %v222_v36 = vld [vmem:[%s560_s21 + $0x60] sm:$0xff]  ;;  %v223_v41 = vld [vmem:[%s560_s21 + $0x68] sm:$0xff]  ;;  %v224_v42 = vld [vmem:[%s560_s21 + $0x70] sm:$0xff] }
  0x14   : > { %v266_v26 = vmax.f32 %v250_v16, 0.0  ;;  %v267_v27 = vmax.f32 %v251_v17, 0.0  ;;  %v268_v28 = vmax.f32 %v252_v18, 0.0  ;;  %v256_v29 = vadd.f32 %v565_v1, %v236_v19  ;;  %v225_v51 = vld [vmem:[%s560_s21 + $0x78] sm:$0xff] }
  0x15   : > { %v269_v31 = vmax.f32 %v253_v20, 0.0  ;;  %v270_v32 = vmax.f32 %v254_v21, 0.0  ;;  %v271_v33 = vmax.f32 %v255_v22, 0.0  ;;  %v257_v34 = vadd.f32 %v565_v1, %v237_v23 }
  0x16   : > { %v417_v37 = vpack.c.bf16 %v267_v27, %v266_v26  ;;  %v272_v38 = vmax.f32 %v256_v29, 0.0  ;;  %v238_v39 = vmul.f32 %v554_v0, %v218_v24  ;;  %v239_v40 = vmul.f32 %v554_v0, %v219_v25 }
  0x17   : > { %v422_v43 = vpack.c.bf16 %v269_v31, %v268_v28  ;;  %v427_v44 = vpack.c.bf16 %v271_v33, %v270_v32  ;;  %v273_v45 = vmax.f32 %v257_v34, 0.0  ;;  %v240_v46 = vmul.f32 %v554_v0, %v220_v30 }
  0x18   : > { %418 = vst [vmem:[%s597_s27] sm:$0xff] %v417_v37   ;;  %v258_v47 = vadd.f32 %v565_v1, %v238_v39  ;;  %v259_v48 = vadd.f32 %v565_v1, %v239_v40  ;;  %v241_v49 = vmul.f32 %v554_v0, %v221_v35  ;;  %v242_v50 = vmul.f32 %v554_v0, %v222_v36 }
  0x19   : > { %454 = vst [vmem:[%s597_s27 + $0x8] sm:$0xff] %v422_v43   ;;  %v432_v52 = vpack.c.bf16 %v273_v45, %v272_v38  ;;  %v260_v53 = vadd.f32 %v565_v1, %v240_v46  ;;  %v243_v54 = vmul.f32 %v554_v0, %v223_v41  ;;  %v244_v55 = vmul.f32 %v554_v0, %v224_v42 }
  0x1a   : > { %455 = vst [vmem:[%s597_s27 + $0x10] sm:$0xff] %v427_v44   ;;  %v274_v56 = vmax.f32 %v258_v47, 0.0  ;;  %v275_v57 = vmax.f32 %v259_v48, 0.0  ;;  %v261_v58 = vadd.f32 %v565_v1, %v241_v49  ;;  %v262_v59 = vadd.f32 %v565_v1, %v242_v50 }
  0x1b   : > { %456 = vst [vmem:[%s597_s27 + $0x18] sm:$0xff] %v432_v52   ;;  %v276_v60 = vmax.f32 %v260_v53, 0.0  ;;  %v263_v61 = vadd.f32 %v565_v1, %v243_v54  ;;  %v245_v62 = vmul.f32 %v554_v0, %v225_v51  ;;  %v264_v63 = vadd.f32 %v565_v1, %v244_v55 }
  0x1c   : > { %v437_v2 = vpack.c.bf16 %v275_v57, %v274_v56  ;;  %v277_v3 = vmax.f32 %v261_v58, 0.0  ;;  %v278_v4 = vmax.f32 %v262_v59, 0.0 }
  0x1d   : > { %v279_v5 = vmax.f32 %v263_v61, 0.0  ;;  %v265_v6 = vadd.f32 %v565_v1, %v245_v62  ;;  %v280_v7 = vmax.f32 %v264_v63, 0.0 }
  0x1e   : > { %457 = vst [vmem:[%s597_s27 + $0x20] sm:$0xff] %v437_v2   ;;  %v442_v8 = vpack.c.bf16 %v277_v3, %v276_v60 }
  0x1f   : > { %v447_v9 = vpack.c.bf16 %v279_v5, %v278_v4  ;;  %v281_v10 = vmax.f32 %v265_v6, 0.0 }
  0x20   : > { %458 = vst [vmem:[%s597_s27 + $0x28] sm:$0xff] %v442_v8  }
  0x21   : > { %459 = vst [vmem:[%s597_s27 + $0x30] sm:$0xff] %v447_v9   ;;  %v452_v11 = vpack.c.bf16 %v281_v10, %v280_v7 }
  0x23   : > { %460 = vst [vmem:[%s597_s27 + $0x38] sm:$0xff] %v452_v11  }
  0x24 PF: > { %s13_s14 = sadd.s32 1, %s509_s14   ;;  %s642_s12 = smov %s505_s13 }
  0x25   : > { %p10_p5 = scmp.ge.s32.totalorder %s13_s14, 6   ;;  %s643_s13 = smov %s645_s15 }
  0x27   :  { %12 = sbr.rel (!%p10_p5) target bundleno = 2 (0x2), region = 62 }

// kernel: _lambda_.11
= control target key start
LH: loop header
LB: loop body
LE: loop exit
PB: predicated region body
PF: predicated region fallthrough
CT: control target
= control target key end

     0   :  { %10 = vsyncpa [#allocation3], 0  ;;  %s1954_s0 = inlined_call_operand.vmem [shape: bf16[4,128,512], index: 0, kind: input, shape index: {}]   ;;  %s1955_s1 = inlined_call_operand.hbm [shape: bf16[4,512,128], index: 1, kind: input, shape index: {}]   ;;  %s1956_s2 = inlined_call_operand.vmem [shape: f32[4,128,128], index: 2, kind: output, shape index: {0}]   ;;  %s1957_s3 = inlined_call_operand.vmem [shape: f32[4,1,8,128], index: 3, kind: output, shape index: {1}]   ;;  %s1958_s4 = inlined_call_operand.vmem [shape: f32[4,1,8,128], index: 4, kind: output, shape index: {2}]  }
   0x1   :  { %12 = vsyncpa [#allocation3 + $0x1], 0  ;;  %s1728_s15 = smov 0   ;;  %s1730_s16 = smov 0  }
   0x2   :  { %s1732_s17 = smov 0   ;;  %s1734_s18 = smov 0  }
   0x3   :  { %s1736_s19 = smov 0   ;;  %s1738_s20 = smov 0  }
   0x4 LB: > { %s1222_s21 = sadd.s32 4294967295, %s1699_s20   ;;  %s30_s22 = sadd.s32 1, %s1695_s19  ;;  %s1699_s20 = sphi %s1738_s20, %s18_s20   ;;  %s1695_s19 = sphi %s1736_s19, %s1965_s19   ;;  %s1691_s18 = sphi %s1734_s18, %s1964_s18   ;;  %s1687_s17 = sphi %s1732_s17, %s1963_s17   ;;  %s1683_s16 = sphi %s1730_s16, %s1962_s16   ;;  %s1679_s15 = sphi %s1728_s15, %s1961_s15  }
   0x5   : > { %p32_p0 = scmp.ge.s32.totalorder %s30_s22, 4  ;;  %s65_s23 = sadd.s32 1, %s1687_s17 }
   0x6   : > { %p72_p1 = scmp.ne.s32.totalorder %s1687_s17, %s1683_s16  ;;  %p73_p2 = scmp.eq.s32.totalorder %s1699_s20, 0 }
   0x7   : > { %s1967_s22 = smov (%p32_p0, %s30_s22), 0  ;;  %p78_p4 = scmp.ne.s32.totalorder %s1683_s16, %s1679_s15 }
   0x8   : > { %p1764_p3 = por %p73_p2, %p72_p1  ;;  %s62_s25 = ssub.s32 %s1695_s19, %s1967_s22 }
   0x9   : > { %p79_p5 = scmp.eq.s32.totalorder %s1222_s21, 0  ;;  %p63_p6 = scmp.eq.s32.totalorder %s62_s25, 0 }
   0xa   : > { %p1568_p8 = scmp.lt.s32.totalorder %s1699_s20, 4  ;;  %s200_s28 = sand.u32 1, %s1687_s17  }
   0xb   : > { %p1771_p7 = por %p79_p5, %p78_p4  ;;  %s1495_s29 = sshll.u32 %s1695_s19, 8 }
   0xc   : > { %s1777_s27 = scalar_select %p63_p6, %s1687_s17, %s65_s23  }
   0xd   : > { %s1226_s30 = sshll.u32 %s200_s28, 8  ;;  %s209_s7 = scalar_lea.hbm %s1955_s1, %s1495_s29 }
   0xe   : > { %s210_s8 = sshll.u32 %s209_s7, 4  ;;  %s204_s9 = scalar_lea.vmem [#allocation2], %s1226_s30  ;;  %s211_s8 = int_to_ptr.hbm [resolvable:$true] %s210_s8 }
   0xf   : > { %s212_s10 = sshll.u32 %s204_s9, 4  ;;  %p1565_p9 = pnand %p1568_p8, %p1764_p3  ;;  %s213_s10 = int_to_ptr.vmem [resolvable:$true] %s212_s10 }
  0x10   : > { %p1229_p10 = scmp.ge.s32.totalorder %s1699_s20, 1  ;;  %p220_p11 = scmp.lt.s32.totalorder %s1699_s20, 5 }
  0x11   : > { %s201_s11 = scalar_lea.sflag [#allocation3], %s200_s28  ;;  %s1701_s12 = smov 64  }
  0x12   : > { %s1702_s13 = smov 4   ;;  %p221_p12 = pnand %p1229_p10, %p220_p11 }
  0x13   : > { %1567 = dma.hbm_to_vmem [thread:$0]  (!%p1565_p9), %s211_s8, 4096, %s213_s10, %s201_s11, %s1701_s12, %s1701_s12, %s1702_s13  }
  0x14   : > { %224 = sbr.rel (%p221_p12) target bundleno = 321 (0x141), region = 28  ;;  %s226_s14 = sand.u32 (!%p221_p12), 1, %s1683_s16  }
  0x15   : > { %s1230_s15 = sshll.u32 (!%p221_p12), %s226_s14, 8  ;;  %s227_s21 = scalar_lea.sflag (!%p221_p12), [#allocation3], %s226_s14 }
  0x16   : > { %s1789_s23 = scalar_lea.vmem (!%p221_p12), [#allocation2], %s1230_s15 }
  0x19   : > { %1674 = dma.done.wait (%p1771_p7), %s227_s21, 4096  }
  0x1a   : > { %1676 = vsyncadd (%p1771_p7), %s227_s21, 4294963200  ;;  %v1537_v0 = vld [vmem:[%s1789_s23 + $0x38] sm:$0xff]  ;;  %v1536_v4 = vld [vmem:[%s1789_s23 + $0x30] sm:$0xff]  ;;  %p285_p13 = scmp.lt.s32.totalorder %s1691_s18, 3 }
  0x1b   : > { %v1545_v1 = vld [vmem:[%s1789_s23 + $0x78] sm:$0xff]  ;;  %767 = vmatpush.bf16.msra.mxu0 %v1537_v0  ;;  %v1544_v5 = vld [vmem:[%s1789_s23 + $0x70] sm:$0xff]  ;;  %v1535_v8 = vld [vmem:[%s1789_s23 + $0x28] sm:$0xff] }
  0x1c   : > { %v1553_v2 = vld [vmem:[%s1789_s23 + $0xb8] sm:$0xff]  ;;  %816 = vmatpush.bf16.msra.mxu1 %v1545_v1  ;;  %v1552_v6 = vld [vmem:[%s1789_s23 + $0xb0] sm:$0xff]  ;;  %v1543_v9 = vld [vmem:[%s1789_s23 + $0x68] sm:$0xff]  ;;  %s1969_s18 = smov (!%p285_p13, %s1691_s18), 3 }
  0x1d   : > { %v1561_v3 = vld [vmem:[%s1789_s23 + $0xf8] sm:$0xff]  ;;  %865 = vmatpush.bf16.msra.mxu2 %v1553_v2  ;;  %v1560_v7 = vld [vmem:[%s1789_s23 + $0xf0] sm:$0xff]  ;;  %v1551_v10 = vld [vmem:[%s1789_s23 + $0xa8] sm:$0xff]  ;;  %s1496_s24 = sshll.u32 %s1969_s18, 8  ;;  %s1497_s29 = sshll.u32 %s1969_s18, 7 }
  0x1e   : > { %914 = vmatpush.bf16.msra.mxu3 %v1561_v3  ;;  %v1559_v11 = vld [vmem:[%s1789_s23 + $0xe8] sm:$0xff]  ;;  %v1534_v12 = vld [vmem:[%s1789_s23 + $0x20] sm:$0xff]  ;;  %v1533_v16 = vld [vmem:[%s1789_s23 + $0x18] sm:$0xff]  ;;  %s1829_s28 = scalar_lea.vmem %s1954_s0, %s1496_s24  ;;  %s1905_s6 = scalar_lea.vmem %s1956_s2, %s1497_s29 }
  0x1f   : > { %768 = vmatpush.bf16.msra.mxu0 %v1536_v4  ;;  %v1542_v13 = vld [vmem:[%s1789_s23 + $0x60] sm:$0xff]  ;;  %v1541_v17 = vld [vmem:[%s1789_s23 + $0x58] sm:$0xff]  ;;  %v1532_v20 = vld [vmem:[%s1789_s23 + $0x10] sm:$0xff]  ;;  %s1235_s7 = sshll.u32 %s1969_s18, 3 }
  0x20   : > { %817 = vmatpush.bf16.msra.mxu1 %v1544_v5  ;;  %v1550_v14 = vld [vmem:[%s1789_s23 + $0xa0] sm:$0xff]  ;;  %v1549_v18 = vld [vmem:[%s1789_s23 + $0x98] sm:$0xff]  ;;  %v1540_v21 = vld [vmem:[%s1789_s23 + $0x50] sm:$0xff]  ;;  %s311_s10 = scalar_lea.vmem %s1957_s3, %s1235_s7  ;;  %s318_s13 = scalar_lea.vmem %s1958_s4, %s1235_s7 }
  0x21   : > { %866 = vmatpush.bf16.msra.mxu2 %v1552_v6  ;;  %v1558_v15 = vld [vmem:[%s1789_s23 + $0xe0] sm:$0xff]  ;;  %v1557_v19 = vld [vmem:[%s1789_s23 + $0xd8] sm:$0xff]  ;;  %v1548_v22 = vld [vmem:[%s1789_s23 + $0x90] sm:$0xff] }
  0x22   : > { %915 = vmatpush.bf16.msra.mxu3 %v1560_v7  ;;  %v1556_v23 = vld [vmem:[%s1789_s23 + $0xd0] sm:$0xff]  ;;  %v1531_v24 = vld [vmem:[%s1789_s23 + $0x8] sm:$0xff]  ;;  %v1530_v28 = vld [vmem:[%s1789_s23] sm:$0xff] }
  0x23   : > { %769 = vmatpush.bf16.msra.mxu0 %v1535_v8  ;;  %v1539_v25 = vld [vmem:[%s1789_s23 + $0x48] sm:$0xff]  ;;  %v1538_v29 = vld [vmem:[%s1789_s23 + $0x40] sm:$0xff]  ;;  %v1500_v33 = vld [vmem:[%s1829_s28 + $0xc] sm:$0xf0] }
  0x24   : > { %818 = vmatpush.bf16.msra.mxu1 %v1543_v9  ;;  %v1547_v26 = vld [vmem:[%s1789_s23 + $0x88] sm:$0xff]  ;;  %v1546_v30 = vld [vmem:[%s1789_s23 + $0x80] sm:$0xff]  ;;  %v1241_v35 = vld [vmem:[%s1829_s28 + $0x10] sm:$0xf0] }
  0x25   : > { %867 = vmatpush.bf16.msra.mxu2 %v1551_v10  ;;  %v1555_v27 = vld [vmem:[%s1789_s23 + $0xc8] sm:$0xff]  ;;  %v1554_v31 = vld [vmem:[%s1789_s23 + $0xc0] sm:$0xff]  ;;  %v1501_v37 = vld [vmem:[%s1829_s28 + $0x14] sm:$0xf0] }
  0x26   : > { %916 = vmatpush.bf16.msra.mxu3 %v1559_v11  ;;  %v1239_v32 = vld [vmem:[%s1829_s28] sm:$0xf]  ;;  %v1498_v34 = vld [vmem:[%s1829_s28 + $0x4] sm:$0xf]  ;;  %v1247_v36 = vld [vmem:[%s1829_s28 + $0x8] sm:$0xf] }
  0x27   : > { %770 = vmatpush.bf16.msra.mxu0 %v1534_v12  ;;  %v1499_v38 = vld [vmem:[%s1829_s28 + $0xc] sm:$0xf]  ;;  %v1249_v39 = vld [vmem:[%s1829_s28 + $0x18] sm:$0xf0]  ;;  %v1240_v40 = vor.u32 %v1500_v33, %v1239_v32  ;;  %v1244_v41 = vor.u32 %v1498_v34, %v1241_v35  ;;  %v1248_v42 = vor.u32 %v1501_v37, %v1247_v36  ;;  %v1255_v44 = vld [vmem:[%s1829_s28 + $0x20] sm:$0xf] }
  0x28   : > { %819 = vmatpush.bf16.msra.mxu1 %v1542_v13  ;;  %v1252_v43 = vor.u32 %v1499_v38, %v1249_v39  ;;  %v1504_v45 = vld [vmem:[%s1829_s28 + $0x2c] sm:$0xf0]  ;;  %v1502_v46 = vld [vmem:[%s1829_s28 + $0x24] sm:$0xf]  ;;  %v1257_v47 = vld [vmem:[%s1829_s28 + $0x30] sm:$0xf0] }
  0x29   : > { %868 = vmatpush.bf16.msra.mxu2 %v1550_v14  ;;  %v1263_v48 = vld [vmem:[%s1829_s28 + $0x28] sm:$0xf]  ;;  %v1505_v49 = vld [vmem:[%s1829_s28 + $0x34] sm:$0xf0]  ;;  %v1503_v50 = vld [vmem:[%s1829_s28 + $0x2c] sm:$0xf]  ;;  %v1256_v52 = vor.u32 %v1504_v45, %v1255_v44  ;;  %v1260_v53 = vor.u32 %v1502_v46, %v1257_v47 }
  0x2a   : > { %917 = vmatpush.bf16.msra.mxu3 %v1558_v15  ;;  %v1265_v51 = vld [vmem:[%s1829_s28 + $0x38] sm:$0xf0]  ;;  %v1264_v54 = vor.u32 %v1505_v49, %v1263_v48  ;;  %v1271_v56 = vld [vmem:[%s1829_s28 + $0x40] sm:$0xf]  ;;  %v1508_v57 = vld [vmem:[%s1829_s28 + $0x4c] sm:$0xf0] }
  0x2b   : > { %771 = vmatpush.bf16.msra.mxu0 %v1533_v16  ;;  %v1268_v55 = vor.u32 %v1503_v50, %v1265_v51  ;;  %v1506_v58 = vld [vmem:[%s1829_s28 + $0x44] sm:$0xf]  ;;  %v1273_v59 = vld [vmem:[%s1829_s28 + $0x50] sm:$0xf0]  ;;  %v1279_v60 = vld [vmem:[%s1829_s28 + $0x48] sm:$0xf]  ;;  %v1272_v0 = vor.u32 %v1508_v57, %v1271_v56 }
  0x2c   : > { %820 = vmatpush.bf16.msra.mxu1 %v1541_v17  ;;  %v1509_v61 = vld [vmem:[%s1829_s28 + $0x54] sm:$0xf0]  ;;  %v1507_v62 = vld [vmem:[%s1829_s28 + $0x4c] sm:$0xf]  ;;  %v1281_v63 = vld [vmem:[%s1829_s28 + $0x58] sm:$0xf0]  ;;  %v1276_v1 = vor.u32 %v1506_v58, %v1273_v59 }
  0x2d   : > { %869 = vmatpush.bf16.msra.mxu2 %v1549_v18  ;;  %v1280_v2 = vor.u32 %v1509_v61, %v1279_v60  ;;  %v1284_v3 = vor.u32 %v1507_v62, %v1281_v63  ;;  %v1287_v4 = vld [vmem:[%s1829_s28 + $0x60] sm:$0xf]  ;;  %v1512_v5 = vld [vmem:[%s1829_s28 + $0x6c] sm:$0xf0]  ;;  %v1510_v6 = vld [vmem:[%s1829_s28 + $0x64] sm:$0xf] }
  0x2e   : > { %918 = vmatpush.bf16.msra.mxu3 %v1557_v19  ;;  %v1289_v7 = vld [vmem:[%s1829_s28 + $0x70] sm:$0xf0]  ;;  %v1295_v8 = vld [vmem:[%s1829_s28 + $0x68] sm:$0xf]  ;;  %v1513_v9 = vld [vmem:[%s1829_s28 + $0x74] sm:$0xf0]  ;;  %v1288_v12 = vor.u32 %v1512_v5, %v1287_v4 }
  0x2f   : > { %772 = vmatpush.bf16.msra.mxu0 %v1532_v20  ;;  %v1511_v10 = vld [vmem:[%s1829_s28 + $0x6c] sm:$0xf]  ;;  %v1297_v11 = vld [vmem:[%s1829_s28 + $0x78] sm:$0xf0]  ;;  %v1292_v13 = vor.u32 %v1510_v6, %v1289_v7  ;;  %v1296_v14 = vor.u32 %v1513_v9, %v1295_v8  ;;  %v1303_v16 = vld [vmem:[%s1829_s28 + $0x80] sm:$0xf] }
  0x30   : > { %821 = vmatpush.bf16.msra.mxu1 %v1540_v21  ;;  %v1300_v15 = vor.u32 %v1511_v10, %v1297_v11  ;;  %v1516_v17 = vld [vmem:[%s1829_s28 + $0x8c] sm:$0xf0]  ;;  %v1514_v18 = vld [vmem:[%s1829_s28 + $0x84] sm:$0xf]  ;;  %v1305_v19 = vld [vmem:[%s1829_s28 + $0x90] sm:$0xf0] }
  0x31   : > { %870 = vmatpush.bf16.msra.mxu2 %v1548_v22  ;;  %v1311_v20 = vld [vmem:[%s1829_s28 + $0x88] sm:$0xf]  ;;  %v1517_v21 = vld [vmem:[%s1829_s28 + $0x94] sm:$0xf0]  ;;  %v1515_v22 = vld [vmem:[%s1829_s28 + $0x8c] sm:$0xf] }
  0x32   : > { %919 = vmatpush.bf16.msra.mxu3 %v1556_v23  ;;  %v1313_v23 = vld [vmem:[%s1829_s28 + $0x98] sm:$0xf0]  ;;  %v1327_v32 = vld [vmem:[%s1829_s28 + $0xa8] sm:$0xf]  ;;  %v1521_v33 = vld [vmem:[%s1829_s28 + $0xb4] sm:$0xf0] }
  0x33   : > { %773 = vmatpush.bf16.msra.mxu0 %v1531_v24  ;;  %v1304_v24 = vor.u32 %v1516_v17, %v1303_v16  ;;  %v1519_v34 = vld [vmem:[%s1829_s28 + $0xac] sm:$0xf]  ;;  %v1329_v35 = vld [vmem:[%s1829_s28 + $0xb8] sm:$0xf0]  ;;  %v1328_v38 = vor.u32 %v1521_v33, %v1327_v32  ;;  %v1343_v44 = vld [vmem:[%s1829_s28 + $0xc8] sm:$0xf] }
  0x34   : > { %822 = vmatpush.bf16.msra.mxu1 %v1539_v25  ;;  %v1308_v25 = vor.u32 %v1514_v18, %v1305_v19  ;;  %v1332_v39 = vor.u32 %v1519_v34, %v1329_v35  ;;  %v1525_v45 = vld [vmem:[%s1829_s28 + $0xd4] sm:$0xf0]  ;;  %v1523_v46 = vld [vmem:[%s1829_s28 + $0xcc] sm:$0xf]  ;;  %v1345_v47 = vld [vmem:[%s1829_s28 + $0xd8] sm:$0xf0] }
  0x35   : > { %871 = vmatpush.bf16.msra.mxu2 %v1547_v26  ;;  %v1312_v26 = vor.u32 %v1517_v21, %v1311_v20  ;;  %v1344_v50 = vor.u32 %v1525_v45, %v1343_v44  ;;  %v1348_v51 = vor.u32 %v1523_v46, %v1345_v47  ;;  %v1359_v56 = vld [vmem:[%s1829_s28 + $0xe8] sm:$0xf]  ;;  %v1529_v57 = vld [vmem:[%s1829_s28 + $0xf4] sm:$0xf0]  ;;  %v1527_v58 = vld [vmem:[%s1829_s28 + $0xec] sm:$0xf] }
  0x36   : > { %920 = vmatpush.bf16.msra.mxu3 %v1555_v27  ;;  %v1316_v27 = vor.u32 %v1515_v22, %v1313_v23  ;;  %v1361_v59 = vld [vmem:[%s1829_s28 + $0xf8] sm:$0xf0]  ;;  %v1360_v62 = vor.u32 %v1529_v57, %v1359_v56 }
  0x37   : > { %774 = vmatpush.bf16.msra.mxu0 %v1530_v28  ;;  %v1319_v28 = vld [vmem:[%s1829_s28 + $0xa0] sm:$0xf]  ;;  %v1364_v63 = vor.u32 %v1527_v58, %v1361_v59 }
  0x38   : > { %823 = vmatpush.bf16.msra.mxu1 %v1538_v29  ;;  %v1520_v29 = vld [vmem:[%s1829_s28 + $0xac] sm:$0xf0] }
  0x39   : > { %872 = vmatpush.bf16.msra.mxu2 %v1546_v30  ;;  %v1518_v30 = vld [vmem:[%s1829_s28 + $0xa4] sm:$0xf]  ;;  %v1320_v36 = vor.u32 %v1520_v29, %v1319_v28 }
  0x3a   : > { %921 = vmatpush.bf16.msra.mxu3 %v1554_v31  ;;  %775 = vmatmul.bf16.vlgmr.msra.gmra.mxu0 %v1240_v40  ;;  %v1321_v31 = vld [vmem:[%s1829_s28 + $0xb0] sm:$0xf0]  ;;  %v1335_v40 = vld [vmem:[%s1829_s28 + $0xc0] sm:$0xf] }
  0x3b   : > { %824 = vmatmul.bf16.vlgmr.msra.gmra.mxu1 %v1244_v41  ;;  %v1324_v37 = vor.u32 %v1518_v30, %v1321_v31  ;;  %v1524_v41 = vld [vmem:[%s1829_s28 + $0xcc] sm:$0xf0] }
  0x3c   : > { %873 = vmatmul.bf16.vlgmr.msra.gmra.mxu2 %v1248_v42  ;;  %v1522_v42 = vld [vmem:[%s1829_s28 + $0xc4] sm:$0xf]  ;;  %v1336_v48 = vor.u32 %v1524_v41, %v1335_v40 }
  0x3d   : > { %922 = vmatmul.bf16.vlgmr.msra.gmra.mxu3 %v1252_v43  ;;  %v1337_v43 = vld [vmem:[%s1829_s28 + $0xd0] sm:$0xf0] }
  0x3e   : > { %v1340_v49 = vor.u32 %v1522_v42, %v1337_v43 }
  0x4a   : > { %780 = vmatmul.bf16.gmra.mxu0 %v1256_v52  ;;  %v1351_v52 = vld [vmem:[%s1829_s28 + $0xe0] sm:$0xf] }
  0x4b   : > { %829 = vmatmul.bf16.gmra.mxu1 %v1260_v53  ;;  %v1528_v53 = vld [vmem:[%s1829_s28 + $0xec] sm:$0xf0] }
  0x4c   : > { %878 = vmatmul.bf16.gmra.mxu2 %v1264_v54  ;;  %v1526_v54 = vld [vmem:[%s1829_s28 + $0xe4] sm:$0xf]  ;;  %v1352_v60 = vor.u32 %v1528_v53, %v1351_v52 }
  0x4d   : > { %927 = vmatmul.bf16.gmra.mxu3 %v1268_v55  ;;  %v1353_v55 = vld [vmem:[%s1829_s28 + $0xf0] sm:$0xf0] }
  0x4e   : > { %v1356_v61 = vor.u32 %v1526_v54, %v1353_v55 }
  0x5a   : > { %785 = vmatmul.bf16.gmra.mxu0 %v1272_v0 }
  0x5b   : > { %834 = vmatmul.bf16.gmra.mxu1 %v1276_v1 }
  0x5c   : > { %883 = vmatmul.bf16.gmra.mxu2 %v1280_v2 }
  0x5d   : > { %932 = vmatmul.bf16.gmra.mxu3 %v1284_v3 }
  0x6a   : > { %790 = vmatmul.bf16.gmra.mxu0 %v1288_v12 }
  0x6b   : > { %839 = vmatmul.bf16.gmra.mxu1 %v1292_v13 }
  0x6c   : > { %888 = vmatmul.bf16.gmra.mxu2 %v1296_v14 }
  0x6d   : > { %937 = vmatmul.bf16.gmra.mxu3 %v1300_v15 }
  0x7a   : > { %795 = vmatmul.bf16.gmra.mxu0 %v1304_v24 }
  0x7b   : > { %844 = vmatmul.bf16.gmra.mxu1 %v1308_v25 }
  0x7c   : > { %893 = vmatmul.bf16.gmra.mxu2 %v1312_v26 }
  0x7d   : > { %942 = vmatmul.bf16.gmra.mxu3 %v1316_v27 }
  0x8a   : > { %800 = vmatmul.bf16.gmra.mxu0 %v1320_v36 }
  0x8b   : > { %849 = vmatmul.bf16.gmra.mxu1 %v1324_v37 }
  0x8c   : > { %898 = vmatmul.bf16.gmra.mxu2 %v1328_v38 }
  0x8d   : > { %947 = vmatmul.bf16.gmra.mxu3 %v1332_v39 }
  0x9a   : > { %805 = vmatmul.bf16.gmra.mxu0 %v1336_v48 }
  0x9b   : > { %854 = vmatmul.bf16.gmra.mxu1 %v1340_v49 }
  0x9c   : > { %903 = vmatmul.bf16.gmra.mxu2 %v1344_v50 }
  0x9d   : > { %952 = vmatmul.bf16.gmra.mxu3 %v1348_v51 }
  0xaa   : > { %810 = vmatmul.bf16.gmra.mxu0 %v1352_v60 }
  0xab   : > { %859 = vmatmul.bf16.gmra.mxu1 %v1356_v61 }
  0xac   : > { %908 = vmatmul.bf16.gmra.mxu2 %v1360_v62 }
  0xad   : > { %957 = vmatmul.bf16.gmra.mxu3 %v1364_v63 }
  0xb7   : > { %v776_v0 = vpop.f32.mrf.mxu0 }
  0xb8   : > { %v825_v1 = vpop.f32.mrf.mxu1 }
  0xb9   : > { %v826_v2 = vadd.f32 %v825_v1, %v776_v0 }
  0xbf   : > { %v874_v3 = vpop.f32.mrf.mxu2  ;;  %v778_v6 = vpop.f32.mrf.mxu0 }
  0xc0   : > { %v923_v4 = vpop.f32.mrf.mxu3  ;;  %v875_v5 = vadd.f32 %v874_v3, %v826_v2  ;;  %v827_v7 = vpop.f32.mrf.mxu1 }
  0xc1   : > { %v828_v9 = vadd.f32 %v827_v7, %v778_v6 }
  0xc2   : > { %v924_v8 = vadd.f32 %v923_v4, %v875_v5 }
  0xc4   : > { %963 = vst [vmem:[%s1905_s6] sm:$0xff] %v924_v8  ;;  %v995_v16 = vmul.f32 %v924_v8, %v924_v8 }
  0xc7   : > { %v876_v10 = vpop.f32.mrf.mxu2  ;;  %v781_v13 = vpop.f32.mrf.mxu0 }
  0xc8   : > { %v925_v11 = vpop.f32.mrf.mxu3  ;;  %v877_v12 = vadd.f32 %v876_v10, %v828_v9  ;;  %v830_v14 = vpop.f32.mrf.mxu1 }
  0xc9   : > { %v831_v19 = vadd.f32 %v830_v14, %v781_v13 }
  0xca   : > { %v926_v15 = vadd.f32 %v925_v11, %v877_v12 }
  0xcc   : > { %964 = vst [vmem:[%s1905_s6 + $0x8] sm:$0xff] %v926_v15  ;;  %v979_v17 = vadd.f32 %v926_v15, %v924_v8  ;;  %v996_v18 = vmul.f32 %v926_v15, %v926_v15 }
  0xce   : > { %v1011_v20 = vadd.f32 %v996_v18, %v995_v16 }
  0xcf   : > { %v879_v21 = vpop.f32.mrf.mxu2  ;;  %v783_v24 = vpop.f32.mrf.mxu0 }
  0xd0   : > { %v928_v22 = vpop.f32.mrf.mxu3  ;;  %v880_v23 = vadd.f32 %v879_v21, %v831_v19  ;;  %v832_v25 = vpop.f32.mrf.mxu1 }
  0xd1   : > { %v833_v30 = vadd.f32 %v832_v25, %v783_v24 }
  0xd2   : > { %v929_v26 = vadd.f32 %v928_v22, %v880_v23 }
  0xd4   : > { %965 = vst [vmem:[%s1905_s6 + $0x10] sm:$0xff] %v929_v26  ;;  %v980_v27 = vadd.f32 %v979_v17, %v929_v26  ;;  %v997_v28 = vmul.f32 %v929_v26, %v929_v26 }
  0xd6   : > { %v1012_v29 = vadd.f32 %v1011_v20, %v997_v28 }
  0xd7   : > { %v881_v31 = vpop.f32.mrf.mxu2  ;;  %v786_v34 = vpop.f32.mrf.mxu0 }
  0xd8   : > { %v930_v32 = vpop.f32.mrf.mxu3  ;;  %v882_v33 = vadd.f32 %v881_v31, %v833_v30  ;;  %v835_v35 = vpop.f32.mrf.mxu1 }
  0xd9   : > { %v836_v39 = vadd.f32 %v835_v35, %v786_v34 }
  0xda   : > { %v931_v36 = vadd.f32 %v930_v32, %v882_v33 }
  0xdc   : > { %966 = vst [vmem:[%s1905_s6 + $0x18] sm:$0xff] %v931_v36  ;;  %v981_v37 = vadd.f32 %v980_v27, %v931_v36  ;;  %v998_v38 = vmul.f32 %v931_v36, %v931_v36 }
  0xde   : > { %v1013_v40 = vadd.f32 %v1012_v29, %v998_v38 }
  0xdf   : > { %v884_v41 = vpop.f32.mrf.mxu2  ;;  %v788_v44 = vpop.f32.mrf.mxu0 }
  0xe0   : > { %v933_v42 = vpop.f32.mrf.mxu3  ;;  %v885_v43 = vadd.f32 %v884_v41, %v836_v39  ;;  %v837_v45 = vpop.f32.mrf.mxu1 }
  0xe1   : > { %v838_v50 = vadd.f32 %v837_v45, %v788_v44 }
  0xe2   : > { %v934_v46 = vadd.f32 %v933_v42, %v885_v43 }
  0xe4   : > { %967 = vst [vmem:[%s1905_s6 + $0x20] sm:$0xff] %v934_v46  ;;  %v1912_v47 = vadd.f32 %v981_v37, %v934_v46  ;;  %v999_v48 = vmul.f32 %v934_v46, %v934_v46 }
  0xe6   : > { %v1914_v49 = vadd.f32 %v1013_v40, %v999_v48 }
  0xe7   : > { %v886_v51 = vpop.f32.mrf.mxu2  ;;  %v791_v54 = vpop.f32.mrf.mxu0 }
  0xe8   : > { %v935_v52 = vpop.f32.mrf.mxu3  ;;  %v887_v53 = vadd.f32 %v886_v51, %v838_v50  ;;  %v840_v55 = vpop.f32.mrf.mxu1 }
  0xe9   : > { %v841_v57 = vadd.f32 %v840_v55, %v791_v54 }
  0xea   : > { %v936_v56 = vadd.f32 %v935_v52, %v887_v53 }
  0xec   : > { %968 = vst [vmem:[%s1905_s6 + $0x28] sm:$0xff] %v936_v56  ;;  %v1000_v42 = vmul.f32 %v936_v56, %v936_v56  ;;  %v983_v46 = vadd.f32 %v1912_v47, %v936_v56 }
  0xee   : > { %v1015_v53 = vadd.f32 %v1914_v49, %v1000_v42 }
  0xef   : > { %v889_v58 = vpop.f32.mrf.mxu2  ;;  %v793_v61 = vpop.f32.mrf.mxu0 }
  0xf0   : > { %v938_v59 = vpop.f32.mrf.mxu3  ;;  %v890_v60 = vadd.f32 %v889_v58, %v841_v57  ;;  %v842_v62 = vpop.f32.mrf.mxu1 }
  0xf1   : > { %v843_v0 = vadd.f32 %v842_v62, %v793_v61 }
  0xf2   : > { %v939_v63 = vadd.f32 %v938_v59, %v890_v60 }
  0xf4   : > { %969 = vst [vmem:[%s1905_s6 + $0x30] sm:$0xff] %v939_v63  ;;  %v1001_v48 = vmul.f32 %v939_v63, %v939_v63  ;;  %v984_v54 = vadd.f32 %v983_v46, %v939_v63 }
  0xf6   : > { %v1016_v58 = vadd.f32 %v1015_v53, %v1001_v48 }
  0xf7   : > { %v891_v1 = vpop.f32.mrf.mxu2  ;;  %v796_v4 = vpop.f32.mrf.mxu0 }
  0xf8   : > { %v940_v2 = vpop.f32.mrf.mxu3  ;;  %v892_v3 = vadd.f32 %v891_v1, %v843_v0  ;;  %v845_v5 = vpop.f32.mrf.mxu1 }
  0xf9   : > { %v846_v7 = vadd.f32 %v845_v5, %v796_v4 }
  0xfa   : > { %v941_v6 = vadd.f32 %v940_v2, %v892_v3 }
  0xfc   : > { %970 = vst [vmem:[%s1905_s6 + $0x38] sm:$0xff] %v941_v6  ;;  %v1002_v55 = vmul.f32 %v941_v6, %v941_v6  ;;  %v985_v59 = vadd.f32 %v984_v54, %v941_v6 }
  0xfe   : > { %v1017_v62 = vadd.f32 %v1016_v58, %v1002_v55 }
  0xff   : > { %v894_v8 = vpop.f32.mrf.mxu2  ;;  %v798_v11 = vpop.f32.mrf.mxu0 }
 0x100   : > { %v943_v9 = vpop.f32.mrf.mxu3  ;;  %v895_v10 = vadd.f32 %v894_v8, %v846_v7  ;;  %v847_v12 = vpop.f32.mrf.mxu1 }
 0x101   : > { %v848_v14 = vadd.f32 %v847_v12, %v798_v11 }
 0x102   : > { %v944_v13 = vadd.f32 %v943_v9, %v895_v10 }
 0x104   : > { %971 = vst [vmem:[%s1905_s6 + $0x40] sm:$0xff] %v944_v13  ;;  %v1003_v60 = vmul.f32 %v944_v13, %v944_v13  ;;  %v986_v0 = vadd.f32 %v985_v59, %v944_v13 }
 0x106   : > { %v1018_v56 = vadd.f32 %v1017_v62, %v1003_v60 }
 0x107   : > { %v896_v15 = vpop.f32.mrf.mxu2  ;;  %v801_v18 = vpop.f32.mrf.mxu0 }
 0x108   : > { %v945_v16 = vpop.f32.mrf.mxu3  ;;  %v897_v17 = vadd.f32 %v896_v15, %v848_v14  ;;  %v850_v19 = vpop.f32.mrf.mxu1 }
 0x109   : > { %v851_v21 = vadd.f32 %v850_v19, %v801_v18 }
 0x10a   : > { %v946_v20 = vadd.f32 %v945_v16, %v897_v17 }
 0x10c   : > { %972 = vst [vmem:[%s1905_s6 + $0x48] sm:$0xff] %v946_v20  ;;  %v1004_v1 = vmul.f32 %v946_v20, %v946_v20  ;;  %v987_v3 = vadd.f32 %v986_v0, %v946_v20 }
 0x10e   : > { %v1019_v7 = vadd.f32 %v1018_v56, %v1004_v1 }
 0x10f   : > { %v899_v22 = vpop.f32.mrf.mxu2  ;;  %v803_v25 = vpop.f32.mrf.mxu0 }
 0x110   : > { %v948_v23 = vpop.f32.mrf.mxu3  ;;  %v900_v24 = vadd.f32 %v899_v22, %v851_v21  ;;  %v852_v26 = vpop.f32.mrf.mxu1 }
 0x111   : > { %v853_v28 = vadd.f32 %v852_v26, %v803_v25 }
 0x112   : > { %v949_v27 = vadd.f32 %v948_v23, %v900_v24 }
 0x114   : > { %973 = vst [vmem:[%s1905_s6 + $0x50] sm:$0xff] %v949_v27  ;;  %v1005_v4 = vmul.f32 %v949_v27, %v949_v27  ;;  %v988_v49 = vadd.f32 %v987_v3, %v949_v27 }
 0x116   : > { %v1020_v10 = vadd.f32 %v1019_v7, %v1005_v4 }
 0x117   : > { %v901_v29 = vpop.f32.mrf.mxu2  ;;  %v806_v32 = vpop.f32.mrf.mxu0 }
 0x118   : > { %v950_v30 = vpop.f32.mrf.mxu3  ;;  %v902_v31 = vadd.f32 %v901_v29, %v853_v28  ;;  %v855_v33 = vpop.f32.mrf.mxu1 }
 0x119   : > { %v856_v35 = vadd.f32 %v855_v33, %v806_v32 }
 0x11a   : > { %v951_v34 = vadd.f32 %v950_v30, %v902_v31 }
 0x11c   : > { %974 = vst [vmem:[%s1905_s6 + $0x58] sm:$0xff] %v951_v34  ;;  %v1006_v63 = vmul.f32 %v951_v34, %v951_v34  ;;  %v989_v11 = vadd.f32 %v988_v49, %v951_v34 }
 0x11e   : > { %v1021_v13 = vadd.f32 %v1020_v10, %v1006_v63 }
 0x11f   : > { %v904_v36 = vpop.f32.mrf.mxu2  ;;  %v808_v39 = vpop.f32.mrf.mxu0 }
 0x120   : > { %v953_v37 = vpop.f32.mrf.mxu3  ;;  %v905_v38 = vadd.f32 %v904_v36, %v856_v35  ;;  %v857_v40 = vpop.f32.mrf.mxu1 }
 0x121   : > { %v858_v43 = vadd.f32 %v857_v40, %v808_v39 }
 0x122   : > { %v954_v41 = vadd.f32 %v953_v37, %v905_v38 }
 0x124   : > { %975 = vst [vmem:[%s1905_s6 + $0x60] sm:$0xff] %v954_v41  ;;  %v1007_v12 = vmul.f32 %v954_v41, %v954_v41  ;;  %v990_v14 = vadd.f32 %v989_v11, %v954_v41 }
 0x126   : > { %v1022_v18 = vadd.f32 %v1021_v13, %v1007_v12 }
 0x127   : > { %v906_v44 = vpop.f32.mrf.mxu2  ;;  %v811_v51 = vpop.f32.mrf.mxu0 }
 0x128   : > { %v955_v45 = vpop.f32.mrf.mxu3  ;;  %v907_v50 = vadd.f32 %v906_v44, %v858_v43  ;;  %v860_v52 = vpop.f32.mrf.mxu1 }
 0x129   : > { %v861_v61 = vadd.f32 %v860_v52, %v811_v51 }
 0x12a   : > { %v956_v57 = vadd.f32 %v955_v45, %v907_v50 }
 0x12c   : > { %976 = vst [vmem:[%s1905_s6 + $0x68] sm:$0xff] %v956_v57  ;;  %v1008_v15 = vmul.f32 %v956_v57, %v956_v57  ;;  %v991_v19 = vadd.f32 %v990_v14, %v956_v57 }
 0x12e   : > { %v1023_v23 = vadd.f32 %v1022_v18, %v1008_v15 }
 0x12f   : > { %v909_v2 = vpop.f32.mrf.mxu2  ;;  %v813_v9 = vpop.f32.mrf.mxu0 }
 0x130   : > { %v958_v47 = vpop.f32.mrf.mxu3  ;;  %v910_v5 = vadd.f32 %v909_v2, %v861_v61  ;;  %v862_v6 = vpop.f32.mrf.mxu1 }
 0x131   : > { %v863_v16 = vadd.f32 %v862_v6, %v813_v9 }
 0x132   : > { %v959_v8 = vadd.f32 %v958_v47, %v910_v5 }
 0x134   : > { %977 = vst [vmem:[%s1905_s6 + $0x70] sm:$0xff] %v959_v8  ;;  %v1009_v20 = vmul.f32 %v959_v8, %v959_v8  ;;  %v992_v24 = vadd.f32 %v991_v19, %v959_v8 }
 0x136   : > { %v1024_v26 = vadd.f32 %v1023_v23, %v1009_v20 }
 0x137   : > { %v911_v17 = vpop.f32.mrf.mxu2 }
 0x138   : > { %v912_v21 = vadd.f32 %v911_v17, %v863_v16  ;;  %v960_v22 = vpop.f32.mrf.mxu3 }
 0x13a   : > { %v961_v25 = vadd.f32 %v960_v22, %v912_v21 }
 0x13c   : > { %978 = vst [vmem:[%s1905_s6 + $0x78] sm:$0xff] %v961_v25  ;;  %v993_v27 = vadd.f32 %v992_v24, %v961_v25  ;;  %v1010_v28 = vmul.f32 %v961_v25, %v961_v25 }
 0x13e   : > { %994 = vst [vmem:[%s311_s10] sm:$0xff] %v993_v27  ;;  %v1025_v29 = vadd.f32 %v1024_v26, %v1010_v28 }
 0x140   : > { %1026 = vst [vmem:[%s318_s13] sm:$0xff] %v1025_v29 }
 0x141 PF: > { %s18_s20 = sadd.s32 1, %s1699_s20   ;;  %s1961_s15 = smov %s1683_s16 }
 0x142   : > { %p15_p0 = scmp.ge.s32.totalorder %s18_s20, 6   ;;  %s1962_s16 = smov %s1687_s17 }
 0x143   : > { %s1963_s17 = smov %s1777_s27  ;;  %s1964_s18 = smov %s1695_s19 }
 0x144   : > { %s1965_s19 = smov %s1967_s22  ;;  %17 = sbr.rel (!%p15_p0) target bundleno = 4 (0x4), region = 95 }
 0x149   :  { %1097 = vsyncpa [#allocation3], 1 }
 0x14a   :  { %1099 = vsyncpa [#allocation3 + $0x1], 1 }

// kernel: _lambda_.13
= control target key start
LH: loop header
LB: loop body
LE: loop exit
PB: predicated region body
PF: predicated region fallthrough
CT: control target
= control target key end

     0   :  { %s3143_s9 = smov 0   ;;  %s3145_s10 = smov 0   ;;  %s3542_s0 = inlined_call_operand.vmem [shape: bf16[4,512,512], index: 0, kind: input, shape index: {}]   ;;  %s3543_s1 = inlined_call_operand.vmem [shape: bf16[4,512,128], index: 1, kind: input, shape index: {}]   ;;  %s3544_s2 = inlined_call_operand.vmem [shape: f32[4,512,128], index: 2, kind: output, shape index: {}]  }
   0x1   :  { %s3147_s11 = smov 0  }
   0x2 LB: > { %s24_s12 = sadd.s32 1, %s3122_s10  ;;  %p2140_p0 = scmp.ge.s32.totalorder %s3126_s11, 1  ;;  %s3126_s11 = sphi %s3147_s11, %s12_s11   ;;  %s3122_s10 = sphi %s3145_s10, %s3546_s10   ;;  %s3118_s9 = sphi %s3143_s9, %s3545_s9  }
   0x3   : > { %p26_p1 = scmp.ge.s32.totalorder %s24_s12, 4  ;;  %p144_p2 = scmp.lt.s32.totalorder %s3126_s11, 5 }
   0x5   : > { %s3548_s12 = smov (%p26_p1, %s24_s12), 0  ;;  %p145_p3 = pnand %p2140_p0, %p144_p2 }
   0x6   : > { %p181_p4 = scmp.lt.s32.totalorder (!%p145_p3), %s3118_s9, 3 }
   0x7   : > { %148 = sbr.rel (%p145_p3) target bundleno = 697 (0x2b9), region = 28 }
   0xc   : > { %s3550_s9 = smov (!%p181_p4, %s3118_s9), 3 }
   0xd   : > { %s2790_s13 = sshll.u32 %s3550_s9, 8  ;;  %s2789_s17 = sshll.u32 %s3550_s9, 10 }
   0xe   : > { %s3167_s16 = scalar_lea.vmem %s3543_s1, %s2790_s13  ;;  %s3199_s20 = scalar_lea.vmem %s3542_s0, %s2789_s17 }
   0xf   : > { %v2927_v0 = vld [vmem:[%s3167_s16 + $0x38] sm:$0xff]  ;;  %v2926_v4 = vld [vmem:[%s3167_s16 + $0x30] sm:$0xff]  ;;  %v2925_v8 = vld [vmem:[%s3167_s16 + $0x28] sm:$0xff]  ;;  %s2791_s21 = sshll.u32 %s3550_s9, 9 }
  0x10   : > { %v2935_v1 = vld [vmem:[%s3167_s16 + $0x78] sm:$0xff]  ;;  %1230 = vmatpush.bf16.msra.mxu0 %v2927_v0  ;;  %v2934_v5 = vld [vmem:[%s3167_s16 + $0x70] sm:$0xff]  ;;  %v2933_v9 = vld [vmem:[%s3167_s16 + $0x68] sm:$0xff]  ;;  %s3291_s24 = scalar_lea.vmem %s3544_s2, %s2791_s21 }
  0x11   : > { %v2943_v2 = vld [vmem:[%s3167_s16 + $0xb8] sm:$0xff]  ;;  %1399 = vmatpush.bf16.msra.mxu1 %v2935_v1  ;;  %v2942_v6 = vld [vmem:[%s3167_s16 + $0xb0] sm:$0xff]  ;;  %v2941_v10 = vld [vmem:[%s3167_s16 + $0xa8] sm:$0xff] }
  0x12   : > { %v2951_v3 = vld [vmem:[%s3167_s16 + $0xf8] sm:$0xff]  ;;  %1568 = vmatpush.bf16.msra.mxu2 %v2943_v2  ;;  %v2950_v7 = vld [vmem:[%s3167_s16 + $0xf0] sm:$0xff]  ;;  %v2949_v11 = vld [vmem:[%s3167_s16 + $0xe8] sm:$0xff] }
  0x13   : > { %1737 = vmatpush.bf16.msra.mxu3 %v2951_v3  ;;  %v2924_v12 = vld [vmem:[%s3167_s16 + $0x20] sm:$0xff]  ;;  %v2923_v16 = vld [vmem:[%s3167_s16 + $0x18] sm:$0xff]  ;;  %v2922_v20 = vld [vmem:[%s3167_s16 + $0x10] sm:$0xff] }
  0x14   : > { %1231 = vmatpush.bf16.msra.mxu0 %v2926_v4  ;;  %v2932_v13 = vld [vmem:[%s3167_s16 + $0x60] sm:$0xff]  ;;  %v2931_v17 = vld [vmem:[%s3167_s16 + $0x58] sm:$0xff]  ;;  %v2930_v21 = vld [vmem:[%s3167_s16 + $0x50] sm:$0xff] }
  0x15   : > { %1400 = vmatpush.bf16.msra.mxu1 %v2934_v5  ;;  %v2940_v14 = vld [vmem:[%s3167_s16 + $0xa0] sm:$0xff]  ;;  %v2939_v18 = vld [vmem:[%s3167_s16 + $0x98] sm:$0xff]  ;;  %v2938_v22 = vld [vmem:[%s3167_s16 + $0x90] sm:$0xff] }
  0x16   : > { %1569 = vmatpush.bf16.msra.mxu2 %v2942_v6  ;;  %v2948_v15 = vld [vmem:[%s3167_s16 + $0xe0] sm:$0xff]  ;;  %v2947_v19 = vld [vmem:[%s3167_s16 + $0xd8] sm:$0xff]  ;;  %v2946_v23 = vld [vmem:[%s3167_s16 + $0xd0] sm:$0xff] }
  0x17   : > { %1738 = vmatpush.bf16.msra.mxu3 %v2950_v7  ;;  %v2921_v24 = vld [vmem:[%s3167_s16 + $0x8] sm:$0xff]  ;;  %v2920_v28 = vld [vmem:[%s3167_s16] sm:$0xff]  ;;  %v2794_v33 = vld [vmem:[%s3199_s20 + $0xc] sm:$0xf0] }
  0x18   : > { %1232 = vmatpush.bf16.msra.mxu0 %v2925_v8  ;;  %v2929_v25 = vld [vmem:[%s3167_s16 + $0x48] sm:$0xff]  ;;  %v2928_v29 = vld [vmem:[%s3167_s16 + $0x40] sm:$0xff]  ;;  %v2151_v35 = vld [vmem:[%s3199_s20 + $0x10] sm:$0xf0] }
  0x19   : > { %1401 = vmatpush.bf16.msra.mxu1 %v2933_v9  ;;  %v2937_v26 = vld [vmem:[%s3167_s16 + $0x88] sm:$0xff]  ;;  %v2936_v30 = vld [vmem:[%s3167_s16 + $0x80] sm:$0xff]  ;;  %v2795_v37 = vld [vmem:[%s3199_s20 + $0x14] sm:$0xf0] }
  0x1a   : > { %1570 = vmatpush.bf16.msra.mxu2 %v2941_v10  ;;  %v2945_v27 = vld [vmem:[%s3167_s16 + $0xc8] sm:$0xff]  ;;  %v2944_v31 = vld [vmem:[%s3167_s16 + $0xc0] sm:$0xff]  ;;  %v2159_v39 = vld [vmem:[%s3199_s20 + $0x18] sm:$0xf0] }
  0x1b   : > { %1739 = vmatpush.bf16.msra.mxu3 %v2949_v11  ;;  %v2149_v32 = vld [vmem:[%s3199_s20] sm:$0xf]  ;;  %v2792_v34 = vld [vmem:[%s3199_s20 + $0x4] sm:$0xf]  ;;  %v2157_v36 = vld [vmem:[%s3199_s20 + $0x8] sm:$0xf] }
  0x1c   : > { %1233 = vmatpush.bf16.msra.mxu0 %v2924_v12  ;;  %v2793_v38 = vld [vmem:[%s3199_s20 + $0xc] sm:$0xf]  ;;  %v2150_v40 = vor.u32 %v2794_v33, %v2149_v32  ;;  %v2154_v41 = vor.u32 %v2792_v34, %v2151_v35  ;;  %v2158_v42 = vor.u32 %v2795_v37, %v2157_v36  ;;  %v2165_v44 = vld [vmem:[%s3199_s20 + $0x20] sm:$0xf]  ;;  %v2798_v45 = vld [vmem:[%s3199_s20 + $0x2c] sm:$0xf0] }
  0x1d   : > { %1402 = vmatpush.bf16.msra.mxu1 %v2932_v13  ;;  %v2162_v43 = vor.u32 %v2793_v38, %v2159_v39  ;;  %v2796_v46 = vld [vmem:[%s3199_s20 + $0x24] sm:$0xf]  ;;  %v2167_v47 = vld [vmem:[%s3199_s20 + $0x30] sm:$0xf0]  ;;  %v2173_v48 = vld [vmem:[%s3199_s20 + $0x28] sm:$0xf]  ;;  %v2166_v52 = vor.u32 %v2798_v45, %v2165_v44 }
  0x1e   : > { %1571 = vmatpush.bf16.msra.mxu2 %v2940_v14  ;;  %v2799_v49 = vld [vmem:[%s3199_s20 + $0x34] sm:$0xf0]  ;;  %v2797_v50 = vld [vmem:[%s3199_s20 + $0x2c] sm:$0xf]  ;;  %v2175_v51 = vld [vmem:[%s3199_s20 + $0x38] sm:$0xf0]  ;;  %v2170_v53 = vor.u32 %v2796_v46, %v2167_v47 }
  0x1f   : > { %1740 = vmatpush.bf16.msra.mxu3 %v2948_v15  ;;  %v2174_v54 = vor.u32 %v2799_v49, %v2173_v48  ;;  %v2178_v55 = vor.u32 %v2797_v50, %v2175_v51  ;;  %v2181_v56 = vld [vmem:[%s3199_s20 + $0x40] sm:$0xf]  ;;  %v2802_v57 = vld [vmem:[%s3199_s20 + $0x4c] sm:$0xf0]  ;;  %v2800_v58 = vld [vmem:[%s3199_s20 + $0x44] sm:$0xf] }
  0x20   : > { %1234 = vmatpush.bf16.msra.mxu0 %v2923_v16  ;;  %v2183_v59 = vld [vmem:[%s3199_s20 + $0x50] sm:$0xf0]  ;;  %v2189_v60 = vld [vmem:[%s3199_s20 + $0x48] sm:$0xf]  ;;  %v2803_v61 = vld [vmem:[%s3199_s20 + $0x54] sm:$0xf0]  ;;  %v2182_v0 = vor.u32 %v2802_v57, %v2181_v56 }
  0x21   : > { %1403 = vmatpush.bf16.msra.mxu1 %v2931_v17  ;;  %v2801_v62 = vld [vmem:[%s3199_s20 + $0x4c] sm:$0xf]  ;;  %v2191_v63 = vld [vmem:[%s3199_s20 + $0x58] sm:$0xf0]  ;;  %v2186_v1 = vor.u32 %v2800_v58, %v2183_v59  ;;  %v2190_v2 = vor.u32 %v2803_v61, %v2189_v60  ;;  %v2197_v4 = vld [vmem:[%s3199_s20 + $0x60] sm:$0xf] }
  0x22   : > { %1572 = vmatpush.bf16.msra.mxu2 %v2939_v18  ;;  %v2194_v3 = vor.u32 %v2801_v62, %v2191_v63  ;;  %v2806_v5 = vld [vmem:[%s3199_s20 + $0x6c] sm:$0xf0]  ;;  %v2804_v6 = vld [vmem:[%s3199_s20 + $0x64] sm:$0xf]  ;;  %v2199_v7 = vld [vmem:[%s3199_s20 + $0x70] sm:$0xf0] }
  0x23   : > { %1741 = vmatpush.bf16.msra.mxu3 %v2947_v19  ;;  %v2205_v8 = vld [vmem:[%s3199_s20 + $0x68] sm:$0xf]  ;;  %v2807_v9 = vld [vmem:[%s3199_s20 + $0x74] sm:$0xf0]  ;;  %v2805_v10 = vld [vmem:[%s3199_s20 + $0x6c] sm:$0xf]  ;;  %v2198_v12 = vor.u32 %v2806_v5, %v2197_v4  ;;  %v2202_v13 = vor.u32 %v2804_v6, %v2199_v7 }
  0x24   : > { %1235 = vmatpush.bf16.msra.mxu0 %v2922_v20  ;;  %v2207_v11 = vld [vmem:[%s3199_s20 + $0x78] sm:$0xf0]  ;;  %v2206_v14 = vor.u32 %v2807_v9, %v2205_v8  ;;  %v2213_v16 = vld [vmem:[%s3199_s20 + $0x80] sm:$0xf]  ;;  %v2810_v17 = vld [vmem:[%s3199_s20 + $0x8c] sm:$0xf0] }
  0x25   : > { %1404 = vmatpush.bf16.msra.mxu1 %v2930_v21  ;;  %v2210_v15 = vor.u32 %v2805_v10, %v2207_v11  ;;  %v2808_v18 = vld [vmem:[%s3199_s20 + $0x84] sm:$0xf]  ;;  %v2215_v19 = vld [vmem:[%s3199_s20 + $0x90] sm:$0xf0]  ;;  %v2221_v20 = vld [vmem:[%s3199_s20 + $0x88] sm:$0xf] }
  0x26   : > { %1573 = vmatpush.bf16.msra.mxu2 %v2938_v22  ;;  %v2811_v21 = vld [vmem:[%s3199_s20 + $0x94] sm:$0xf0]  ;;  %v2809_v22 = vld [vmem:[%s3199_s20 + $0x8c] sm:$0xf]  ;;  %v2237_v32 = vld [vmem:[%s3199_s20 + $0xa8] sm:$0xf] }
  0x27   : > { %1742 = vmatpush.bf16.msra.mxu3 %v2946_v23  ;;  %v2223_v23 = vld [vmem:[%s3199_s20 + $0x98] sm:$0xf0]  ;;  %v2815_v33 = vld [vmem:[%s3199_s20 + $0xb4] sm:$0xf0]  ;;  %v2813_v34 = vld [vmem:[%s3199_s20 + $0xac] sm:$0xf] }
  0x28   : > { %1236 = vmatpush.bf16.msra.mxu0 %v2921_v24  ;;  %v2214_v24 = vor.u32 %v2810_v17, %v2213_v16  ;;  %v2239_v35 = vld [vmem:[%s3199_s20 + $0xb8] sm:$0xf0]  ;;  %v2238_v38 = vor.u32 %v2815_v33, %v2237_v32  ;;  %v2253_v44 = vld [vmem:[%s3199_s20 + $0xc8] sm:$0xf]  ;;  %v2819_v45 = vld [vmem:[%s3199_s20 + $0xd4] sm:$0xf0] }
  0x29   : > { %1405 = vmatpush.bf16.msra.mxu1 %v2929_v25  ;;  %v2218_v25 = vor.u32 %v2808_v18, %v2215_v19  ;;  %v2242_v39 = vor.u32 %v2813_v34, %v2239_v35  ;;  %v2817_v46 = vld [vmem:[%s3199_s20 + $0xcc] sm:$0xf]  ;;  %v2255_v47 = vld [vmem:[%s3199_s20 + $0xd8] sm:$0xf0]  ;;  %v2254_v50 = vor.u32 %v2819_v45, %v2253_v44  ;;  %v2269_v56 = vld [vmem:[%s3199_s20 + $0xe8] sm:$0xf] }
  0x2a   : > { %1574 = vmatpush.bf16.msra.mxu2 %v2937_v26  ;;  %v2222_v26 = vor.u32 %v2811_v21, %v2221_v20  ;;  %v2258_v51 = vor.u32 %v2817_v46, %v2255_v47  ;;  %v2823_v57 = vld [vmem:[%s3199_s20 + $0xf4] sm:$0xf0]  ;;  %v2821_v58 = vld [vmem:[%s3199_s20 + $0xec] sm:$0xf]  ;;  %v2271_v59 = vld [vmem:[%s3199_s20 + $0xf8] sm:$0xf0] }
  0x2b   : > { %1743 = vmatpush.bf16.msra.mxu3 %v2945_v27  ;;  %v2226_v27 = vor.u32 %v2809_v22, %v2223_v23  ;;  %v2270_v62 = vor.u32 %v2823_v57, %v2269_v56  ;;  %v2274_v63 = vor.u32 %v2821_v58, %v2271_v59  ;;  %v2285_v4 = vld [vmem:[%s3199_s20 + $0x108] sm:$0xf]  ;;  %v2827_v5 = vld [vmem:[%s3199_s20 + $0x114] sm:$0xf0]  ;;  %v2825_v6 = vld [vmem:[%s3199_s20 + $0x10c] sm:$0xf] }
  0x2c   : > { %1237 = vmatpush.bf16.msra.mxu0 %v2920_v28  ;;  %v2229_v28 = vld [vmem:[%s3199_s20 + $0xa0] sm:$0xf]  ;;  %v2287_v7 = vld [vmem:[%s3199_s20 + $0x118] sm:$0xf0]  ;;  %v2830_v22 = vld [vmem:[%s3199_s20 + $0x12c] sm:$0xf0] }
  0x2d   : > { %1406 = vmatpush.bf16.msra.mxu1 %v2928_v29  ;;  %v2814_v29 = vld [vmem:[%s3199_s20 + $0xac] sm:$0xf0]  ;;  %v2293_v21 = vld [vmem:[%s3199_s20 + $0x120] sm:$0xf]  ;;  %v2828_v23 = vld [vmem:[%s3199_s20 + $0x124] sm:$0xf] }
  0x2e   : > { %1575 = vmatpush.bf16.msra.mxu2 %v2936_v30  ;;  %v2812_v30 = vld [vmem:[%s3199_s20 + $0xa4] sm:$0xf]  ;;  %v2230_v36 = vor.u32 %v2814_v29, %v2229_v28  ;;  %v2303_v28 = vld [vmem:[%s3199_s20 + $0x138] sm:$0xf0]  ;;  %v2294_v32 = vor.u32 %v2830_v22, %v2293_v21 }
  0x2f   : > { %1744 = vmatpush.bf16.msra.mxu3 %v2944_v31  ;;  %1238 = vmatmul.bf16.vlgmr.msra.gmra.mxu0 %v2150_v40  ;;  %v2231_v31 = vld [vmem:[%s3199_s20 + $0xb0] sm:$0xf0]  ;;  %v2245_v40 = vld [vmem:[%s3199_s20 + $0xc0] sm:$0xf]  ;;  %v2319_v56 = vld [vmem:[%s3199_s20 + $0x158] sm:$0xf0] }
  0x30   : > { %1407 = vmatmul.bf16.vlgmr.msra.gmra.mxu1 %v2154_v41  ;;  %v2234_v37 = vor.u32 %v2812_v30, %v2231_v31  ;;  %v2818_v41 = vld [vmem:[%s3199_s20 + $0xcc] sm:$0xf0] }
  0x31   : > { %1576 = vmatmul.bf16.vlgmr.msra.gmra.mxu2 %v2158_v42  ;;  %v2816_v42 = vld [vmem:[%s3199_s20 + $0xc4] sm:$0xf]  ;;  %v2246_v48 = vor.u32 %v2818_v41, %v2245_v40 }
  0x32   : > { %1745 = vmatmul.bf16.vlgmr.msra.gmra.mxu3 %v2162_v43  ;;  %v2247_v43 = vld [vmem:[%s3199_s20 + $0xd0] sm:$0xf0] }
  0x33   : > { %v2250_v49 = vor.u32 %v2816_v42, %v2247_v43 }
  0x3f   : > { %1243 = vmatmul.bf16.gmra.mxu0 %v2166_v52  ;;  %v2261_v52 = vld [vmem:[%s3199_s20 + $0xe0] sm:$0xf] }
  0x40   : > { %1412 = vmatmul.bf16.gmra.mxu1 %v2170_v53  ;;  %v2822_v53 = vld [vmem:[%s3199_s20 + $0xec] sm:$0xf0] }
  0x41   : > { %1581 = vmatmul.bf16.gmra.mxu2 %v2174_v54  ;;  %v2820_v54 = vld [vmem:[%s3199_s20 + $0xe4] sm:$0xf]  ;;  %v2262_v60 = vor.u32 %v2822_v53, %v2261_v52  ;;  %v2311_v52 = vld [vmem:[%s3199_s20 + $0x150] sm:$0xf0]  ;;  %v2317_v53 = vld [vmem:[%s3199_s20 + $0x148] sm:$0xf] }
  0x42   : > { %1750 = vmatmul.bf16.gmra.mxu3 %v2178_v55  ;;  %v2263_v55 = vld [vmem:[%s3199_s20 + $0xf0] sm:$0xf0] }
  0x43   : > { %v2266_v61 = vor.u32 %v2820_v54, %v2263_v55  ;;  %v2835_v54 = vld [vmem:[%s3199_s20 + $0x154] sm:$0xf0]  ;;  %v2833_v55 = vld [vmem:[%s3199_s20 + $0x14c] sm:$0xf] }
  0x4f   : > { %1248 = vmatmul.bf16.gmra.mxu0 %v2182_v0  ;;  %v2277_v0 = vld [vmem:[%s3199_s20 + $0x100] sm:$0xf] }
  0x50   : > { %1417 = vmatmul.bf16.gmra.mxu1 %v2186_v1  ;;  %v2826_v1 = vld [vmem:[%s3199_s20 + $0x10c] sm:$0xf0] }
  0x51   : > { %1586 = vmatmul.bf16.gmra.mxu2 %v2190_v2  ;;  %v2824_v2 = vld [vmem:[%s3199_s20 + $0x104] sm:$0xf]  ;;  %v2278_v8 = vor.u32 %v2826_v1, %v2277_v0  ;;  %v2318_v1 = vor.u32 %v2835_v54, %v2317_v53 }
  0x52   : > { %1755 = vmatmul.bf16.gmra.mxu3 %v2194_v3  ;;  %v2279_v3 = vld [vmem:[%s3199_s20 + $0x110] sm:$0xf0] }
  0x53   : > { %v2282_v9 = vor.u32 %v2824_v2, %v2279_v3  ;;  %v2322_v2 = vor.u32 %v2833_v55, %v2319_v56 }
  0x5f   : > { %1253 = vmatmul.bf16.gmra.mxu0 %v2198_v12  ;;  %v2286_v12 = vor.u32 %v2827_v5, %v2285_v4 }
  0x60   : > { %1422 = vmatmul.bf16.gmra.mxu1 %v2202_v13  ;;  %v2290_v13 = vor.u32 %v2825_v6, %v2287_v7 }
  0x61   : > { %1591 = vmatmul.bf16.gmra.mxu2 %v2206_v14 }
  0x62   : > { %1760 = vmatmul.bf16.gmra.mxu3 %v2210_v15 }
  0x6f   : > { %1258 = vmatmul.bf16.gmra.mxu0 %v2214_v24  ;;  %v2295_v24 = vld [vmem:[%s3199_s20 + $0x130] sm:$0xf0] }
  0x70   : > { %1427 = vmatmul.bf16.gmra.mxu1 %v2218_v25  ;;  %v2301_v25 = vld [vmem:[%s3199_s20 + $0x128] sm:$0xf]  ;;  %v2298_v33 = vor.u32 %v2828_v23, %v2295_v24 }
  0x71   : > { %1596 = vmatmul.bf16.gmra.mxu2 %v2222_v26  ;;  %v2831_v26 = vld [vmem:[%s3199_s20 + $0x134] sm:$0xf0] }
  0x72   : > { %1765 = vmatmul.bf16.gmra.mxu3 %v2226_v27  ;;  %v2829_v27 = vld [vmem:[%s3199_s20 + $0x12c] sm:$0xf] }
  0x7f   : > { %1263 = vmatmul.bf16.gmra.mxu0 %v2230_v36 }
  0x80   : > { %1432 = vmatmul.bf16.gmra.mxu1 %v2234_v37  ;;  %v2302_v37 = vor.u32 %v2831_v26, %v2301_v25 }
  0x81   : > { %1601 = vmatmul.bf16.gmra.mxu2 %v2238_v38  ;;  %v2306_v38 = vor.u32 %v2829_v27, %v2303_v28 }
  0x82   : > { %1770 = vmatmul.bf16.gmra.mxu3 %v2242_v39 }
  0x8f   : > { %1268 = vmatmul.bf16.gmra.mxu0 %v2246_v48 }
  0x90   : > { %1437 = vmatmul.bf16.gmra.mxu1 %v2250_v49  ;;  %v2309_v49 = vld [vmem:[%s3199_s20 + $0x140] sm:$0xf] }
  0x91   : > { %1606 = vmatmul.bf16.gmra.mxu2 %v2254_v50  ;;  %v2834_v50 = vld [vmem:[%s3199_s20 + $0x14c] sm:$0xf0] }
  0x92   : > { %1775 = vmatmul.bf16.gmra.mxu3 %v2258_v51  ;;  %v2832_v51 = vld [vmem:[%s3199_s20 + $0x144] sm:$0xf] }
  0x9f   : > { %1273 = vmatmul.bf16.gmra.mxu0 %v2262_v60  ;;  %v2310_v60 = vor.u32 %v2834_v50, %v2309_v49 }
  0xa0   : > { %1442 = vmatmul.bf16.gmra.mxu1 %v2266_v61  ;;  %v2314_v61 = vor.u32 %v2832_v51, %v2311_v52 }
  0xa1   : > { %1611 = vmatmul.bf16.gmra.mxu2 %v2270_v62 }
  0xa2   : > { %1780 = vmatmul.bf16.gmra.mxu3 %v2274_v63 }
  0xac   : > { %v1239_v10 = vpop.f32.mrf.mxu0 }
  0xad   : > { %v1408_v11 = vpop.f32.mrf.mxu1 }
  0xae   : > { %v1409_v14 = vadd.f32 %v1408_v11, %v1239_v10 }
  0xaf   : > { %1278 = vmatmul.bf16.gmra.mxu0 %v2278_v8 }
  0xb0   : > { %1447 = vmatmul.bf16.gmra.mxu1 %v2282_v9 }
  0xb1   : > { %1616 = vmatmul.bf16.gmra.mxu2 %v2286_v12 }
  0xb2   : > { %1785 = vmatmul.bf16.gmra.mxu3 %v2290_v13  ;;  %v2325_v13 = vld [vmem:[%s3199_s20 + $0x160] sm:$0xf] }
  0xb4   : > { %v1577_v15 = vpop.f32.mrf.mxu2  ;;  %v1241_v18 = vpop.f32.mrf.mxu0 }
  0xb5   : > { %v1746_v16 = vpop.f32.mrf.mxu3  ;;  %v1578_v17 = vadd.f32 %v1577_v15, %v1409_v14  ;;  %v1410_v19 = vpop.f32.mrf.mxu1  ;;  %v2838_v14 = vld [vmem:[%s3199_s20 + $0x16c] sm:$0xf0]  ;;  %v2836_v15 = vld [vmem:[%s3199_s20 + $0x164] sm:$0xf] }
  0xb6   : > { %v1411_v29 = vadd.f32 %v1410_v19, %v1241_v18  ;;  %v2839_v18 = vld [vmem:[%s3199_s20 + $0x174] sm:$0xf0]  ;;  %v2837_v19 = vld [vmem:[%s3199_s20 + $0x16c] sm:$0xf]  ;;  %v2326_v24 = vor.u32 %v2838_v14, %v2325_v13 }
  0xb7   : > { %v1747_v20 = vadd.f32 %v1746_v16, %v1578_v17  ;;  %v2327_v16 = vld [vmem:[%s3199_s20 + $0x170] sm:$0xf0]  ;;  %v2333_v17 = vld [vmem:[%s3199_s20 + $0x168] sm:$0xf] }
  0xb8   : > { %v2330_v25 = vor.u32 %v2836_v15, %v2327_v16 }
  0xb9   : > { %2976 = vtanh.f32 %v1747_v20  ;;  %v2335_v20 = vld [vmem:[%s3199_s20 + $0x178] sm:$0xf0] }
  0xbc   : > { %v1579_v30 = vpop.f32.mrf.mxu2  ;;  %v1244_v35 = vpop.f32.mrf.mxu0 }
  0xbd   : > { %v1748_v31 = vpop.f32.mrf.mxu3  ;;  %v1580_v34 = vadd.f32 %v1579_v30, %v1411_v29  ;;  %v1413_v36 = vpop.f32.mrf.mxu1  ;;  %v2334_v29 = vor.u32 %v2839_v18, %v2333_v17  ;;  %v2338_v30 = vor.u32 %v2837_v19, %v2335_v20 }
  0xbe   : > { %v1414_v41 = vadd.f32 %v1413_v36, %v1244_v35 }
  0xbf   : > { %v2977_v39 = vpop.eup %2976  ;;  %v1749_v40 = vadd.f32 %v1748_v31, %v1580_v34  ;;  %1283 = vmatmul.bf16.gmra.mxu0 %v2294_v32 }
  0xc0   : > { %1970 = vst [vmem:[%s3291_s24] sm:$0xff] %v2977_v39  ;;  %1452 = vmatmul.bf16.gmra.mxu1 %v2298_v33 }
  0xc1   : > { %2978 = vtanh.f32 %v1749_v40  ;;  %1621 = vmatmul.bf16.gmra.mxu2 %v2302_v37 }
  0xc2   : > { %1790 = vmatmul.bf16.gmra.mxu3 %v2306_v38 }
  0xc4   : > { %v1582_v42 = vpop.f32.mrf.mxu2  ;;  %v1246_v45 = vpop.f32.mrf.mxu0 }
  0xc5   : > { %v1751_v43 = vpop.f32.mrf.mxu3  ;;  %v1583_v44 = vadd.f32 %v1582_v42, %v1414_v41  ;;  %v1415_v46 = vpop.f32.mrf.mxu1  ;;  %v2341_v41 = vld [vmem:[%s3199_s20 + $0x180] sm:$0xf]  ;;  %v2842_v42 = vld [vmem:[%s3199_s20 + $0x18c] sm:$0xf0] }
  0xc6   : > { %v1416_v57 = vadd.f32 %v1415_v46, %v1246_v45  ;;  %v2349_v45 = vld [vmem:[%s3199_s20 + $0x188] sm:$0xf]  ;;  %v2843_v46 = vld [vmem:[%s3199_s20 + $0x194] sm:$0xf0]  ;;  %v2342_v52 = vor.u32 %v2842_v42, %v2341_v41 }
  0xc7   : > { %v2979_v47 = vpop.eup %2978  ;;  %v1752_v48 = vadd.f32 %v1751_v43, %v1583_v44  ;;  %v2840_v43 = vld [vmem:[%s3199_s20 + $0x184] sm:$0xf]  ;;  %v2343_v44 = vld [vmem:[%s3199_s20 + $0x190] sm:$0xf0] }
  0xc8   : > { %1971 = vst [vmem:[%s3291_s24 + $0x8] sm:$0xff] %v2979_v47  ;;  %v2841_v47 = vld [vmem:[%s3199_s20 + $0x18c] sm:$0xf]  ;;  %v2346_v53 = vor.u32 %v2840_v43, %v2343_v44 }
  0xc9   : > { %2980 = vtanh.f32 %v1752_v48  ;;  %v2351_v48 = vld [vmem:[%s3199_s20 + $0x198] sm:$0xf0] }
  0xcc   : > { %v1584_v58 = vpop.f32.mrf.mxu2  ;;  %v1249_v63 = vpop.f32.mrf.mxu0 }
  0xcd   : > { %v1753_v59 = vpop.f32.mrf.mxu3  ;;  %v1585_v62 = vadd.f32 %v1584_v58, %v1416_v57  ;;  %v1418_v0 = vpop.f32.mrf.mxu1  ;;  %v2350_v57 = vor.u32 %v2843_v46, %v2349_v45  ;;  %v2354_v58 = vor.u32 %v2841_v47, %v2351_v48 }
  0xce   : > { %v1419_v5 = vadd.f32 %v1418_v0, %v1249_v63 }
  0xcf   : > { %v2981_v3 = vpop.eup %2980  ;;  %v1754_v4 = vadd.f32 %v1753_v59, %v1585_v62  ;;  %1288 = vmatmul.bf16.gmra.mxu0 %v2310_v60 }
  0xd0   : > { %1972 = vst [vmem:[%s3291_s24 + $0x10] sm:$0xff] %v2981_v3  ;;  %1457 = vmatmul.bf16.gmra.mxu1 %v2314_v61 }
  0xd1   : > { %2982 = vtanh.f32 %v1754_v4  ;;  %1626 = vmatmul.bf16.gmra.mxu2 %v2318_v1 }
  0xd2   : > { %1795 = vmatmul.bf16.gmra.mxu3 %v2322_v2 }
  0xd4   : > { %v1587_v6 = vpop.f32.mrf.mxu2  ;;  %v1251_v9 = vpop.f32.mrf.mxu0 }
  0xd5   : > { %v1756_v7 = vpop.f32.mrf.mxu3  ;;  %v1588_v8 = vadd.f32 %v1587_v6, %v1419_v5  ;;  %v1420_v10 = vpop.f32.mrf.mxu1  ;;  %v2357_v5 = vld [vmem:[%s3199_s20 + $0x1a0] sm:$0xf]  ;;  %v2846_v6 = vld [vmem:[%s3199_s20 + $0x1ac] sm:$0xf0] }
  0xd6   : > { %v1421_v21 = vadd.f32 %v1420_v10, %v1251_v9  ;;  %v2365_v9 = vld [vmem:[%s3199_s20 + $0x1a8] sm:$0xf]  ;;  %v2847_v10 = vld [vmem:[%s3199_s20 + $0x1b4] sm:$0xf0]  ;;  %v2358_v16 = vor.u32 %v2846_v6, %v2357_v5 }
  0xd7   : > { %v2983_v11 = vpop.eup %2982  ;;  %v1757_v12 = vadd.f32 %v1756_v7, %v1588_v8  ;;  %v2844_v7 = vld [vmem:[%s3199_s20 + $0x1a4] sm:$0xf]  ;;  %v2359_v8 = vld [vmem:[%s3199_s20 + $0x1b0] sm:$0xf0] }
  0xd8   : > { %1973 = vst [vmem:[%s3291_s24 + $0x18] sm:$0xff] %v2983_v11  ;;  %v2845_v11 = vld [vmem:[%s3199_s20 + $0x1ac] sm:$0xf]  ;;  %v2362_v17 = vor.u32 %v2844_v7, %v2359_v8 }
  0xd9   : > { %2984 = vtanh.f32 %v1757_v12  ;;  %v2367_v12 = vld [vmem:[%s3199_s20 + $0x1b8] sm:$0xf0] }
  0xdc   : > { %v1589_v22 = vpop.f32.mrf.mxu2  ;;  %v1254_v27 = vpop.f32.mrf.mxu0 }
  0xdd   : > { %v1758_v23 = vpop.f32.mrf.mxu3  ;;  %v1590_v26 = vadd.f32 %v1589_v22, %v1421_v21  ;;  %v1423_v28 = vpop.f32.mrf.mxu1  ;;  %v2366_v21 = vor.u32 %v2847_v10, %v2365_v9  ;;  %v2370_v22 = vor.u32 %v2845_v11, %v2367_v12 }
  0xde   : > { %v1424_v33 = vadd.f32 %v1423_v28, %v1254_v27 }
  0xdf   : > { %v2985_v31 = vpop.eup %2984  ;;  %v1759_v32 = vadd.f32 %v1758_v23, %v1590_v26  ;;  %1293 = vmatmul.bf16.gmra.mxu0 %v2326_v24 }
  0xe0   : > { %1974 = vst [vmem:[%s3291_s24 + $0x20] sm:$0xff] %v2985_v31  ;;  %1462 = vmatmul.bf16.gmra.mxu1 %v2330_v25 }
  0xe1   : > { %2986 = vtanh.f32 %v1759_v32  ;;  %1631 = vmatmul.bf16.gmra.mxu2 %v2334_v29 }
  0xe2   : > { %1800 = vmatmul.bf16.gmra.mxu3 %v2338_v30 }
  0xe4   : > { %v1592_v34 = vpop.f32.mrf.mxu2  ;;  %v1256_v37 = vpop.f32.mrf.mxu0 }
  0xe5   : > { %v1761_v35 = vpop.f32.mrf.mxu3  ;;  %v1593_v36 = vadd.f32 %v1592_v34, %v1424_v33  ;;  %v1425_v38 = vpop.f32.mrf.mxu1  ;;  %v2373_v33 = vld [vmem:[%s3199_s20 + $0x1c0] sm:$0xf]  ;;  %v2850_v34 = vld [vmem:[%s3199_s20 + $0x1cc] sm:$0xf0] }
  0xe6   : > { %v1426_v49 = vadd.f32 %v1425_v38, %v1256_v37  ;;  %v2381_v37 = vld [vmem:[%s3199_s20 + $0x1c8] sm:$0xf]  ;;  %v2851_v38 = vld [vmem:[%s3199_s20 + $0x1d4] sm:$0xf0]  ;;  %v2374_v44 = vor.u32 %v2850_v34, %v2373_v33 }
  0xe7   : > { %v2987_v39 = vpop.eup %2986  ;;  %v1762_v40 = vadd.f32 %v1761_v35, %v1593_v36  ;;  %v2848_v35 = vld [vmem:[%s3199_s20 + $0x1c4] sm:$0xf]  ;;  %v2375_v36 = vld [vmem:[%s3199_s20 + $0x1d0] sm:$0xf0] }
  0xe8   : > { %1975 = vst [vmem:[%s3291_s24 + $0x28] sm:$0xff] %v2987_v39  ;;  %v2849_v39 = vld [vmem:[%s3199_s20 + $0x1cc] sm:$0xf]  ;;  %v2378_v45 = vor.u32 %v2848_v35, %v2375_v36 }
  0xe9   : > { %2988 = vtanh.f32 %v1762_v40  ;;  %v2383_v40 = vld [vmem:[%s3199_s20 + $0x1d8] sm:$0xf0] }
  0xec   : > { %v1594_v50 = vpop.f32.mrf.mxu2  ;;  %v1259_v55 = vpop.f32.mrf.mxu0 }
  0xed   : > { %v1763_v51 = vpop.f32.mrf.mxu3  ;;  %v1595_v54 = vadd.f32 %v1594_v50, %v1426_v49  ;;  %v1428_v56 = vpop.f32.mrf.mxu1  ;;  %v2382_v49 = vor.u32 %v2851_v38, %v2381_v37  ;;  %v2386_v50 = vor.u32 %v2849_v39, %v2383_v40 }
  0xee   : > { %v1429_v61 = vadd.f32 %v1428_v56, %v1259_v55 }
  0xef   : > { %v2989_v59 = vpop.eup %2988  ;;  %v1764_v60 = vadd.f32 %v1763_v51, %v1595_v54  ;;  %1298 = vmatmul.bf16.gmra.mxu0 %v2342_v52 }
  0xf0   : > { %1976 = vst [vmem:[%s3291_s24 + $0x30] sm:$0xff] %v2989_v59  ;;  %1467 = vmatmul.bf16.gmra.mxu1 %v2346_v53 }
  0xf1   : > { %2990 = vtanh.f32 %v1764_v60  ;;  %1636 = vmatmul.bf16.gmra.mxu2 %v2350_v57 }
  0xf2   : > { %1805 = vmatmul.bf16.gmra.mxu3 %v2354_v58 }
  0xf4   : > { %v1597_v62 = vpop.f32.mrf.mxu2  ;;  %v1261_v1 = vpop.f32.mrf.mxu0 }
  0xf5   : > { %v1766_v63 = vpop.f32.mrf.mxu3  ;;  %v1598_v0 = vadd.f32 %v1597_v62, %v1429_v61  ;;  %v1430_v2 = vpop.f32.mrf.mxu1  ;;  %v2389_v61 = vld [vmem:[%s3199_s20 + $0x1e0] sm:$0xf]  ;;  %v2854_v62 = vld [vmem:[%s3199_s20 + $0x1ec] sm:$0xf0] }
  0xf6   : > { %v1431_v13 = vadd.f32 %v1430_v2, %v1261_v1  ;;  %v2397_v1 = vld [vmem:[%s3199_s20 + $0x1e8] sm:$0xf]  ;;  %v2855_v2 = vld [vmem:[%s3199_s20 + $0x1f4] sm:$0xf0]  ;;  %v2390_v8 = vor.u32 %v2854_v62, %v2389_v61 }
  0xf7   : > { %v2991_v3 = vpop.eup %2990  ;;  %v1767_v4 = vadd.f32 %v1766_v63, %v1598_v0  ;;  %v2852_v63 = vld [vmem:[%s3199_s20 + $0x1e4] sm:$0xf]  ;;  %v2391_v0 = vld [vmem:[%s3199_s20 + $0x1f0] sm:$0xf0] }
  0xf8   : > { %1977 = vst [vmem:[%s3291_s24 + $0x38] sm:$0xff] %v2991_v3  ;;  %v2853_v3 = vld [vmem:[%s3199_s20 + $0x1ec] sm:$0xf]  ;;  %v2394_v9 = vor.u32 %v2852_v63, %v2391_v0 }
  0xf9   : > { %2992 = vtanh.f32 %v1767_v4  ;;  %v2399_v4 = vld [vmem:[%s3199_s20 + $0x1f8] sm:$0xf0] }
  0xfc   : > { %v1599_v14 = vpop.f32.mrf.mxu2  ;;  %v1264_v19 = vpop.f32.mrf.mxu0 }
  0xfd   : > { %v1768_v15 = vpop.f32.mrf.mxu3  ;;  %v1600_v18 = vadd.f32 %v1599_v14, %v1431_v13  ;;  %v1433_v20 = vpop.f32.mrf.mxu1  ;;  %v2398_v13 = vor.u32 %v2855_v2, %v2397_v1  ;;  %v2402_v14 = vor.u32 %v2853_v3, %v2399_v4 }
  0xfe   : > { %v1434_v25 = vadd.f32 %v1433_v20, %v1264_v19 }
  0xff   : > { %v2993_v23 = vpop.eup %2992  ;;  %v1769_v24 = vadd.f32 %v1768_v15, %v1600_v18  ;;  %1303 = vmatmul.bf16.gmra.mxu0 %v2358_v16 }
 0x100   : > { %1978 = vst [vmem:[%s3291_s24 + $0x40] sm:$0xff] %v2993_v23  ;;  %1472 = vmatmul.bf16.gmra.mxu1 %v2362_v17 }
 0x101   : > { %2994 = vtanh.f32 %v1769_v24  ;;  %1641 = vmatmul.bf16.gmra.mxu2 %v2366_v21 }
 0x102   : > { %1810 = vmatmul.bf16.gmra.mxu3 %v2370_v22 }
 0x104   : > { %v1602_v26 = vpop.f32.mrf.mxu2  ;;  %v1266_v29 = vpop.f32.mrf.mxu0 }
 0x105   : > { %v1771_v27 = vpop.f32.mrf.mxu3  ;;  %v1603_v28 = vadd.f32 %v1602_v26, %v1434_v25  ;;  %v1435_v30 = vpop.f32.mrf.mxu1  ;;  %v2405_v25 = vld [vmem:[%s3199_s20 + $0x200] sm:$0xf]  ;;  %v2858_v26 = vld [vmem:[%s3199_s20 + $0x20c] sm:$0xf0] }
 0x106   : > { %v1436_v41 = vadd.f32 %v1435_v30, %v1266_v29  ;;  %v2413_v29 = vld [vmem:[%s3199_s20 + $0x208] sm:$0xf]  ;;  %v2859_v30 = vld [vmem:[%s3199_s20 + $0x214] sm:$0xf0]  ;;  %v2406_v36 = vor.u32 %v2858_v26, %v2405_v25 }
 0x107   : > { %v2995_v31 = vpop.eup %2994  ;;  %v1772_v32 = vadd.f32 %v1771_v27, %v1603_v28  ;;  %v2856_v27 = vld [vmem:[%s3199_s20 + $0x204] sm:$0xf]  ;;  %v2407_v28 = vld [vmem:[%s3199_s20 + $0x210] sm:$0xf0] }
 0x108   : > { %1979 = vst [vmem:[%s3291_s24 + $0x48] sm:$0xff] %v2995_v31  ;;  %v2857_v31 = vld [vmem:[%s3199_s20 + $0x20c] sm:$0xf]  ;;  %v2410_v37 = vor.u32 %v2856_v27, %v2407_v28 }
 0x109   : > { %2996 = vtanh.f32 %v1772_v32  ;;  %v2415_v32 = vld [vmem:[%s3199_s20 + $0x218] sm:$0xf0] }
 0x10c   : > { %v1604_v42 = vpop.f32.mrf.mxu2  ;;  %v1269_v47 = vpop.f32.mrf.mxu0 }
 0x10d   : > { %v1773_v43 = vpop.f32.mrf.mxu3  ;;  %v1605_v46 = vadd.f32 %v1604_v42, %v1436_v41  ;;  %v1438_v48 = vpop.f32.mrf.mxu1  ;;  %v2414_v41 = vor.u32 %v2859_v30, %v2413_v29  ;;  %v2418_v42 = vor.u32 %v2857_v31, %v2415_v32 }
 0x10e   : > { %v1439_v53 = vadd.f32 %v1438_v48, %v1269_v47 }
 0x10f   : > { %v2997_v51 = vpop.eup %2996  ;;  %v1774_v52 = vadd.f32 %v1773_v43, %v1605_v46  ;;  %1308 = vmatmul.bf16.gmra.mxu0 %v2374_v44 }
 0x110   : > { %1980 = vst [vmem:[%s3291_s24 + $0x50] sm:$0xff] %v2997_v51  ;;  %1477 = vmatmul.bf16.gmra.mxu1 %v2378_v45 }
 0x111   : > { %2998 = vtanh.f32 %v1774_v52  ;;  %1646 = vmatmul.bf16.gmra.mxu2 %v2382_v49 }
 0x112   : > { %1815 = vmatmul.bf16.gmra.mxu3 %v2386_v50 }
 0x114   : > { %v1607_v54 = vpop.f32.mrf.mxu2  ;;  %v1271_v57 = vpop.f32.mrf.mxu0 }
 0x115   : > { %v1776_v55 = vpop.f32.mrf.mxu3  ;;  %v1608_v56 = vadd.f32 %v1607_v54, %v1439_v53  ;;  %v1440_v58 = vpop.f32.mrf.mxu1  ;;  %v2421_v53 = vld [vmem:[%s3199_s20 + $0x220] sm:$0xf]  ;;  %v2862_v54 = vld [vmem:[%s3199_s20 + $0x22c] sm:$0xf0] }
 0x116   : > { %v1441_v5 = vadd.f32 %v1440_v58, %v1271_v57  ;;  %v2429_v57 = vld [vmem:[%s3199_s20 + $0x228] sm:$0xf]  ;;  %v2863_v58 = vld [vmem:[%s3199_s20 + $0x234] sm:$0xf0]  ;;  %v2422_v0 = vor.u32 %v2862_v54, %v2421_v53 }
 0x117   : > { %v2999_v59 = vpop.eup %2998  ;;  %v1777_v60 = vadd.f32 %v1776_v55, %v1608_v56  ;;  %v2860_v55 = vld [vmem:[%s3199_s20 + $0x224] sm:$0xf]  ;;  %v2423_v56 = vld [vmem:[%s3199_s20 + $0x230] sm:$0xf0] }
 0x118   : > { %1981 = vst [vmem:[%s3291_s24 + $0x58] sm:$0xff] %v2999_v59  ;;  %v2861_v59 = vld [vmem:[%s3199_s20 + $0x22c] sm:$0xf]  ;;  %v2426_v1 = vor.u32 %v2860_v55, %v2423_v56 }
 0x119   : > { %3000 = vtanh.f32 %v1777_v60  ;;  %v2431_v60 = vld [vmem:[%s3199_s20 + $0x238] sm:$0xf0] }
 0x11c   : > { %v1609_v6 = vpop.f32.mrf.mxu2  ;;  %v1274_v11 = vpop.f32.mrf.mxu0 }
 0x11d   : > { %v1778_v7 = vpop.f32.mrf.mxu3  ;;  %v1610_v10 = vadd.f32 %v1609_v6, %v1441_v5  ;;  %v1443_v12 = vpop.f32.mrf.mxu1  ;;  %v2430_v5 = vor.u32 %v2863_v58, %v2429_v57  ;;  %v2434_v6 = vor.u32 %v2861_v59, %v2431_v60 }
 0x11e   : > { %v1444_v17 = vadd.f32 %v1443_v12, %v1274_v11 }
 0x11f   : > { %v3001_v15 = vpop.eup %3000  ;;  %v1779_v16 = vadd.f32 %v1778_v7, %v1610_v10  ;;  %1313 = vmatmul.bf16.gmra.mxu0 %v2390_v8 }
 0x120   : > { %1982 = vst [vmem:[%s3291_s24 + $0x60] sm:$0xff] %v3001_v15  ;;  %1482 = vmatmul.bf16.gmra.mxu1 %v2394_v9 }
 0x121   : > { %3002 = vtanh.f32 %v1779_v16  ;;  %1651 = vmatmul.bf16.gmra.mxu2 %v2398_v13 }
 0x122   : > { %1820 = vmatmul.bf16.gmra.mxu3 %v2402_v14 }
 0x124   : > { %v1612_v18 = vpop.f32.mrf.mxu2  ;;  %v1276_v21 = vpop.f32.mrf.mxu0 }
 0x125   : > { %v1781_v19 = vpop.f32.mrf.mxu3  ;;  %v1613_v20 = vadd.f32 %v1612_v18, %v1444_v17  ;;  %v1445_v22 = vpop.f32.mrf.mxu1  ;;  %v2437_v17 = vld [vmem:[%s3199_s20 + $0x240] sm:$0xf]  ;;  %v2866_v18 = vld [vmem:[%s3199_s20 + $0x24c] sm:$0xf0] }
 0x126   : > { %v1446_v33 = vadd.f32 %v1445_v22, %v1276_v21  ;;  %v2445_v21 = vld [vmem:[%s3199_s20 + $0x248] sm:$0xf]  ;;  %v2867_v22 = vld [vmem:[%s3199_s20 + $0x254] sm:$0xf0]  ;;  %v2438_v28 = vor.u32 %v2866_v18, %v2437_v17 }
 0x127   : > { %v3003_v23 = vpop.eup %3002  ;;  %v1782_v24 = vadd.f32 %v1781_v19, %v1613_v20  ;;  %v2864_v19 = vld [vmem:[%s3199_s20 + $0x244] sm:$0xf]  ;;  %v2439_v20 = vld [vmem:[%s3199_s20 + $0x250] sm:$0xf0] }
 0x128   : > { %1983 = vst [vmem:[%s3291_s24 + $0x68] sm:$0xff] %v3003_v23  ;;  %v2865_v23 = vld [vmem:[%s3199_s20 + $0x24c] sm:$0xf]  ;;  %v2442_v29 = vor.u32 %v2864_v19, %v2439_v20 }
 0x129   : > { %3004 = vtanh.f32 %v1782_v24  ;;  %v2447_v24 = vld [vmem:[%s3199_s20 + $0x258] sm:$0xf0] }
 0x12c   : > { %v1614_v34 = vpop.f32.mrf.mxu2  ;;  %v1279_v39 = vpop.f32.mrf.mxu0 }
 0x12d   : > { %v1783_v35 = vpop.f32.mrf.mxu3  ;;  %v1615_v38 = vadd.f32 %v1614_v34, %v1446_v33  ;;  %v1448_v40 = vpop.f32.mrf.mxu1  ;;  %v2446_v33 = vor.u32 %v2867_v22, %v2445_v21  ;;  %v2450_v34 = vor.u32 %v2865_v23, %v2447_v24 }
 0x12e   : > { %v1449_v45 = vadd.f32 %v1448_v40, %v1279_v39 }
 0x12f   : > { %v3005_v43 = vpop.eup %3004  ;;  %v1784_v44 = vadd.f32 %v1783_v35, %v1615_v38  ;;  %1318 = vmatmul.bf16.gmra.mxu0 %v2406_v36 }
 0x130   : > { %1984 = vst [vmem:[%s3291_s24 + $0x70] sm:$0xff] %v3005_v43  ;;  %1487 = vmatmul.bf16.gmra.mxu1 %v2410_v37 }
 0x131   : > { %3006 = vtanh.f32 %v1784_v44  ;;  %1656 = vmatmul.bf16.gmra.mxu2 %v2414_v41 }
 0x132   : > { %1825 = vmatmul.bf16.gmra.mxu3 %v2418_v42 }
 0x134   : > { %v1617_v46 = vpop.f32.mrf.mxu2  ;;  %v1281_v49 = vpop.f32.mrf.mxu0 }
 0x135   : > { %v1786_v47 = vpop.f32.mrf.mxu3  ;;  %v1618_v48 = vadd.f32 %v1617_v46, %v1449_v45  ;;  %v1450_v50 = vpop.f32.mrf.mxu1  ;;  %v2453_v45 = vld [vmem:[%s3199_s20 + $0x260] sm:$0xf]  ;;  %v2870_v46 = vld [vmem:[%s3199_s20 + $0x26c] sm:$0xf0] }
 0x136   : > { %v1451_v61 = vadd.f32 %v1450_v50, %v1281_v49  ;;  %v2461_v49 = vld [vmem:[%s3199_s20 + $0x268] sm:$0xf]  ;;  %v2871_v50 = vld [vmem:[%s3199_s20 + $0x274] sm:$0xf0]  ;;  %v2454_v56 = vor.u32 %v2870_v46, %v2453_v45 }
 0x137   : > { %v3007_v51 = vpop.eup %3006  ;;  %v1787_v52 = vadd.f32 %v1786_v47, %v1618_v48  ;;  %v2868_v47 = vld [vmem:[%s3199_s20 + $0x264] sm:$0xf]  ;;  %v2455_v48 = vld [vmem:[%s3199_s20 + $0x270] sm:$0xf0] }
 0x138   : > { %1985 = vst [vmem:[%s3291_s24 + $0x78] sm:$0xff] %v3007_v51  ;;  %v2869_v51 = vld [vmem:[%s3199_s20 + $0x26c] sm:$0xf]  ;;  %v2458_v57 = vor.u32 %v2868_v47, %v2455_v48 }
 0x139   : > { %3008 = vtanh.f32 %v1787_v52  ;;  %v2463_v52 = vld [vmem:[%s3199_s20 + $0x278] sm:$0xf0] }
 0x13c   : > { %v1619_v62 = vpop.f32.mrf.mxu2  ;;  %v1284_v3 = vpop.f32.mrf.mxu0 }
 0x13d   : > { %v1788_v63 = vpop.f32.mrf.mxu3  ;;  %v1620_v2 = vadd.f32 %v1619_v62, %v1451_v61  ;;  %v1453_v4 = vpop.f32.mrf.mxu1  ;;  %v2462_v61 = vor.u32 %v2871_v50, %v2461_v49  ;;  %v2466_v62 = vor.u32 %v2869_v51, %v2463_v52 }
 0x13e   : > { %v1454_v9 = vadd.f32 %v1453_v4, %v1284_v3 }
 0x13f   : > { %v3009_v7 = vpop.eup %3008  ;;  %v1789_v8 = vadd.f32 %v1788_v63, %v1620_v2  ;;  %1323 = vmatmul.bf16.gmra.mxu0 %v2422_v0 }
 0x140   : > { %1986 = vst [vmem:[%s3291_s24 + $0x80] sm:$0xff] %v3009_v7  ;;  %1492 = vmatmul.bf16.gmra.mxu1 %v2426_v1 }
 0x141   : > { %3010 = vtanh.f32 %v1789_v8  ;;  %1661 = vmatmul.bf16.gmra.mxu2 %v2430_v5 }
 0x142   : > { %1830 = vmatmul.bf16.gmra.mxu3 %v2434_v6 }
 0x144   : > { %v1622_v10 = vpop.f32.mrf.mxu2  ;;  %v1286_v13 = vpop.f32.mrf.mxu0 }
 0x145   : > { %v1791_v11 = vpop.f32.mrf.mxu3  ;;  %v1623_v12 = vadd.f32 %v1622_v10, %v1454_v9  ;;  %v1455_v14 = vpop.f32.mrf.mxu1  ;;  %v2469_v9 = vld [vmem:[%s3199_s20 + $0x280] sm:$0xf]  ;;  %v2874_v10 = vld [vmem:[%s3199_s20 + $0x28c] sm:$0xf0] }
 0x146   : > { %v1456_v25 = vadd.f32 %v1455_v14, %v1286_v13  ;;  %v2477_v13 = vld [vmem:[%s3199_s20 + $0x288] sm:$0xf]  ;;  %v2875_v14 = vld [vmem:[%s3199_s20 + $0x294] sm:$0xf0]  ;;  %v2470_v20 = vor.u32 %v2874_v10, %v2469_v9 }
 0x147   : > { %v3011_v15 = vpop.eup %3010  ;;  %v1792_v16 = vadd.f32 %v1791_v11, %v1623_v12  ;;  %v2872_v11 = vld [vmem:[%s3199_s20 + $0x284] sm:$0xf]  ;;  %v2471_v12 = vld [vmem:[%s3199_s20 + $0x290] sm:$0xf0] }
 0x148   : > { %1987 = vst [vmem:[%s3291_s24 + $0x88] sm:$0xff] %v3011_v15  ;;  %v2873_v15 = vld [vmem:[%s3199_s20 + $0x28c] sm:$0xf]  ;;  %v2474_v21 = vor.u32 %v2872_v11, %v2471_v12 }
 0x149   : > { %3012 = vtanh.f32 %v1792_v16  ;;  %v2479_v16 = vld [vmem:[%s3199_s20 + $0x298] sm:$0xf0] }
 0x14c   : > { %v1624_v26 = vpop.f32.mrf.mxu2  ;;  %v1289_v31 = vpop.f32.mrf.mxu0 }
 0x14d   : > { %v1793_v27 = vpop.f32.mrf.mxu3  ;;  %v1625_v30 = vadd.f32 %v1624_v26, %v1456_v25  ;;  %v1458_v32 = vpop.f32.mrf.mxu1  ;;  %v2478_v25 = vor.u32 %v2875_v14, %v2477_v13  ;;  %v2482_v26 = vor.u32 %v2873_v15, %v2479_v16 }
 0x14e   : > { %v1459_v37 = vadd.f32 %v1458_v32, %v1289_v31 }
 0x14f   : > { %v3013_v35 = vpop.eup %3012  ;;  %v1794_v36 = vadd.f32 %v1793_v27, %v1625_v30  ;;  %1328 = vmatmul.bf16.gmra.mxu0 %v2438_v28 }
 0x150   : > { %1988 = vst [vmem:[%s3291_s24 + $0x90] sm:$0xff] %v3013_v35  ;;  %1497 = vmatmul.bf16.gmra.mxu1 %v2442_v29 }
 0x151   : > { %3014 = vtanh.f32 %v1794_v36  ;;  %1666 = vmatmul.bf16.gmra.mxu2 %v2446_v33 }
 0x152   : > { %1835 = vmatmul.bf16.gmra.mxu3 %v2450_v34 }
 0x154   : > { %v1627_v38 = vpop.f32.mrf.mxu2  ;;  %v1291_v41 = vpop.f32.mrf.mxu0 }
 0x155   : > { %v1796_v39 = vpop.f32.mrf.mxu3  ;;  %v1628_v40 = vadd.f32 %v1627_v38, %v1459_v37  ;;  %v1460_v42 = vpop.f32.mrf.mxu1  ;;  %v2485_v37 = vld [vmem:[%s3199_s20 + $0x2a0] sm:$0xf]  ;;  %v2878_v38 = vld [vmem:[%s3199_s20 + $0x2ac] sm:$0xf0] }
 0x156   : > { %v1461_v53 = vadd.f32 %v1460_v42, %v1291_v41  ;;  %v2493_v41 = vld [vmem:[%s3199_s20 + $0x2a8] sm:$0xf]  ;;  %v2879_v42 = vld [vmem:[%s3199_s20 + $0x2b4] sm:$0xf0]  ;;  %v2486_v48 = vor.u32 %v2878_v38, %v2485_v37 }
 0x157   : > { %v3015_v43 = vpop.eup %3014  ;;  %v1797_v44 = vadd.f32 %v1796_v39, %v1628_v40  ;;  %v2876_v39 = vld [vmem:[%s3199_s20 + $0x2a4] sm:$0xf]  ;;  %v2487_v40 = vld [vmem:[%s3199_s20 + $0x2b0] sm:$0xf0] }
 0x158   : > { %1989 = vst [vmem:[%s3291_s24 + $0x98] sm:$0xff] %v3015_v43  ;;  %v2877_v43 = vld [vmem:[%s3199_s20 + $0x2ac] sm:$0xf]  ;;  %v2490_v49 = vor.u32 %v2876_v39, %v2487_v40 }
 0x159   : > { %3016 = vtanh.f32 %v1797_v44  ;;  %v2495_v44 = vld [vmem:[%s3199_s20 + $0x2b8] sm:$0xf0] }
 0x15c   : > { %v1629_v54 = vpop.f32.mrf.mxu2  ;;  %v1294_v59 = vpop.f32.mrf.mxu0 }
 0x15d   : > { %v1798_v55 = vpop.f32.mrf.mxu3  ;;  %v1630_v58 = vadd.f32 %v1629_v54, %v1461_v53  ;;  %v1463_v60 = vpop.f32.mrf.mxu1  ;;  %v2494_v53 = vor.u32 %v2879_v42, %v2493_v41  ;;  %v2498_v54 = vor.u32 %v2877_v43, %v2495_v44 }
 0x15e   : > { %v1464_v1 = vadd.f32 %v1463_v60, %v1294_v59 }
 0x15f   : > { %v3017_v63 = vpop.eup %3016  ;;  %v1799_v0 = vadd.f32 %v1798_v55, %v1630_v58  ;;  %1333 = vmatmul.bf16.gmra.mxu0 %v2454_v56 }
 0x160   : > { %1990 = vst [vmem:[%s3291_s24 + $0xa0] sm:$0xff] %v3017_v63  ;;  %1502 = vmatmul.bf16.gmra.mxu1 %v2458_v57 }
 0x161   : > { %3018 = vtanh.f32 %v1799_v0  ;;  %1671 = vmatmul.bf16.gmra.mxu2 %v2462_v61 }
 0x162   : > { %1840 = vmatmul.bf16.gmra.mxu3 %v2466_v62 }
 0x164   : > { %v1632_v2 = vpop.f32.mrf.mxu2  ;;  %v1296_v5 = vpop.f32.mrf.mxu0 }
 0x165   : > { %v1801_v3 = vpop.f32.mrf.mxu3  ;;  %v1633_v4 = vadd.f32 %v1632_v2, %v1464_v1  ;;  %v1465_v6 = vpop.f32.mrf.mxu1  ;;  %v2501_v1 = vld [vmem:[%s3199_s20 + $0x2c0] sm:$0xf]  ;;  %v2882_v2 = vld [vmem:[%s3199_s20 + $0x2cc] sm:$0xf0] }
 0x166   : > { %v1466_v17 = vadd.f32 %v1465_v6, %v1296_v5  ;;  %v2509_v5 = vld [vmem:[%s3199_s20 + $0x2c8] sm:$0xf]  ;;  %v2883_v6 = vld [vmem:[%s3199_s20 + $0x2d4] sm:$0xf0]  ;;  %v2502_v12 = vor.u32 %v2882_v2, %v2501_v1 }
 0x167   : > { %v3019_v7 = vpop.eup %3018  ;;  %v1802_v8 = vadd.f32 %v1801_v3, %v1633_v4  ;;  %v2880_v3 = vld [vmem:[%s3199_s20 + $0x2c4] sm:$0xf]  ;;  %v2503_v4 = vld [vmem:[%s3199_s20 + $0x2d0] sm:$0xf0] }
 0x168   : > { %1991 = vst [vmem:[%s3291_s24 + $0xa8] sm:$0xff] %v3019_v7  ;;  %v2881_v7 = vld [vmem:[%s3199_s20 + $0x2cc] sm:$0xf]  ;;  %v2506_v13 = vor.u32 %v2880_v3, %v2503_v4 }
 0x169   : > { %3020 = vtanh.f32 %v1802_v8  ;;  %v2511_v8 = vld [vmem:[%s3199_s20 + $0x2d8] sm:$0xf0] }
 0x16c   : > { %v1634_v18 = vpop.f32.mrf.mxu2  ;;  %v1299_v23 = vpop.f32.mrf.mxu0 }
 0x16d   : > { %v1803_v19 = vpop.f32.mrf.mxu3  ;;  %v1635_v22 = vadd.f32 %v1634_v18, %v1466_v17  ;;  %v1468_v24 = vpop.f32.mrf.mxu1  ;;  %v2510_v17 = vor.u32 %v2883_v6, %v2509_v5  ;;  %v2514_v18 = vor.u32 %v2881_v7, %v2511_v8 }
 0x16e   : > { %v1469_v29 = vadd.f32 %v1468_v24, %v1299_v23 }
 0x16f   : > { %v3021_v27 = vpop.eup %3020  ;;  %v1804_v28 = vadd.f32 %v1803_v19, %v1635_v22  ;;  %1338 = vmatmul.bf16.gmra.mxu0 %v2470_v20 }
 0x170   : > { %1992 = vst [vmem:[%s3291_s24 + $0xb0] sm:$0xff] %v3021_v27  ;;  %1507 = vmatmul.bf16.gmra.mxu1 %v2474_v21 }
 0x171   : > { %3022 = vtanh.f32 %v1804_v28  ;;  %1676 = vmatmul.bf16.gmra.mxu2 %v2478_v25 }
 0x172   : > { %1845 = vmatmul.bf16.gmra.mxu3 %v2482_v26 }
 0x174   : > { %v1637_v30 = vpop.f32.mrf.mxu2  ;;  %v1301_v33 = vpop.f32.mrf.mxu0 }
 0x175   : > { %v1806_v31 = vpop.f32.mrf.mxu3  ;;  %v1638_v32 = vadd.f32 %v1637_v30, %v1469_v29  ;;  %v1470_v34 = vpop.f32.mrf.mxu1  ;;  %v2517_v29 = vld [vmem:[%s3199_s20 + $0x2e0] sm:$0xf]  ;;  %v2886_v30 = vld [vmem:[%s3199_s20 + $0x2ec] sm:$0xf0] }
 0x176   : > { %v1471_v45 = vadd.f32 %v1470_v34, %v1301_v33  ;;  %v2525_v33 = vld [vmem:[%s3199_s20 + $0x2e8] sm:$0xf]  ;;  %v2887_v34 = vld [vmem:[%s3199_s20 + $0x2f4] sm:$0xf0]  ;;  %v2518_v40 = vor.u32 %v2886_v30, %v2517_v29 }
 0x177   : > { %v3023_v35 = vpop.eup %3022  ;;  %v1807_v36 = vadd.f32 %v1806_v31, %v1638_v32  ;;  %v2884_v31 = vld [vmem:[%s3199_s20 + $0x2e4] sm:$0xf]  ;;  %v2519_v32 = vld [vmem:[%s3199_s20 + $0x2f0] sm:$0xf0] }
 0x178   : > { %1993 = vst [vmem:[%s3291_s24 + $0xb8] sm:$0xff] %v3023_v35  ;;  %v2885_v35 = vld [vmem:[%s3199_s20 + $0x2ec] sm:$0xf]  ;;  %v2522_v41 = vor.u32 %v2884_v31, %v2519_v32 }
 0x179   : > { %3024 = vtanh.f32 %v1807_v36  ;;  %v2527_v36 = vld [vmem:[%s3199_s20 + $0x2f8] sm:$0xf0] }
 0x17c   : > { %v1639_v46 = vpop.f32.mrf.mxu2  ;;  %v1304_v51 = vpop.f32.mrf.mxu0 }
 0x17d   : > { %v1808_v47 = vpop.f32.mrf.mxu3  ;;  %v1640_v50 = vadd.f32 %v1639_v46, %v1471_v45  ;;  %v1473_v52 = vpop.f32.mrf.mxu1  ;;  %v2526_v45 = vor.u32 %v2887_v34, %v2525_v33  ;;  %v2530_v46 = vor.u32 %v2885_v35, %v2527_v36 }
 0x17e   : > { %v1474_v57 = vadd.f32 %v1473_v52, %v1304_v51 }
 0x17f   : > { %v3025_v55 = vpop.eup %3024  ;;  %v1809_v56 = vadd.f32 %v1808_v47, %v1640_v50  ;;  %1343 = vmatmul.bf16.gmra.mxu0 %v2486_v48 }
 0x180   : > { %1994 = vst [vmem:[%s3291_s24 + $0xc0] sm:$0xff] %v3025_v55  ;;  %1512 = vmatmul.bf16.gmra.mxu1 %v2490_v49 }
 0x181   : > { %3026 = vtanh.f32 %v1809_v56  ;;  %1681 = vmatmul.bf16.gmra.mxu2 %v2494_v53 }
 0x182   : > { %1850 = vmatmul.bf16.gmra.mxu3 %v2498_v54 }
 0x184   : > { %v1642_v58 = vpop.f32.mrf.mxu2  ;;  %v1306_v61 = vpop.f32.mrf.mxu0 }
 0x185   : > { %v1811_v59 = vpop.f32.mrf.mxu3  ;;  %v1643_v60 = vadd.f32 %v1642_v58, %v1474_v57  ;;  %v1475_v62 = vpop.f32.mrf.mxu1  ;;  %v2533_v57 = vld [vmem:[%s3199_s20 + $0x300] sm:$0xf]  ;;  %v2890_v58 = vld [vmem:[%s3199_s20 + $0x30c] sm:$0xf0] }
 0x186   : > { %v1476_v9 = vadd.f32 %v1475_v62, %v1306_v61  ;;  %v2541_v61 = vld [vmem:[%s3199_s20 + $0x308] sm:$0xf]  ;;  %v2891_v62 = vld [vmem:[%s3199_s20 + $0x314] sm:$0xf0]  ;;  %v2534_v4 = vor.u32 %v2890_v58, %v2533_v57 }
 0x187   : > { %v3027_v63 = vpop.eup %3026  ;;  %v1812_v0 = vadd.f32 %v1811_v59, %v1643_v60  ;;  %v2888_v59 = vld [vmem:[%s3199_s20 + $0x304] sm:$0xf]  ;;  %v2535_v60 = vld [vmem:[%s3199_s20 + $0x310] sm:$0xf0] }
 0x188   : > { %1995 = vst [vmem:[%s3291_s24 + $0xc8] sm:$0xff] %v3027_v63  ;;  %v2889_v63 = vld [vmem:[%s3199_s20 + $0x30c] sm:$0xf]  ;;  %v2538_v5 = vor.u32 %v2888_v59, %v2535_v60 }
 0x189   : > { %3028 = vtanh.f32 %v1812_v0  ;;  %v2543_v0 = vld [vmem:[%s3199_s20 + $0x318] sm:$0xf0] }
 0x18c   : > { %v1644_v10 = vpop.f32.mrf.mxu2  ;;  %v1309_v15 = vpop.f32.mrf.mxu0 }
 0x18d   : > { %v1813_v11 = vpop.f32.mrf.mxu3  ;;  %v1645_v14 = vadd.f32 %v1644_v10, %v1476_v9  ;;  %v1478_v16 = vpop.f32.mrf.mxu1  ;;  %v2542_v9 = vor.u32 %v2891_v62, %v2541_v61  ;;  %v2546_v10 = vor.u32 %v2889_v63, %v2543_v0 }
 0x18e   : > { %v1479_v21 = vadd.f32 %v1478_v16, %v1309_v15 }
 0x18f   : > { %v3029_v19 = vpop.eup %3028  ;;  %v1814_v20 = vadd.f32 %v1813_v11, %v1645_v14  ;;  %1348 = vmatmul.bf16.gmra.mxu0 %v2502_v12 }
 0x190   : > { %1996 = vst [vmem:[%s3291_s24 + $0xd0] sm:$0xff] %v3029_v19  ;;  %1517 = vmatmul.bf16.gmra.mxu1 %v2506_v13 }
 0x191   : > { %3030 = vtanh.f32 %v1814_v20  ;;  %1686 = vmatmul.bf16.gmra.mxu2 %v2510_v17 }
 0x192   : > { %1855 = vmatmul.bf16.gmra.mxu3 %v2514_v18 }
 0x194   : > { %v1647_v22 = vpop.f32.mrf.mxu2  ;;  %v1311_v25 = vpop.f32.mrf.mxu0 }
 0x195   : > { %v1816_v23 = vpop.f32.mrf.mxu3  ;;  %v1648_v24 = vadd.f32 %v1647_v22, %v1479_v21  ;;  %v1480_v26 = vpop.f32.mrf.mxu1  ;;  %v2549_v21 = vld [vmem:[%s3199_s20 + $0x320] sm:$0xf]  ;;  %v2894_v22 = vld [vmem:[%s3199_s20 + $0x32c] sm:$0xf0] }
 0x196   : > { %v1481_v37 = vadd.f32 %v1480_v26, %v1311_v25  ;;  %v2557_v25 = vld [vmem:[%s3199_s20 + $0x328] sm:$0xf]  ;;  %v2895_v26 = vld [vmem:[%s3199_s20 + $0x334] sm:$0xf0]  ;;  %v2550_v32 = vor.u32 %v2894_v22, %v2549_v21 }
 0x197   : > { %v3031_v27 = vpop.eup %3030  ;;  %v1817_v28 = vadd.f32 %v1816_v23, %v1648_v24  ;;  %v2892_v23 = vld [vmem:[%s3199_s20 + $0x324] sm:$0xf]  ;;  %v2551_v24 = vld [vmem:[%s3199_s20 + $0x330] sm:$0xf0] }
 0x198   : > { %1997 = vst [vmem:[%s3291_s24 + $0xd8] sm:$0xff] %v3031_v27  ;;  %v2893_v27 = vld [vmem:[%s3199_s20 + $0x32c] sm:$0xf]  ;;  %v2554_v33 = vor.u32 %v2892_v23, %v2551_v24 }
 0x199   : > { %3032 = vtanh.f32 %v1817_v28  ;;  %v2559_v28 = vld [vmem:[%s3199_s20 + $0x338] sm:$0xf0] }
 0x19c   : > { %v1649_v38 = vpop.f32.mrf.mxu2  ;;  %v1314_v43 = vpop.f32.mrf.mxu0 }
 0x19d   : > { %v1818_v39 = vpop.f32.mrf.mxu3  ;;  %v1650_v42 = vadd.f32 %v1649_v38, %v1481_v37  ;;  %v1483_v44 = vpop.f32.mrf.mxu1  ;;  %v2558_v37 = vor.u32 %v2895_v26, %v2557_v25  ;;  %v2562_v38 = vor.u32 %v2893_v27, %v2559_v28 }
 0x19e   : > { %v1484_v49 = vadd.f32 %v1483_v44, %v1314_v43 }
 0x19f   : > { %v3033_v47 = vpop.eup %3032  ;;  %v1819_v48 = vadd.f32 %v1818_v39, %v1650_v42  ;;  %1353 = vmatmul.bf16.gmra.mxu0 %v2518_v40 }
 0x1a0   : > { %1998 = vst [vmem:[%s3291_s24 + $0xe0] sm:$0xff] %v3033_v47  ;;  %1522 = vmatmul.bf16.gmra.mxu1 %v2522_v41 }
 0x1a1   : > { %3034 = vtanh.f32 %v1819_v48  ;;  %1691 = vmatmul.bf16.gmra.mxu2 %v2526_v45 }
 0x1a2   : > { %1860 = vmatmul.bf16.gmra.mxu3 %v2530_v46 }
 0x1a4   : > { %v1652_v50 = vpop.f32.mrf.mxu2  ;;  %v1316_v53 = vpop.f32.mrf.mxu0 }
 0x1a5   : > { %v1821_v51 = vpop.f32.mrf.mxu3  ;;  %v1653_v52 = vadd.f32 %v1652_v50, %v1484_v49  ;;  %v1485_v54 = vpop.f32.mrf.mxu1  ;;  %v2565_v49 = vld [vmem:[%s3199_s20 + $0x340] sm:$0xf]  ;;  %v2898_v50 = vld [vmem:[%s3199_s20 + $0x34c] sm:$0xf0] }
 0x1a6   : > { %v1486_v1 = vadd.f32 %v1485_v54, %v1316_v53  ;;  %v2573_v53 = vld [vmem:[%s3199_s20 + $0x348] sm:$0xf]  ;;  %v2899_v54 = vld [vmem:[%s3199_s20 + $0x354] sm:$0xf0]  ;;  %v2566_v60 = vor.u32 %v2898_v50, %v2565_v49 }
 0x1a7   : > { %v3035_v55 = vpop.eup %3034  ;;  %v1822_v56 = vadd.f32 %v1821_v51, %v1653_v52  ;;  %v2896_v51 = vld [vmem:[%s3199_s20 + $0x344] sm:$0xf]  ;;  %v2567_v52 = vld [vmem:[%s3199_s20 + $0x350] sm:$0xf0] }
 0x1a8   : > { %1999 = vst [vmem:[%s3291_s24 + $0xe8] sm:$0xff] %v3035_v55  ;;  %v2897_v55 = vld [vmem:[%s3199_s20 + $0x34c] sm:$0xf]  ;;  %v2570_v61 = vor.u32 %v2896_v51, %v2567_v52 }
 0x1a9   : > { %3036 = vtanh.f32 %v1822_v56  ;;  %v2575_v56 = vld [vmem:[%s3199_s20 + $0x358] sm:$0xf0] }
 0x1ac   : > { %v1654_v2 = vpop.f32.mrf.mxu2  ;;  %v1319_v7 = vpop.f32.mrf.mxu0 }
 0x1ad   : > { %v1823_v3 = vpop.f32.mrf.mxu3  ;;  %v1655_v6 = vadd.f32 %v1654_v2, %v1486_v1  ;;  %v1488_v8 = vpop.f32.mrf.mxu1  ;;  %v2574_v1 = vor.u32 %v2899_v54, %v2573_v53  ;;  %v2578_v2 = vor.u32 %v2897_v55, %v2575_v56 }
 0x1ae   : > { %v1489_v13 = vadd.f32 %v1488_v8, %v1319_v7 }
 0x1af   : > { %v3037_v11 = vpop.eup %3036  ;;  %v1824_v12 = vadd.f32 %v1823_v3, %v1655_v6  ;;  %1358 = vmatmul.bf16.gmra.mxu0 %v2534_v4 }
 0x1b0   : > { %2000 = vst [vmem:[%s3291_s24 + $0xf0] sm:$0xff] %v3037_v11  ;;  %1527 = vmatmul.bf16.gmra.mxu1 %v2538_v5 }
 0x1b1   : > { %3038 = vtanh.f32 %v1824_v12  ;;  %1696 = vmatmul.bf16.gmra.mxu2 %v2542_v9 }
 0x1b2   : > { %1865 = vmatmul.bf16.gmra.mxu3 %v2546_v10 }
 0x1b4   : > { %v1657_v14 = vpop.f32.mrf.mxu2  ;;  %v1321_v17 = vpop.f32.mrf.mxu0 }
 0x1b5   : > { %v1826_v15 = vpop.f32.mrf.mxu3  ;;  %v1658_v16 = vadd.f32 %v1657_v14, %v1489_v13  ;;  %v1490_v18 = vpop.f32.mrf.mxu1  ;;  %v2581_v13 = vld [vmem:[%s3199_s20 + $0x360] sm:$0xf]  ;;  %v2902_v14 = vld [vmem:[%s3199_s20 + $0x36c] sm:$0xf0] }
 0x1b6   : > { %v1491_v29 = vadd.f32 %v1490_v18, %v1321_v17  ;;  %v2589_v17 = vld [vmem:[%s3199_s20 + $0x368] sm:$0xf]  ;;  %v2903_v18 = vld [vmem:[%s3199_s20 + $0x374] sm:$0xf0]  ;;  %v2582_v24 = vor.u32 %v2902_v14, %v2581_v13 }
 0x1b7   : > { %v3039_v19 = vpop.eup %3038  ;;  %v1827_v20 = vadd.f32 %v1826_v15, %v1658_v16  ;;  %v2900_v15 = vld [vmem:[%s3199_s20 + $0x364] sm:$0xf]  ;;  %v2583_v16 = vld [vmem:[%s3199_s20 + $0x370] sm:$0xf0] }
 0x1b8   : > { %2001 = vst [vmem:[%s3291_s24 + $0xf8] sm:$0xff] %v3039_v19  ;;  %v2901_v19 = vld [vmem:[%s3199_s20 + $0x36c] sm:$0xf]  ;;  %v2586_v25 = vor.u32 %v2900_v15, %v2583_v16 }
 0x1b9   : > { %3040 = vtanh.f32 %v1827_v20  ;;  %v2591_v20 = vld [vmem:[%s3199_s20 + $0x378] sm:$0xf0] }
 0x1bc   : > { %v1659_v30 = vpop.f32.mrf.mxu2  ;;  %v1324_v35 = vpop.f32.mrf.mxu0 }
 0x1bd   : > { %v1828_v31 = vpop.f32.mrf.mxu3  ;;  %v1660_v34 = vadd.f32 %v1659_v30, %v1491_v29  ;;  %v1493_v36 = vpop.f32.mrf.mxu1  ;;  %v2590_v29 = vor.u32 %v2903_v18, %v2589_v17  ;;  %v2594_v30 = vor.u32 %v2901_v19, %v2591_v20 }
 0x1be   : > { %v1494_v41 = vadd.f32 %v1493_v36, %v1324_v35 }
 0x1bf   : > { %v3041_v39 = vpop.eup %3040  ;;  %v1829_v40 = vadd.f32 %v1828_v31, %v1660_v34  ;;  %1363 = vmatmul.bf16.gmra.mxu0 %v2550_v32 }
 0x1c0   : > { %2002 = vst [vmem:[%s3291_s24 + $0x100] sm:$0xff] %v3041_v39  ;;  %1532 = vmatmul.bf16.gmra.mxu1 %v2554_v33 }
 0x1c1   : > { %3042 = vtanh.f32 %v1829_v40  ;;  %1701 = vmatmul.bf16.gmra.mxu2 %v2558_v37 }
 0x1c2   : > { %1870 = vmatmul.bf16.gmra.mxu3 %v2562_v38 }
 0x1c4   : > { %v1662_v42 = vpop.f32.mrf.mxu2  ;;  %v1326_v45 = vpop.f32.mrf.mxu0 }
 0x1c5   : > { %v1831_v43 = vpop.f32.mrf.mxu3  ;;  %v1663_v44 = vadd.f32 %v1662_v42, %v1494_v41  ;;  %v1495_v46 = vpop.f32.mrf.mxu1  ;;  %v2597_v41 = vld [vmem:[%s3199_s20 + $0x380] sm:$0xf]  ;;  %v2906_v42 = vld [vmem:[%s3199_s20 + $0x38c] sm:$0xf0] }
 0x1c6   : > { %v1496_v57 = vadd.f32 %v1495_v46, %v1326_v45  ;;  %v2605_v45 = vld [vmem:[%s3199_s20 + $0x388] sm:$0xf]  ;;  %v2907_v46 = vld [vmem:[%s3199_s20 + $0x394] sm:$0xf0]  ;;  %v2598_v52 = vor.u32 %v2906_v42, %v2597_v41 }
 0x1c7   : > { %v3043_v47 = vpop.eup %3042  ;;  %v1832_v48 = vadd.f32 %v1831_v43, %v1663_v44  ;;  %v2904_v43 = vld [vmem:[%s3199_s20 + $0x384] sm:$0xf]  ;;  %v2599_v44 = vld [vmem:[%s3199_s20 + $0x390] sm:$0xf0] }
 0x1c8   : > { %2003 = vst [vmem:[%s3291_s24 + $0x108] sm:$0xff] %v3043_v47  ;;  %v2905_v47 = vld [vmem:[%s3199_s20 + $0x38c] sm:$0xf]  ;;  %v2602_v53 = vor.u32 %v2904_v43, %v2599_v44 }
 0x1c9   : > { %3044 = vtanh.f32 %v1832_v48  ;;  %v2607_v48 = vld [vmem:[%s3199_s20 + $0x398] sm:$0xf0] }
 0x1cc   : > { %v1664_v58 = vpop.f32.mrf.mxu2  ;;  %v1329_v63 = vpop.f32.mrf.mxu0 }
 0x1cd   : > { %v1833_v59 = vpop.f32.mrf.mxu3  ;;  %v1665_v62 = vadd.f32 %v1664_v58, %v1496_v57  ;;  %v1498_v0 = vpop.f32.mrf.mxu1  ;;  %v2606_v57 = vor.u32 %v2907_v46, %v2605_v45  ;;  %v2610_v58 = vor.u32 %v2905_v47, %v2607_v48 }
 0x1ce   : > { %v1499_v5 = vadd.f32 %v1498_v0, %v1329_v63 }
 0x1cf   : > { %v3045_v3 = vpop.eup %3044  ;;  %v1834_v4 = vadd.f32 %v1833_v59, %v1665_v62  ;;  %1368 = vmatmul.bf16.gmra.mxu0 %v2566_v60 }
 0x1d0   : > { %2004 = vst [vmem:[%s3291_s24 + $0x110] sm:$0xff] %v3045_v3  ;;  %1537 = vmatmul.bf16.gmra.mxu1 %v2570_v61 }
 0x1d1   : > { %3046 = vtanh.f32 %v1834_v4  ;;  %1706 = vmatmul.bf16.gmra.mxu2 %v2574_v1 }
 0x1d2   : > { %1875 = vmatmul.bf16.gmra.mxu3 %v2578_v2 }
 0x1d4   : > { %v1667_v6 = vpop.f32.mrf.mxu2  ;;  %v1331_v9 = vpop.f32.mrf.mxu0 }
 0x1d5   : > { %v1836_v7 = vpop.f32.mrf.mxu3  ;;  %v1668_v8 = vadd.f32 %v1667_v6, %v1499_v5  ;;  %v1500_v10 = vpop.f32.mrf.mxu1  ;;  %v2613_v5 = vld [vmem:[%s3199_s20 + $0x3a0] sm:$0xf]  ;;  %v2910_v6 = vld [vmem:[%s3199_s20 + $0x3ac] sm:$0xf0] }
 0x1d6   : > { %v1501_v21 = vadd.f32 %v1500_v10, %v1331_v9  ;;  %v2621_v9 = vld [vmem:[%s3199_s20 + $0x3a8] sm:$0xf]  ;;  %v2911_v10 = vld [vmem:[%s3199_s20 + $0x3b4] sm:$0xf0]  ;;  %v2614_v16 = vor.u32 %v2910_v6, %v2613_v5 }
 0x1d7   : > { %v3047_v11 = vpop.eup %3046  ;;  %v1837_v12 = vadd.f32 %v1836_v7, %v1668_v8  ;;  %v2908_v7 = vld [vmem:[%s3199_s20 + $0x3a4] sm:$0xf]  ;;  %v2615_v8 = vld [vmem:[%s3199_s20 + $0x3b0] sm:$0xf0] }
 0x1d8   : > { %2005 = vst [vmem:[%s3291_s24 + $0x118] sm:$0xff] %v3047_v11  ;;  %v2909_v11 = vld [vmem:[%s3199_s20 + $0x3ac] sm:$0xf]  ;;  %v2618_v17 = vor.u32 %v2908_v7, %v2615_v8 }
 0x1d9   : > { %3048 = vtanh.f32 %v1837_v12  ;;  %v2623_v12 = vld [vmem:[%s3199_s20 + $0x3b8] sm:$0xf0] }
 0x1dc   : > { %v1669_v22 = vpop.f32.mrf.mxu2  ;;  %v1334_v27 = vpop.f32.mrf.mxu0 }
 0x1dd   : > { %v1838_v23 = vpop.f32.mrf.mxu3  ;;  %v1670_v26 = vadd.f32 %v1669_v22, %v1501_v21  ;;  %v1503_v28 = vpop.f32.mrf.mxu1  ;;  %v2622_v21 = vor.u32 %v2911_v10, %v2621_v9  ;;  %v2626_v22 = vor.u32 %v2909_v11, %v2623_v12 }
 0x1de   : > { %v1504_v33 = vadd.f32 %v1503_v28, %v1334_v27 }
 0x1df   : > { %v3049_v31 = vpop.eup %3048  ;;  %v1839_v32 = vadd.f32 %v1838_v23, %v1670_v26  ;;  %1373 = vmatmul.bf16.gmra.mxu0 %v2582_v24 }
 0x1e0   : > { %2006 = vst [vmem:[%s3291_s24 + $0x120] sm:$0xff] %v3049_v31  ;;  %1542 = vmatmul.bf16.gmra.mxu1 %v2586_v25 }
 0x1e1   : > { %3050 = vtanh.f32 %v1839_v32  ;;  %1711 = vmatmul.bf16.gmra.mxu2 %v2590_v29 }
 0x1e2   : > { %1880 = vmatmul.bf16.gmra.mxu3 %v2594_v30 }
 0x1e4   : > { %v1672_v34 = vpop.f32.mrf.mxu2  ;;  %v1336_v37 = vpop.f32.mrf.mxu0 }
 0x1e5   : > { %v1841_v35 = vpop.f32.mrf.mxu3  ;;  %v1673_v36 = vadd.f32 %v1672_v34, %v1504_v33  ;;  %v1505_v38 = vpop.f32.mrf.mxu1  ;;  %v2629_v33 = vld [vmem:[%s3199_s20 + $0x3c0] sm:$0xf]  ;;  %v2914_v34 = vld [vmem:[%s3199_s20 + $0x3cc] sm:$0xf0] }
 0x1e6   : > { %v1506_v49 = vadd.f32 %v1505_v38, %v1336_v37  ;;  %v2637_v37 = vld [vmem:[%s3199_s20 + $0x3c8] sm:$0xf]  ;;  %v2915_v38 = vld [vmem:[%s3199_s20 + $0x3d4] sm:$0xf0]  ;;  %v2630_v44 = vor.u32 %v2914_v34, %v2629_v33 }
 0x1e7   : > { %v3051_v39 = vpop.eup %3050  ;;  %v1842_v40 = vadd.f32 %v1841_v35, %v1673_v36  ;;  %v2912_v35 = vld [vmem:[%s3199_s20 + $0x3c4] sm:$0xf]  ;;  %v2631_v36 = vld [vmem:[%s3199_s20 + $0x3d0] sm:$0xf0] }
 0x1e8   : > { %2007 = vst [vmem:[%s3291_s24 + $0x128] sm:$0xff] %v3051_v39  ;;  %v2913_v39 = vld [vmem:[%s3199_s20 + $0x3cc] sm:$0xf]  ;;  %v2634_v45 = vor.u32 %v2912_v35, %v2631_v36 }
 0x1e9   : > { %3052 = vtanh.f32 %v1842_v40  ;;  %v2639_v40 = vld [vmem:[%s3199_s20 + $0x3d8] sm:$0xf0] }
 0x1ec   : > { %v1674_v50 = vpop.f32.mrf.mxu2  ;;  %v1339_v55 = vpop.f32.mrf.mxu0 }
 0x1ed   : > { %v1843_v51 = vpop.f32.mrf.mxu3  ;;  %v1675_v54 = vadd.f32 %v1674_v50, %v1506_v49  ;;  %v1508_v56 = vpop.f32.mrf.mxu1  ;;  %v2638_v49 = vor.u32 %v2915_v38, %v2637_v37  ;;  %v2642_v50 = vor.u32 %v2913_v39, %v2639_v40 }
 0x1ee   : > { %v1509_v61 = vadd.f32 %v1508_v56, %v1339_v55 }
 0x1ef   : > { %v3053_v59 = vpop.eup %3052  ;;  %v1844_v60 = vadd.f32 %v1843_v51, %v1675_v54  ;;  %1378 = vmatmul.bf16.gmra.mxu0 %v2598_v52 }
 0x1f0   : > { %2008 = vst [vmem:[%s3291_s24 + $0x130] sm:$0xff] %v3053_v59  ;;  %1547 = vmatmul.bf16.gmra.mxu1 %v2602_v53 }
 0x1f1   : > { %3054 = vtanh.f32 %v1844_v60  ;;  %1716 = vmatmul.bf16.gmra.mxu2 %v2606_v57 }
 0x1f2   : > { %1885 = vmatmul.bf16.gmra.mxu3 %v2610_v58 }
 0x1f4   : > { %v1677_v62 = vpop.f32.mrf.mxu2  ;;  %v1341_v1 = vpop.f32.mrf.mxu0 }
 0x1f5   : > { %v1846_v63 = vpop.f32.mrf.mxu3  ;;  %v1678_v0 = vadd.f32 %v1677_v62, %v1509_v61  ;;  %v1510_v2 = vpop.f32.mrf.mxu1  ;;  %v2645_v61 = vld [vmem:[%s3199_s20 + $0x3e0] sm:$0xf]  ;;  %v2918_v62 = vld [vmem:[%s3199_s20 + $0x3ec] sm:$0xf0] }
 0x1f6   : > { %v1511_v13 = vadd.f32 %v1510_v2, %v1341_v1  ;;  %v2653_v1 = vld [vmem:[%s3199_s20 + $0x3e8] sm:$0xf]  ;;  %v2919_v2 = vld [vmem:[%s3199_s20 + $0x3f4] sm:$0xf0]  ;;  %v2646_v8 = vor.u32 %v2918_v62, %v2645_v61 }
 0x1f7   : > { %v3055_v3 = vpop.eup %3054  ;;  %v1847_v4 = vadd.f32 %v1846_v63, %v1678_v0  ;;  %v2916_v63 = vld [vmem:[%s3199_s20 + $0x3e4] sm:$0xf]  ;;  %v2647_v0 = vld [vmem:[%s3199_s20 + $0x3f0] sm:$0xf0] }
 0x1f8   : > { %2009 = vst [vmem:[%s3291_s24 + $0x138] sm:$0xff] %v3055_v3  ;;  %v2917_v3 = vld [vmem:[%s3199_s20 + $0x3ec] sm:$0xf]  ;;  %v2650_v9 = vor.u32 %v2916_v63, %v2647_v0 }
 0x1f9   : > { %3056 = vtanh.f32 %v1847_v4  ;;  %v2655_v4 = vld [vmem:[%s3199_s20 + $0x3f8] sm:$0xf0] }
 0x1fc   : > { %v1679_v14 = vpop.f32.mrf.mxu2  ;;  %v1344_v19 = vpop.f32.mrf.mxu0 }
 0x1fd   : > { %v1848_v15 = vpop.f32.mrf.mxu3  ;;  %v1680_v18 = vadd.f32 %v1679_v14, %v1511_v13  ;;  %v1513_v20 = vpop.f32.mrf.mxu1  ;;  %v2654_v13 = vor.u32 %v2919_v2, %v2653_v1  ;;  %v2658_v14 = vor.u32 %v2917_v3, %v2655_v4 }
 0x1fe   : > { %v1514_v25 = vadd.f32 %v1513_v20, %v1344_v19 }
 0x1ff   : > { %v3057_v23 = vpop.eup %3056  ;;  %v1849_v24 = vadd.f32 %v1848_v15, %v1680_v18  ;;  %1383 = vmatmul.bf16.gmra.mxu0 %v2614_v16 }
 0x200   : > { %2010 = vst [vmem:[%s3291_s24 + $0x140] sm:$0xff] %v3057_v23  ;;  %1552 = vmatmul.bf16.gmra.mxu1 %v2618_v17 }
 0x201   : > { %3058 = vtanh.f32 %v1849_v24  ;;  %1721 = vmatmul.bf16.gmra.mxu2 %v2622_v21 }
 0x202   : > { %1890 = vmatmul.bf16.gmra.mxu3 %v2626_v22 }
 0x204   : > { %v1682_v26 = vpop.f32.mrf.mxu2  ;;  %v1346_v29 = vpop.f32.mrf.mxu0 }
 0x205   : > { %v1851_v27 = vpop.f32.mrf.mxu3  ;;  %v1683_v28 = vadd.f32 %v1682_v26, %v1514_v25  ;;  %v1515_v30 = vpop.f32.mrf.mxu1 }
 0x206   : > { %v1516_v41 = vadd.f32 %v1515_v30, %v1346_v29 }
 0x207   : > { %v3059_v31 = vpop.eup %3058  ;;  %v1852_v32 = vadd.f32 %v1851_v27, %v1683_v28 }
 0x208   : > { %2011 = vst [vmem:[%s3291_s24 + $0x148] sm:$0xff] %v3059_v31 }
 0x209   : > { %3060 = vtanh.f32 %v1852_v32 }
 0x20c   : > { %v1684_v42 = vpop.f32.mrf.mxu2  ;;  %v1349_v47 = vpop.f32.mrf.mxu0 }
 0x20d   : > { %v1853_v43 = vpop.f32.mrf.mxu3  ;;  %v1685_v46 = vadd.f32 %v1684_v42, %v1516_v41  ;;  %v1518_v48 = vpop.f32.mrf.mxu1 }
 0x20e   : > { %v1519_v53 = vadd.f32 %v1518_v48, %v1349_v47 }
 0x20f   : > { %v3061_v51 = vpop.eup %3060  ;;  %v1854_v52 = vadd.f32 %v1853_v43, %v1685_v46  ;;  %1388 = vmatmul.bf16.gmra.mxu0 %v2630_v44 }
 0x210   : > { %2012 = vst [vmem:[%s3291_s24 + $0x150] sm:$0xff] %v3061_v51  ;;  %1557 = vmatmul.bf16.gmra.mxu1 %v2634_v45 }
 0x211   : > { %3062 = vtanh.f32 %v1854_v52  ;;  %1726 = vmatmul.bf16.gmra.mxu2 %v2638_v49 }
 0x212   : > { %1895 = vmatmul.bf16.gmra.mxu3 %v2642_v50 }
 0x214   : > { %v1687_v54 = vpop.f32.mrf.mxu2  ;;  %v1351_v57 = vpop.f32.mrf.mxu0 }
 0x215   : > { %v1856_v55 = vpop.f32.mrf.mxu3  ;;  %v1688_v56 = vadd.f32 %v1687_v54, %v1519_v53  ;;  %v1520_v58 = vpop.f32.mrf.mxu1 }
 0x216   : > { %v1521_v5 = vadd.f32 %v1520_v58, %v1351_v57 }
 0x217   : > { %v3063_v59 = vpop.eup %3062  ;;  %v1857_v60 = vadd.f32 %v1856_v55, %v1688_v56 }
 0x218   : > { %2013 = vst [vmem:[%s3291_s24 + $0x158] sm:$0xff] %v3063_v59 }
 0x219   : > { %3064 = vtanh.f32 %v1857_v60 }
 0x21c   : > { %v1689_v6 = vpop.f32.mrf.mxu2  ;;  %v1354_v11 = vpop.f32.mrf.mxu0 }
 0x21d   : > { %v1858_v7 = vpop.f32.mrf.mxu3  ;;  %v1690_v10 = vadd.f32 %v1689_v6, %v1521_v5  ;;  %v1523_v12 = vpop.f32.mrf.mxu1 }
 0x21e   : > { %v1524_v17 = vadd.f32 %v1523_v12, %v1354_v11 }
 0x21f   : > { %v3065_v15 = vpop.eup %3064  ;;  %v1859_v16 = vadd.f32 %v1858_v7, %v1690_v10  ;;  %1393 = vmatmul.bf16.gmra.mxu0 %v2646_v8 }
 0x220   : > { %2014 = vst [vmem:[%s3291_s24 + $0x160] sm:$0xff] %v3065_v15  ;;  %1562 = vmatmul.bf16.gmra.mxu1 %v2650_v9 }
 0x221   : > { %3066 = vtanh.f32 %v1859_v16  ;;  %1731 = vmatmul.bf16.gmra.mxu2 %v2654_v13 }
 0x222   : > { %1900 = vmatmul.bf16.gmra.mxu3 %v2658_v14 }
 0x224   : > { %v1692_v18 = vpop.f32.mrf.mxu2  ;;  %v1356_v21 = vpop.f32.mrf.mxu0 }
 0x225   : > { %v1861_v19 = vpop.f32.mrf.mxu3  ;;  %v1693_v20 = vadd.f32 %v1692_v18, %v1524_v17  ;;  %v1525_v22 = vpop.f32.mrf.mxu1 }
 0x226   : > { %v1526_v25 = vadd.f32 %v1525_v22, %v1356_v21 }
 0x227   : > { %v3067_v23 = vpop.eup %3066  ;;  %v1862_v24 = vadd.f32 %v1861_v19, %v1693_v20 }
 0x228   : > { %2015 = vst [vmem:[%s3291_s24 + $0x168] sm:$0xff] %v3067_v23 }
 0x229   : > { %3068 = vtanh.f32 %v1862_v24 }
 0x22c   : > { %v1694_v26 = vpop.f32.mrf.mxu2  ;;  %v1359_v29 = vpop.f32.mrf.mxu0 }
 0x22d   : > { %v1863_v27 = vpop.f32.mrf.mxu3  ;;  %v1695_v28 = vadd.f32 %v1694_v26, %v1526_v25  ;;  %v1528_v30 = vpop.f32.mrf.mxu1 }
 0x22e   : > { %v1529_v33 = vadd.f32 %v1528_v30, %v1359_v29 }
 0x22f   : > { %v3069_v31 = vpop.eup %3068  ;;  %v1864_v32 = vadd.f32 %v1863_v27, %v1695_v28 }
 0x230   : > { %2016 = vst [vmem:[%s3291_s24 + $0x170] sm:$0xff] %v3069_v31 }
 0x231   : > { %3070 = vtanh.f32 %v1864_v32 }
 0x234   : > { %v1697_v34 = vpop.f32.mrf.mxu2  ;;  %v1361_v37 = vpop.f32.mrf.mxu0 }
 0x235   : > { %v1866_v35 = vpop.f32.mrf.mxu3  ;;  %v1698_v36 = vadd.f32 %v1697_v34, %v1529_v33  ;;  %v1530_v38 = vpop.f32.mrf.mxu1 }
 0x236   : > { %v1531_v41 = vadd.f32 %v1530_v38, %v1361_v37 }
 0x237   : > { %v3071_v39 = vpop.eup %3070  ;;  %v1867_v40 = vadd.f32 %v1866_v35, %v1698_v36 }
 0x238   : > { %2017 = vst [vmem:[%s3291_s24 + $0x178] sm:$0xff] %v3071_v39 }
 0x239   : > { %3072 = vtanh.f32 %v1867_v40 }
 0x23c   : > { %v1699_v42 = vpop.f32.mrf.mxu2  ;;  %v1364_v45 = vpop.f32.mrf.mxu0 }
 0x23d   : > { %v1868_v43 = vpop.f32.mrf.mxu3  ;;  %v1700_v44 = vadd.f32 %v1699_v42, %v1531_v41  ;;  %v1533_v46 = vpop.f32.mrf.mxu1 }
 0x23e   : > { %v1534_v49 = vadd.f32 %v1533_v46, %v1364_v45 }
 0x23f   : > { %v3073_v47 = vpop.eup %3072  ;;  %v1869_v48 = vadd.f32 %v1868_v43, %v1700_v44 }
 0x240   : > { %2018 = vst [vmem:[%s3291_s24 + $0x180] sm:$0xff] %v3073_v47 }
 0x241   : > { %3074 = vtanh.f32 %v1869_v48 }
 0x244   : > { %v1702_v50 = vpop.f32.mrf.mxu2  ;;  %v1366_v53 = vpop.f32.mrf.mxu0 }
 0x245   : > { %v1871_v51 = vpop.f32.mrf.mxu3  ;;  %v1703_v52 = vadd.f32 %v1702_v50, %v1534_v49  ;;  %v1535_v54 = vpop.f32.mrf.mxu1 }
 0x246   : > { %v1536_v57 = vadd.f32 %v1535_v54, %v1366_v53 }
 0x247   : > { %v3075_v55 = vpop.eup %3074  ;;  %v1872_v56 = vadd.f32 %v1871_v51, %v1703_v52 }
 0x248   : > { %2019 = vst [vmem:[%s3291_s24 + $0x188] sm:$0xff] %v3075_v55 }
 0x249   : > { %3076 = vtanh.f32 %v1872_v56 }
 0x24c   : > { %v1704_v58 = vpop.f32.mrf.mxu2  ;;  %v1369_v61 = vpop.f32.mrf.mxu0 }
 0x24d   : > { %v1873_v59 = vpop.f32.mrf.mxu3  ;;  %v1705_v60 = vadd.f32 %v1704_v58, %v1536_v57  ;;  %v1538_v62 = vpop.f32.mrf.mxu1 }
 0x24e   : > { %v1539_v1 = vadd.f32 %v1538_v62, %v1369_v61 }
 0x24f   : > { %v3077_v63 = vpop.eup %3076  ;;  %v1874_v0 = vadd.f32 %v1873_v59, %v1705_v60 }
 0x250   : > { %2020 = vst [vmem:[%s3291_s24 + $0x190] sm:$0xff] %v3077_v63 }
 0x251   : > { %3078 = vtanh.f32 %v1874_v0 }
 0x254   : > { %v1707_v2 = vpop.f32.mrf.mxu2  ;;  %v1371_v5 = vpop.f32.mrf.mxu0 }
 0x255   : > { %v1876_v3 = vpop.f32.mrf.mxu3  ;;  %v1708_v4 = vadd.f32 %v1707_v2, %v1539_v1  ;;  %v1540_v6 = vpop.f32.mrf.mxu1 }
 0x256   : > { %v1541_v9 = vadd.f32 %v1540_v6, %v1371_v5 }
 0x257   : > { %v3079_v7 = vpop.eup %3078  ;;  %v1877_v8 = vadd.f32 %v1876_v3, %v1708_v4 }
 0x258   : > { %2021 = vst [vmem:[%s3291_s24 + $0x198] sm:$0xff] %v3079_v7 }
 0x259   : > { %3080 = vtanh.f32 %v1877_v8 }
 0x25c   : > { %v1709_v10 = vpop.f32.mrf.mxu2  ;;  %v1374_v13 = vpop.f32.mrf.mxu0 }
 0x25d   : > { %v1878_v11 = vpop.f32.mrf.mxu3  ;;  %v1710_v12 = vadd.f32 %v1709_v10, %v1541_v9  ;;  %v1543_v14 = vpop.f32.mrf.mxu1 }
 0x25e   : > { %v1544_v17 = vadd.f32 %v1543_v14, %v1374_v13 }
 0x25f   : > { %v3081_v15 = vpop.eup %3080  ;;  %v1879_v16 = vadd.f32 %v1878_v11, %v1710_v12 }
 0x260   : > { %2022 = vst [vmem:[%s3291_s24 + $0x1a0] sm:$0xff] %v3081_v15 }
 0x261   : > { %3082 = vtanh.f32 %v1879_v16 }
 0x264   : > { %v1712_v18 = vpop.f32.mrf.mxu2  ;;  %v1376_v21 = vpop.f32.mrf.mxu0 }
 0x265   : > { %v1881_v19 = vpop.f32.mrf.mxu3  ;;  %v1713_v20 = vadd.f32 %v1712_v18, %v1544_v17  ;;  %v1545_v22 = vpop.f32.mrf.mxu1 }
 0x266   : > { %v1546_v25 = vadd.f32 %v1545_v22, %v1376_v21 }
 0x267   : > { %v3083_v23 = vpop.eup %3082  ;;  %v1882_v24 = vadd.f32 %v1881_v19, %v1713_v20 }
 0x268   : > { %2023 = vst [vmem:[%s3291_s24 + $0x1a8] sm:$0xff] %v3083_v23 }
 0x269   : > { %3084 = vtanh.f32 %v1882_v24 }
 0x26c   : > { %v1714_v26 = vpop.f32.mrf.mxu2  ;;  %v1379_v29 = vpop.f32.mrf.mxu0 }
 0x26d   : > { %v1883_v27 = vpop.f32.mrf.mxu3  ;;  %v1715_v28 = vadd.f32 %v1714_v26, %v1546_v25  ;;  %v1548_v30 = vpop.f32.mrf.mxu1 }
 0x26e   : > { %v1549_v33 = vadd.f32 %v1548_v30, %v1379_v29 }
 0x26f   : > { %v3085_v31 = vpop.eup %3084  ;;  %v1884_v32 = vadd.f32 %v1883_v27, %v1715_v28 }
 0x270   : > { %2024 = vst [vmem:[%s3291_s24 + $0x1b0] sm:$0xff] %v3085_v31 }
 0x271   : > { %3086 = vtanh.f32 %v1884_v32 }
 0x274   : > { %v1717_v34 = vpop.f32.mrf.mxu2  ;;  %v1381_v37 = vpop.f32.mrf.mxu0 }
 0x275   : > { %v1886_v35 = vpop.f32.mrf.mxu3  ;;  %v1718_v36 = vadd.f32 %v1717_v34, %v1549_v33  ;;  %v1550_v38 = vpop.f32.mrf.mxu1 }
 0x276   : > { %v1551_v41 = vadd.f32 %v1550_v38, %v1381_v37 }
 0x277   : > { %v3087_v39 = vpop.eup %3086  ;;  %v1887_v40 = vadd.f32 %v1886_v35, %v1718_v36 }
 0x278   : > { %2025 = vst [vmem:[%s3291_s24 + $0x1b8] sm:$0xff] %v3087_v39 }
 0x279   : > { %3088 = vtanh.f32 %v1887_v40 }
 0x27c   : > { %v1719_v42 = vpop.f32.mrf.mxu2  ;;  %v1384_v45 = vpop.f32.mrf.mxu0 }
 0x27d   : > { %v1888_v43 = vpop.f32.mrf.mxu3  ;;  %v1720_v44 = vadd.f32 %v1719_v42, %v1551_v41  ;;  %v1553_v46 = vpop.f32.mrf.mxu1 }
 0x27e   : > { %v1554_v49 = vadd.f32 %v1553_v46, %v1384_v45 }
 0x27f   : > { %v3089_v47 = vpop.eup %3088  ;;  %v1889_v48 = vadd.f32 %v1888_v43, %v1720_v44 }
 0x280   : > { %2026 = vst [vmem:[%s3291_s24 + $0x1c0] sm:$0xff] %v3089_v47 }
 0x281   : > { %3090 = vtanh.f32 %v1889_v48 }
 0x284   : > { %v1722_v50 = vpop.f32.mrf.mxu2  ;;  %v1386_v53 = vpop.f32.mrf.mxu0 }
 0x285   : > { %v1891_v51 = vpop.f32.mrf.mxu3  ;;  %v1723_v52 = vadd.f32 %v1722_v50, %v1554_v49  ;;  %v1555_v54 = vpop.f32.mrf.mxu1 }
 0x286   : > { %v1556_v57 = vadd.f32 %v1555_v54, %v1386_v53 }
 0x287   : > { %v3091_v55 = vpop.eup %3090  ;;  %v1892_v56 = vadd.f32 %v1891_v51, %v1723_v52 }
 0x288   : > { %2027 = vst [vmem:[%s3291_s24 + $0x1c8] sm:$0xff] %v3091_v55 }
 0x289   : > { %3092 = vtanh.f32 %v1892_v56 }
 0x28c   : > { %v1724_v58 = vpop.f32.mrf.mxu2  ;;  %v1389_v61 = vpop.f32.mrf.mxu0 }
 0x28d   : > { %v1893_v59 = vpop.f32.mrf.mxu3  ;;  %v1725_v60 = vadd.f32 %v1724_v58, %v1556_v57  ;;  %v1558_v62 = vpop.f32.mrf.mxu1 }
 0x28e   : > { %v1559_v1 = vadd.f32 %v1558_v62, %v1389_v61 }
 0x28f   : > { %v3093_v63 = vpop.eup %3092  ;;  %v1894_v0 = vadd.f32 %v1893_v59, %v1725_v60 }
 0x290   : > { %2028 = vst [vmem:[%s3291_s24 + $0x1d0] sm:$0xff] %v3093_v63 }
 0x291   : > { %3094 = vtanh.f32 %v1894_v0 }
 0x294   : > { %v1727_v2 = vpop.f32.mrf.mxu2  ;;  %v1391_v5 = vpop.f32.mrf.mxu0 }
 0x295   : > { %v1896_v3 = vpop.f32.mrf.mxu3  ;;  %v1728_v4 = vadd.f32 %v1727_v2, %v1559_v1  ;;  %v1560_v6 = vpop.f32.mrf.mxu1 }
 0x296   : > { %v1561_v9 = vadd.f32 %v1560_v6, %v1391_v5 }
 0x297   : > { %v3095_v7 = vpop.eup %3094  ;;  %v1897_v8 = vadd.f32 %v1896_v3, %v1728_v4 }
 0x298   : > { %2029 = vst [vmem:[%s3291_s24 + $0x1d8] sm:$0xff] %v3095_v7 }
 0x299   : > { %3096 = vtanh.f32 %v1897_v8 }
 0x29c   : > { %v1729_v10 = vpop.f32.mrf.mxu2  ;;  %v1394_v13 = vpop.f32.mrf.mxu0 }
 0x29d   : > { %v1898_v11 = vpop.f32.mrf.mxu3  ;;  %v1730_v12 = vadd.f32 %v1729_v10, %v1561_v9  ;;  %v1563_v14 = vpop.f32.mrf.mxu1 }
 0x29e   : > { %v1564_v17 = vadd.f32 %v1563_v14, %v1394_v13 }
 0x29f   : > { %v3097_v15 = vpop.eup %3096  ;;  %v1899_v16 = vadd.f32 %v1898_v11, %v1730_v12 }
 0x2a0   : > { %2030 = vst [vmem:[%s3291_s24 + $0x1e0] sm:$0xff] %v3097_v15 }
 0x2a1   : > { %3098 = vtanh.f32 %v1899_v16 }
 0x2a4   : > { %v1732_v18 = vpop.f32.mrf.mxu2  ;;  %v1396_v23 = vpop.f32.mrf.mxu0 }
 0x2a5   : > { %v1901_v19 = vpop.f32.mrf.mxu3  ;;  %v1733_v20 = vadd.f32 %v1732_v18, %v1564_v17  ;;  %v1565_v24 = vpop.f32.mrf.mxu1 }
 0x2a6   : > { %v1566_v25 = vadd.f32 %v1565_v24, %v1396_v23 }
 0x2a7   : > { %v3099_v21 = vpop.eup %3098  ;;  %v1902_v22 = vadd.f32 %v1901_v19, %v1733_v20 }
 0x2a8   : > { %2031 = vst [vmem:[%s3291_s24 + $0x1e8] sm:$0xff] %v3099_v21 }
 0x2a9   : > { %3100 = vtanh.f32 %v1902_v22 }
 0x2ac   : > { %v1734_v26 = vpop.f32.mrf.mxu2 }
 0x2ad   : > { %v1735_v27 = vadd.f32 %v1734_v26, %v1566_v25  ;;  %v1903_v28 = vpop.f32.mrf.mxu3 }
 0x2af   : > { %v3101_v29 = vpop.eup %3100  ;;  %v1904_v30 = vadd.f32 %v1903_v28, %v1735_v27 }
 0x2b0   : > { %2032 = vst [vmem:[%s3291_s24 + $0x1f0] sm:$0xff] %v3101_v29 }
 0x2b1   : > { %3102 = vtanh.f32 %v1904_v30 }
 0x2b7   : > { %v3103_v31 = vpop.eup %3102 }
 0x2b8   : > { %2033 = vst [vmem:[%s3291_s24 + $0x1f8] sm:$0xff] %v3103_v31 }
 0x2b9 PF: > { %s12_s11 = sadd.s32 1, %s3126_s11   ;;  %s3545_s9 = smov %s3122_s10 }
 0x2ba   : > { %p9_p5 = scmp.ge.s32.totalorder %s12_s11, 6   ;;  %s3546_s10 = smov %s3548_s12 }
 0x2bc   :  { %11 = sbr.rel (!%p9_p5) target bundleno = 2 (0x2), region = 61 }

</bundles_post_ra>
